<compile_context>
chip_gen: v6e
topology: v6e:2x2x1
jax: 0.10.0
libtpu: 0.0.40
codegen_flags: <defaults>
</compile_context>

<pallas_src>
import functools

import jax
import jax.numpy as jnp
from jax.experimental import pallas as pl
from jax.experimental.pallas import tpu as pltpu

# Older jax fallback (name changed from TPUCompilerParams -> CompilerParams).
_CompilerParams = getattr(pltpu, "CompilerParams", None) or getattr(
    pltpu, "TPUCompilerParams")

_LANE = 128
_VMEM_BUDGET = 24 << 20      # target double-buffered working set (all gens)
_VMEM_LIMIT = 48 << 20       # scoped-VMEM limit; < v7x's 64 MiB physical


def _round_up(x, m):
    return (x + m - 1) // m * m


def _pick_div(dim, cap, align):
    """Largest multiple of `align` that is <= cap and divides `dim` (or None)."""
    t = (min(cap, dim) // align) * align
    while t >= align:
        if dim % t == 0:
            return t
        t -= align
    return None


def _plan_tiles(M, Np, k_list, out_itemsize):
    """Pick (tm, tn, Mp): full-extent blocks when they fit (no (8,128)
    constraint, minimal padding), otherwise aligned divisors shrunk to the
    double-buffered VMEM budget."""

    def ws(tm, tn):
        b = sum(4 * (tm * K + K * tn) for K in k_list)   # bf16 ins, x2 buffers
        b += 2 * (tn * 4 + tm * tn * out_itemsize)       # bias + out tile
        return b

    tn_cap, tm_cap, full_m_cap = 512, 512, 1024          # 256-multiples (MXU)

    tn = Np if Np <= tn_cap else (_pick_div(Np, tn_cap, _LANE) or _LANE)

    if M <= full_m_cap:
        Mp = _round_up(M, 8)                             # keep sublane-aligned
        tm = Mp
    else:
        tm = _pick_div(M, tm_cap, 16)
        if tm is None:                                   # awkward M: pad rows
            tm, Mp = tm_cap, _round_up(M, tm_cap)
        else:
            Mp = M

    while ws(tm, tn) > _VMEM_BUDGET and tn > _LANE:
        tn = _pick_div(Np, tn // 2, _LANE) or _LANE
    while ws(tm, tn) > _VMEM_BUDGET:
        nt = _pick_div(Mp, tm // 2, 16)
        if nt is None:
            break
        tm = nt
    return tm, tn, Mp


# ----------------------------------------------------------------------------
# Pallas kernel:  out = act(sum_i A_i @ B_i + bias)   (full-K blocks, no acc)
# ----------------------------------------------------------------------------
def _mm_kernel(act, n_pairs, *refs):
    a_refs = refs[:n_pairs]
    b_refs = refs[n_pairs:2 * n_pairs]
    bias_ref = refs[2 * n_pairs]
    o_ref = refs[2 * n_pairs + 1]

    acc = jnp.dot(a_refs[0][...], b_refs[0][...],
                  preferred_element_type=jnp.float32)
    for p in range(1, n_pairs):
        acc = acc + jnp.dot(a_refs[p][...], b_refs[p][...],
                            preferred_element_type=jnp.float32)
    r = acc + bias_ref[...]                               # (tm,tn) + (1,tn)
    if act == "relu":
        r = jnp.maximum(r, 0.0)
    elif act == "sigmoid":
        # exp + approx reciprocal go to the EUP slot; clip keeps output in [0,1].
        r = jnp.clip(pl.reciprocal(1.0 + jnp.exp(-r), approx=True), 0.0, 1.0)
    o_ref[...] = r.astype(o_ref.dtype)


def matmul_bias_act(a_list, b_list, bias_p, act="none", out_dtype=jnp.bfloat16):
    """out = act(sum_i a_i @ b_i + bias).

    a_i: (M, K_i) activations (cast to bf16 here; already bf16 in practice).
    b_i: (K_i, Np) pre-padded bf16 weights (Np multiple of 128).
    bias_p: (1, Np) f32.  Returns (M, Np); caller slices the real N columns.
    """
    n_pairs = len(a_list)
    M = a_list[0].shape[0]
    Np = b_list[0].shape[1]
    k_list = [a.shape[1] for a in a_list]
    for a, b in zip(a_list, b_list):
        assert a.shape[0] == M and a.shape[1] == b.shape[0] and b.shape[1] == Np

    out_itemsize = jnp.dtype(out_dtype).itemsize
    tm, tn, Mp = _plan_tiles(M, Np, k_list, out_itemsize)

    a_ops = []
    for a in a_list:
        a = a.astype(jnp.bfloat16)
        if Mp != M:
            a = jnp.pad(a, ((0, Mp - M), (0, 0)))
        a_ops.append(a)

    grid = (Mp // tm, Np // tn)
    in_specs = (
        [pl.BlockSpec((tm, K), lambda i, j: (i, 0)) for K in k_list]
        + [pl.BlockSpec((K, tn), lambda i, j: (0, j)) for K in k_list]
        + [pl.BlockSpec((1, tn), lambda i, j: (0, j))])

    flops = 2 * Mp * Np * sum(k_list)
    bytes_accessed = (sum(Mp * K * 2 + K * Np * 2 for K in k_list)
                      + Mp * Np * out_itemsize + Np * 4)

    out = pl.pallas_call(
        functools.partial(_mm_kernel, act, n_pairs),
        out_shape=jax.ShapeDtypeStruct((Mp, Np), out_dtype),
        grid=grid,
        in_specs=in_specs,
        out_specs=pl.BlockSpec((tm, tn), lambda i, j: (i, j)),
        compiler_params=_CompilerParams(
            dimension_semantics=("parallel", "parallel"),
            vmem_limit_bytes=_VMEM_LIMIT),
        cost_estimate=pl.CostEstimate(
            flops=flops,
            transcendentals=Mp * Np if act == "sigmoid" else 0,
            bytes_accessed=bytes_accessed),
    )(*a_ops, *b_list, bias_p)

    if Mp != M:
        out = out[:M]
    return out


# ----------------------------------------------------------------------------
# im2col (NHWC, XLA glue) + conv wrappers
# ----------------------------------------------------------------------------
def _im2col_nhwc(xp, kh, kw, stride, Ho, Wo):
    """xp: padded (N,Hp,Wp,C) -> (N*Ho*Wo, kh*kw*C); cols ordered (kh,kw,C)."""
    N = xp.shape[0]
    C = xp.shape[3]
    patches = []
    for i in range(kh):
        for j in range(kw):
            patches.append(
                xp[:, i:i + stride * Ho:stride, j:j + stride * Wo:stride, :])
    p = jnp.stack(patches, axis=3)            # (N, Ho, Wo, kh*kw, C)
    return p.reshape(N * Ho * Wo, kh * kw * C)


def conv2d_s2(x, wmat, bias_p, cout, act, out_dtype=jnp.bfloat16):
    """PyTorch Conv2d(k=4, s=2, p=1).  x NHWC, wmat pre-packed (16*Cin, Np)."""
    B, H, W, _ = x.shape
    Ho, Wo = H // 2, W // 2
    xp = jnp.pad(x, ((0, 0), (1, 1), (1, 1), (0, 0)))
    cols = _im2col_nhwc(xp, 4, 4, 2, Ho, Wo)
    out = matmul_bias_act([cols], [wmat], bias_p, act, out_dtype)
    if out.shape[1] != cout:
        out = out[:, :cout]
    return out.reshape(B, Ho, Wo, cout)                       # stays NHWC


def conv_transpose2d_s2(inputs, bias_p, cout, act, out_dtype=jnp.bfloat16):
    """PyTorch ConvTranspose2d(k=4, s=2, p=1) via 4-phase sub-pixel decomposition.

    inputs: list of (x NHWC, wmat) pairs sharing the spatial dims; each wmat is
    a pre-packed (4*Cin_i, Np) block (Np = round_up(4*Cout, 128)).  Multiple
    pairs implement the skip-connection concat without a concat in HBM.
    """
    B, H, W, _ = inputs[0][0].shape
    a_list, b_list = [], []
    for x, wmat in inputs:
        xp = jnp.pad(x, ((0, 0), (1, 1), (1, 1), (0, 0)))     # (B,H+2,W+2,Cin)
        a_list.append(_im2col_nhwc(xp, 2, 2, 1, H + 1, W + 1))
        b_list.append(wmat)
    o = matmul_bias_act(a_list, b_list, bias_p, act, out_dtype)
    if o.shape[1] != 4 * cout:
        o = o[:, :4 * cout]
    o = o.reshape(B, H + 1, W + 1, 2, 2, cout)
    # out[b, 2j+py, 2i+px, c] = o[b, j+py, i+px, py, px, c]
    rows = []
    for py in (0, 1):
        parts = [o[:, py:py + H, px:px + W, py, px, :] for px in (0, 1)]
        rows.append(jnp.stack(parts, axis=0))                 # (2, B, H, W, C)
    stacked = jnp.stack(rows, axis=0)                         # (2, 2, B, H, W, C)
    out = stacked.transpose(2, 3, 0, 4, 1, 5)                 # (B, H, 2, W, 2, C)
    return out.reshape(B, 2 * H, 2 * W, cout)


# ----------------------------------------------------------------------------
# One-time weight layout preparation (hoisted out of the forward pass)
# ----------------------------------------------------------------------------
def _prep_conv_w(w):
    """(Cout, Cin, 4, 4) -> bf16 (16*Cin, Np), rows ordered (ky, kx, Cin)."""
    cout, cin, kh, kw = w.shape
    m = w.transpose(2, 3, 1, 0).reshape(kh * kw * cin, cout)
    np_ = _round_up(cout, _LANE)
    return jnp.pad(m, ((0, 0), (0, np_ - cout))).astype(jnp.bfloat16)


# Output parity -> (kernel tap for window offset 0, tap for window offset 1).
_TAPS = ((3, 1), (2, 0))


def _prep_convt_w(w):
    """(Cin, Cout, 4, 4) -> bf16 (4*Cin, Np) of per-parity 2x2 sub-kernels."""
    cin, cout = w.shape[:2]
    blocks = []
    for py in (0, 1):
        for px in (0, 1):
            sub = jnp.take(w, jnp.array(_TAPS[py]), axis=2)
            sub = jnp.take(sub, jnp.array(_TAPS[px]), axis=3)   # (Cin,Cout,2,2)
            blocks.append(sub.transpose(2, 3, 0, 1).reshape(4 * cin, cout))
    m = jnp.concatenate(blocks, axis=1)                         # (4Cin, 4Cout)
    np_ = _round_up(4 * cout, _LANE)
    return jnp.pad(m, ((0, 0), (0, np_ - 4 * cout))).astype(jnp.bfloat16)


def _pad_bias(b, np_):
    return jnp.pad(b.astype(jnp.float32), (0, np_ - b.shape[0])).reshape(1, np_)


def prepare_params(raw):
    p = {}
    for n in ("enc1", "enc2", "enc3", "enc4", "enc5"):
        w = raw[n + "_w"]
        cout = w.shape[0]
        p[n + "_w"] = _prep_conv_w(w)
        p[n + "_b"] = _pad_bias(raw[n + "_b"], _round_up(cout, _LANE))
    # fc_mu / fc_logvar fused (shared A read); fc GEMMs stay in XLA (tiny M).
    p["fc_mulv_w"] = jnp.concatenate(
        [raw["fc_mu_w"].T, raw["fc_logvar_w"].T], axis=1).astype(jnp.float32)
    p["fc_mulv_b"] = jnp.concatenate(
        [raw["fc_mu_b"], raw["fc_logvar_b"]]).astype(jnp.float32)
    p["fc_dec_w"] = raw["fc_dec_w"].T.astype(jnp.float32)
    p["fc_dec_b"] = raw["fc_dec_b"].astype(jnp.float32)
    # Decoder: dec5 single path; dec4..dec1 split rows into upsample/skip halves
    # so the forward pass never concatenates activations in HBM.
    skip_ch = {4: raw["enc4_w"].shape[0], 3: raw["enc3_w"].shape[0],
               2: raw["enc2_w"].shape[0], 1: raw["enc1_w"].shape[0]}
    for k in (5, 4, 3, 2, 1):
        w = raw[f"dec{k}_w"]
        cout = w.shape[1]
        np_ = _round_up(4 * cout, _LANE)
        p[f"dec{k}_b"] = _pad_bias(jnp.tile(raw[f"dec{k}_b"], 4), np_)
        if k == 5:
            p["dec5_w"] = _prep_convt_w(w)
        else:
            cu = w.shape[0] - skip_ch[k]
            p[f"dec{k}_wu"] = _prep_convt_w(w[:cu])     # rows for upsample path
            p[f"dec{k}_ws"] = _prep_convt_w(w[cu:])     # rows for encoder skip
    return p


# ----------------------------------------------------------------------------
# Synthetic parameter init (PyTorch layouts)
# ----------------------------------------------------------------------------
def init_raw_params(key, z_dim, in_ch, base, img_size):
    C = base * 8
    h = w = img_size // 2 ** 5
    feat = C * h * w
    keys = iter(jax.random.split(key, 40))

    def conv_w(cout, cin):
        return jax.random.normal(next(keys), (cout, cin, 4, 4), jnp.float32) * 0.05

    def convt_w(cin, cout):
        return jax.random.normal(next(keys), (cin, cout, 4, 4), jnp.float32) * 0.05

    def lin_w(o, i):
        return jax.random.normal(next(keys), (o, i), jnp.float32) * 0.05

    def bias(n):
        return jax.random.normal(next(keys), (n,), jnp.float32) * 0.01

    return {
        "enc1_w": conv_w(base, in_ch), "enc1_b": bias(base),
        "enc2_w": conv_w(base * 2, base), "enc2_b": bias(base * 2),
        "enc3_w": conv_w(base * 4, base * 2), "enc3_b": bias(base * 4),
        "enc4_w": conv_w(base * 8, base * 4), "enc4_b": bias(base * 8),
        "enc5_w": conv_w(base * 8, base * 8), "enc5_b": bias(base * 8),
        "fc_mu_w": lin_w(z_dim, feat), "fc_mu_b": bias(z_dim),
        "fc_logvar_w": lin_w(z_dim, feat), "fc_logvar_b": bias(z_dim),
        "fc_dec_w": lin_w(feat, z_dim), "fc_dec_b": bias(feat),
        "dec5_w": convt_w(C, C), "dec5_b": bias(C),
        "dec4_w": convt_w(C + base * 8, base * 4), "dec4_b": bias(base * 4),
        "dec3_w": convt_w(base * 4 + base * 4, base * 2), "dec3_b": bias(base * 2),
        "dec2_w": convt_w(base * 2 + base * 2, base), "dec2_b": bias(base),
        "dec1_w": convt_w(base + base, in_ch), "dec1_b": bias(in_ch),
    }


# ----------------------------------------------------------------------------
# Forward pass (mirrors ConvVAE.forward); static dims captured by closure.
# ----------------------------------------------------------------------------
def make_forward(z_dim, in_ch, base, img_size):
    C = base * 8
    h = w = img_size // 2 ** 5
    cout = {"enc1": base, "enc2": base * 2, "enc3": base * 4,
            "enc4": base * 8, "enc5": base * 8,
            "dec5": C, "dec4": base * 4, "dec3": base * 2,
            "dec2": base, "dec1": in_ch}

    def forward(params, x, eps_key):
        B = x.shape[0]
        xh = jnp.transpose(x, (0, 2, 3, 1)).astype(jnp.bfloat16)   # NCHW->NHWC

        # ---- encode ----
        e1 = conv2d_s2(xh, params["enc1_w"], params["enc1_b"], cout["enc1"], "relu")
        e2 = conv2d_s2(e1, params["enc2_w"], params["enc2_b"], cout["enc2"], "relu")
        e3 = conv2d_s2(e2, params["enc3_w"], params["enc3_b"], cout["enc3"], "relu")
        e4 = conv2d_s2(e3, params["enc4_w"], params["enc4_b"], cout["enc4"], "relu")
        e5 = conv2d_s2(e4, params["enc5_w"], params["enc5_b"], cout["enc5"], "relu")
        # torch .view(B,-1) flattens NCHW order -> transpose the tiny e5 back.
        flat = jnp.transpose(e5, (0, 3, 1, 2)).reshape(B, -1).astype(jnp.float32)
        # Tiny fc GEMMs (M = batch): plain XLA dot per perf review.
        mulv = flat @ params["fc_mulv_w"] + params["fc_mulv_b"]
        mu, logvar = mulv[:, :z_dim], mulv[:, z_dim:]

        # ---- reparameterize (tiny elementwise op -> plain XLA) ----
        eps = jax.random.normal(eps_key, mu.shape, jnp.float32)
        z = mu + eps * jnp.exp(0.5 * logvar)

        # ---- decode ----
        feat = (z @ params["fc_dec_w"] + params["fc_dec_b"]).astype(jnp.bfloat16)
        d5i = jnp.transpose(feat.reshape(B, C, h, w), (0, 2, 3, 1))   # -> NHWC
        d5 = conv_transpose2d_s2([(d5i, params["dec5_w"])],
                                 params["dec5_b"], cout["dec5"], "relu")
        d4 = conv_transpose2d_s2([(d5, params["dec4_wu"]), (e4, params["dec4_ws"])],
                                 params["dec4_b"], cout["dec4"], "relu")
        d3 = conv_transpose2d_s2([(d4, params["dec3_wu"]), (e3, params["dec3_ws"])],
                                 params["dec3_b"], cout["dec3"], "relu")
        d2 = conv_transpose2d_s2([(d3, params["dec2_wu"]), (e2, params["dec2_ws"])],
                                 params["dec2_b"], cout["dec2"], "relu")
        out = conv_transpose2d_s2([(d2, params["dec1_wu"]), (e1, params["dec1_ws"])],
                                  params["dec1_b"], cout["dec1"], "sigmoid",
                                  jnp.float32)
        return jnp.transpose(out, (0, 3, 1, 2)), mu, logvar    # NHWC -> NCHW

    return forward


# ----------------------------------------------------------------------------
if __name__ == "__main__":
    # Small but structurally-consistent config (img_size divisible by 32).
    Z_DIM, IN_CH, BASE, IMG, BATCH = 8, 1, 4, 32, 2

    root = jax.random.PRNGKey(0)
    k_param, k_x, k_eps = jax.random.split(root, 3)

    raw_params = init_raw_params(k_param, Z_DIM, IN_CH, BASE, IMG)
    params = prepare_params(raw_params)            # one-time layout prep
    x = jax.random.normal(k_x, (BATCH, IN_CH, IMG, IMG), jnp.float32)

    fwd = jax.jit(make_forward(Z_DIM, IN_CH, BASE, IMG))
    x_recon, mu, logvar = fwd(params, x, k_eps)
    jax.block_until_ready((x_recon, mu, logvar))

    assert x_recon.shape == (BATCH, IN_CH, IMG, IMG)
    assert mu.shape == (BATCH, Z_DIM) and logvar.shape == (BATCH, Z_DIM)
    assert bool(jnp.all(jnp.isfinite(x_recon)))
    assert bool(jnp.all((x_recon >= 0.0) & (x_recon <= 1.0)))   # sigmoid range
    print("KERNEL_OK")
</pallas_src>

<mosaic_0001>
module attributes {stable_mosaic.version = 11 : i64} {
  func.func @_mm_kernel(%arg0: i32, %arg1: i32, %arg2: memref<512x16xbf16, #tpu.memory_space<vmem>>, %arg3: memref<16x128xbf16, #tpu.memory_space<vmem>>, %arg4: memref<1x128xf32, #tpu.memory_space<vmem>>, %arg5: memref<512x128xbf16, #tpu.memory_space<vmem>>) attributes {dimension_semantics = [#tpu.dimension_semantics<parallel>, #tpu.dimension_semantics<parallel>], iteration_bounds = array<i64: 1, 1>, scalar_prefetch = 0 : i64, scratch_operands = 0 : i64, tpu.core_type = #tpu.core_type<tc>, window_params = [{transform_indices = @transform_0, window_bounds = array<i64: 512, 16>}, {transform_indices = @transform_1, window_bounds = array<i64: 16, 128>}, {transform_indices = @transform_2, window_bounds = array<i64: 1, 128>}, {transform_indices = @transform_3, window_bounds = array<i64: 512, 128>}]} {
    %c0 = arith.constant 0 : index
    %c0_0 = arith.constant 0 : index
    %0 = vector.load %arg2[%c0, %c0_0] : memref<512x16xbf16, #tpu.memory_space<vmem>>, vector<512x16xbf16>
    %c0_1 = arith.constant 0 : index
    %c0_2 = arith.constant 0 : index
    %1 = vector.load %arg3[%c0_1, %c0_2] : memref<16x128xbf16, #tpu.memory_space<vmem>>, vector<16x128xbf16>
    %cst = arith.constant dense<0.000000e+00> : vector<512x128xf32>
    %2 = tpu.matmul %0, %1, %cst {dimension_numbers = #tpu.dot_dimension_numbers<[1], [0], [0], [1], [0, 0, 1, 1], [], []>} : vector<512x16xbf16>, vector<16x128xbf16>, vector<512x128xf32> -> vector<512x128xf32>
    %c0_3 = arith.constant 0 : index
    %c0_4 = arith.constant 0 : index
    %3 = vector.load %arg4[%c0_3, %c0_4] : memref<1x128xf32, #tpu.memory_space<vmem>>, vector<1x128xf32>
    %4 = vector.broadcast %3 : vector<1x128xf32> to vector<512x128xf32>
    %5 = arith.addf %2, %4 : vector<512x128xf32>
    %cst_5 = arith.constant 0.000000e+00 : f32
    %6 = vector.broadcast %cst_5 : f32 to vector<512x128xf32>
    %7 = arith.maximumf %5, %6 : vector<512x128xf32>
    %8 = arith.truncf %7 : vector<512x128xf32> to vector<512x128xbf16>
    %c0_6 = arith.constant 0 : index
    %c0_7 = arith.constant 0 : index
    %9 = vector.load %arg5[%c0_6, %c0_7] : memref<512x128xbf16, #tpu.memory_space<vmem>>, vector<512x128xbf16>
    tpu.vector_store %arg5[%c0_6, %c0_7], %8 {strides = array<i32>} : memref<512x128xbf16, #tpu.memory_space<vmem>>, vector<512x128xbf16>,
    return
  }
  func.func @transform_0(%arg0: i32, %arg1: i32) -> (i32, i32) {
    %c0_i32 = arith.constant 0 : i32
    %c0_i32_0 = arith.constant 0 : i32
    return %arg0, %c0_i32 : i32, i32
  }
  func.func @transform_1(%arg0: i32, %arg1: i32) -> (i32, i32) {
    %c0_i32 = arith.constant 0 : i32
    %c0_i32_0 = arith.constant 0 : i32
    return %c0_i32, %arg1 : i32, i32
  }
  func.func @transform_2(%arg0: i32, %arg1: i32) -> (i32, i32) {
    %c0_i32 = arith.constant 0 : i32
    %c0_i32_0 = arith.constant 0 : i32
    return %c0_i32, %arg1 : i32, i32
  }
  func.func @transform_3(%arg0: i32, %arg1: i32) -> (i32, i32) {
    %c0_i32 = arith.constant 0 : i32
    return %arg0, %arg1 : i32, i32
  }
}

module attributes {stable_mosaic.version = 11 : i64} {
  func.func @_mm_kernel(%arg0: i32, %arg1: i32, %arg2: memref<128x64xbf16, #tpu.memory_space<vmem>>, %arg3: memref<64x128xbf16, #tpu.memory_space<vmem>>, %arg4: memref<1x128xf32, #tpu.memory_space<vmem>>, %arg5: memref<128x128xbf16, #tpu.memory_space<vmem>>) attributes {dimension_semantics = [#tpu.dimension_semantics<parallel>, #tpu.dimension_semantics<parallel>], iteration_bounds = array<i64: 1, 1>, scalar_prefetch = 0 : i64, scratch_operands = 0 : i64, tpu.core_type = #tpu.core_type<tc>, window_params = [{transform_indices = @transform_0, window_bounds = array<i64: 128, 64>}, {transform_indices = @transform_1, window_bounds = array<i64: 64, 128>}, {transform_indices = @transform_2, window_bounds = array<i64: 1, 128>}, {transform_indices = @transform_3, window_bounds = array<i64: 128, 128>}]} {
    %c0 = arith.constant 0 : index
    %c0_0 = arith.constant 0 : index
    %0 = vector.load %arg2[%c0, %c0_0] : memref<128x64xbf16, #tpu.memory_space<vmem>>, vector<128x64xbf16>
    %c0_1 = arith.constant 0 : index
    %c0_2 = arith.constant 0 : index
    %1 = vector.load %arg3[%c0_1, %c0_2] : memref<64x128xbf16, #tpu.memory_space<vmem>>, vector<64x128xbf16>
    %cst = arith.constant dense<0.000000e+00> : vector<128x128xf32>
    %2 = tpu.matmul %0, %1, %cst {dimension_numbers = #tpu.dot_dimension_numbers<[1], [0], [0], [1], [0, 0, 1, 1], [], []>} : vector<128x64xbf16>, vector<64x128xbf16>, vector<128x128xf32> -> vector<128x128xf32>
    %c0_3 = arith.constant 0 : index
    %c0_4 = arith.constant 0 : index
    %3 = vector.load %arg4[%c0_3, %c0_4] : memref<1x128xf32, #tpu.memory_space<vmem>>, vector<1x128xf32>
    %4 = vector.broadcast %3 : vector<1x128xf32> to vector<128x128xf32>
    %5 = arith.addf %2, %4 : vector<128x128xf32>
    %cst_5 = arith.constant 0.000000e+00 : f32
    %6 = vector.broadcast %cst_5 : f32 to vector<128x128xf32>
    %7 = arith.maximumf %5, %6 : vector<128x128xf32>
    %8 = arith.truncf %7 : vector<128x128xf32> to vector<128x128xbf16>
    %c0_6 = arith.constant 0 : index
    %c0_7 = arith.constant 0 : index
    %9 = vector.load %arg5[%c0_6, %c0_7] : memref<128x128xbf16, #tpu.memory_space<vmem>>, vector<128x128xbf16>
    tpu.vector_store %arg5[%c0_6, %c0_7], %8 {strides = array<i32>} : memref<128x128xbf16, #tpu.memory_space<vmem>>, vector<128x128xbf16>,
    return
  }
  func.func @transform_0(%arg0: i32, %arg1: i32) -> (i32, i32) {
    %c0_i32 = arith.constant 0 : i32
    %c0_i32_0 = arith.constant 0 : i32
    return %arg0, %c0_i32 : i32, i32
  }
  func.func @transform_1(%arg0: i32, %arg1: i32) -> (i32, i32) {
    %c0_i32 = arith.constant 0 : i32
    %c0_i32_0 = arith.constant 0 : i32
    return %c0_i32, %arg1 : i32, i32
  }
  func.func @transform_2(%arg0: i32, %arg1: i32) -> (i32, i32) {
    %c0_i32 = arith.constant 0 : i32
    %c0_i32_0 = arith.constant 0 : i32
    return %c0_i32, %arg1 : i32, i32
  }
  func.func @transform_3(%arg0: i32, %arg1: i32) -> (i32, i32) {
    %c0_i32 = arith.constant 0 : i32
    return %arg0, %arg1 : i32, i32
  }
}

module attributes {stable_mosaic.version = 11 : i64} {
  func.func @_mm_kernel(%arg0: i32, %arg1: i32, %arg2: memref<32x128xbf16, #tpu.memory_space<vmem>>, %arg3: memref<128x128xbf16, #tpu.memory_space<vmem>>, %arg4: memref<1x128xf32, #tpu.memory_space<vmem>>, %arg5: memref<32x128xbf16, #tpu.memory_space<vmem>>) attributes {dimension_semantics = [#tpu.dimension_semantics<parallel>, #tpu.dimension_semantics<parallel>], iteration_bounds = array<i64: 1, 1>, scalar_prefetch = 0 : i64, scratch_operands = 0 : i64, tpu.core_type = #tpu.core_type<tc>, window_params = [{transform_indices = @transform_0, window_bounds = array<i64: 32, 128>}, {transform_indices = @transform_1, window_bounds = array<i64: 128, 128>}, {transform_indices = @transform_2, window_bounds = array<i64: 1, 128>}, {transform_indices = @transform_3, window_bounds = array<i64: 32, 128>}]} {
    %c0 = arith.constant 0 : index
    %c0_0 = arith.constant 0 : index
    %0 = vector.load %arg2[%c0, %c0_0] : memref<32x128xbf16, #tpu.memory_space<vmem>>, vector<32x128xbf16>
    %c0_1 = arith.constant 0 : index
    %c0_2 = arith.constant 0 : index
    %1 = vector.load %arg3[%c0_1, %c0_2] : memref<128x128xbf16, #tpu.memory_space<vmem>>, vector<128x128xbf16>
    %cst = arith.constant dense<0.000000e+00> : vector<32x128xf32>
    %2 = tpu.matmul %0, %1, %cst {dimension_numbers = #tpu.dot_dimension_numbers<[1], [0], [0], [1], [0, 0, 1, 1], [], []>} : vector<32x128xbf16>, vector<128x128xbf16>, vector<32x128xf32> -> vector<32x128xf32>
    %c0_3 = arith.constant 0 : index
    %c0_4 = arith.constant 0 : index
    %3 = vector.load %arg4[%c0_3, %c0_4] : memref<1x128xf32, #tpu.memory_space<vmem>>, vector<1x128xf32>
    %4 = vector.broadcast %3 : vector<1x128xf32> to vector<32x128xf32>
    %5 = arith.addf %2, %4 : vector<32x128xf32>
    %cst_5 = arith.constant 0.000000e+00 : f32
    %6 = vector.broadcast %cst_5 : f32 to vector<32x128xf32>
    %7 = arith.maximumf %5, %6 : vector<32x128xf32>
    %8 = arith.truncf %7 : vector<32x128xf32> to vector<32x128xbf16>
    %c0_6 = arith.constant 0 : index
    %c0_7 = arith.constant 0 : index
    %9 = vector.load %arg5[%c0_6, %c0_7] : memref<32x128xbf16, #tpu.memory_space<vmem>>, vector<32x128xbf16>
    tpu.vector_store %arg5[%c0_6, %c0_7], %8 {strides = array<i32>} : memref<32x128xbf16, #tpu.memory_space<vmem>>, vector<32x128xbf16>,
    return
  }
  func.func @transform_0(%arg0: i32, %arg1: i32) -> (i32, i32) {
    %c0_i32 = arith.constant 0 : i32
    %c0_i32_0 = arith.constant 0 : i32
    return %arg0, %c0_i32 : i32, i32
  }
  func.func @transform_1(%arg0: i32, %arg1: i32) -> (i32, i32) {
    %c0_i32 = arith.constant 0 : i32
    %c0_i32_0 = arith.constant 0 : i32
    return %c0_i32, %arg1 : i32, i32
  }
  func.func @transform_2(%arg0: i32, %arg1: i32) -> (i32, i32) {
    %c0_i32 = arith.constant 0 : i32
    %c0_i32_0 = arith.constant 0 : i32
    return %c0_i32, %arg1 : i32, i32
  }
  func.func @transform_3(%arg0: i32, %arg1: i32) -> (i32, i32) {
    %c0_i32 = arith.constant 0 : i32
    return %arg0, %arg1 : i32, i32
  }
}

module attributes {stable_mosaic.version = 11 : i64} {
  func.func @_mm_kernel(%arg0: i32, %arg1: i32, %arg2: memref<8x256xbf16, #tpu.memory_space<vmem>>, %arg3: memref<256x128xbf16, #tpu.memory_space<vmem>>, %arg4: memref<1x128xf32, #tpu.memory_space<vmem>>, %arg5: memref<8x128xbf16, #tpu.memory_space<vmem>>) attributes {dimension_semantics = [#tpu.dimension_semantics<parallel>, #tpu.dimension_semantics<parallel>], iteration_bounds = array<i64: 1, 1>, scalar_prefetch = 0 : i64, scratch_operands = 0 : i64, tpu.core_type = #tpu.core_type<tc>, window_params = [{transform_indices = @transform_0, window_bounds = array<i64: 8, 256>}, {transform_indices = @transform_1, window_bounds = array<i64: 256, 128>}, {transform_indices = @transform_2, window_bounds = array<i64: 1, 128>}, {transform_indices = @transform_3, window_bounds = array<i64: 8, 128>}]} {
    %c0 = arith.constant 0 : index
    %c0_0 = arith.constant 0 : index
    %0 = vector.load %arg2[%c0, %c0_0] : memref<8x256xbf16, #tpu.memory_space<vmem>>, vector<8x256xbf16>
    %c0_1 = arith.constant 0 : index
    %c0_2 = arith.constant 0 : index
    %1 = vector.load %arg3[%c0_1, %c0_2] : memref<256x128xbf16, #tpu.memory_space<vmem>>, vector<256x128xbf16>
    %cst = arith.constant dense<0.000000e+00> : vector<8x128xf32>
    %2 = tpu.matmul %0, %1, %cst {dimension_numbers = #tpu.dot_dimension_numbers<[1], [0], [0], [1], [0, 0, 1, 1], [], []>} : vector<8x256xbf16>, vector<256x128xbf16>, vector<8x128xf32> -> vector<8x128xf32>
    %c0_3 = arith.constant 0 : index
    %c0_4 = arith.constant 0 : index
    %3 = vector.load %arg4[%c0_3, %c0_4] : memref<1x128xf32, #tpu.memory_space<vmem>>, vector<1x128xf32>
    %4 = vector.broadcast %3 : vector<1x128xf32> to vector<8x128xf32>
    %5 = arith.addf %2, %4 : vector<8x128xf32>
    %cst_5 = arith.constant 0.000000e+00 : f32
    %6 = vector.broadcast %cst_5 : f32 to vector<8x128xf32>
    %7 = arith.maximumf %5, %6 : vector<8x128xf32>
    %8 = arith.truncf %7 : vector<8x128xf32> to vector<8x128xbf16>
    %c0_6 = arith.constant 0 : index
    %c0_7 = arith.constant 0 : index
    %9 = vector.load %arg5[%c0_6, %c0_7] : memref<8x128xbf16, #tpu.memory_space<vmem>>, vector<8x128xbf16>
    tpu.vector_store %arg5[%c0_6, %c0_7], %8 {strides = array<i32>} : memref<8x128xbf16, #tpu.memory_space<vmem>>, vector<8x128xbf16>,
    return
  }
  func.func @transform_0(%arg0: i32, %arg1: i32) -> (i32, i32) {
    %c0_i32 = arith.constant 0 : i32
    %c0_i32_0 = arith.constant 0 : i32
    return %arg0, %c0_i32 : i32, i32
  }
  func.func @transform_1(%arg0: i32, %arg1: i32) -> (i32, i32) {
    %c0_i32 = arith.constant 0 : i32
    %c0_i32_0 = arith.constant 0 : i32
    return %c0_i32, %arg1 : i32, i32
  }
  func.func @transform_2(%arg0: i32, %arg1: i32) -> (i32, i32) {
    %c0_i32 = arith.constant 0 : i32
    %c0_i32_0 = arith.constant 0 : i32
    return %c0_i32, %arg1 : i32, i32
  }
  func.func @transform_3(%arg0: i32, %arg1: i32) -> (i32, i32) {
    %c0_i32 = arith.constant 0 : i32
    return %arg0, %arg1 : i32, i32
  }
}

module attributes {stable_mosaic.version = 11 : i64} {
  func.func @_mm_kernel(%arg0: i32, %arg1: i32, %arg2: memref<8x512xbf16, #tpu.memory_space<vmem>>, %arg3: memref<512x128xbf16, #tpu.memory_space<vmem>>, %arg4: memref<1x128xf32, #tpu.memory_space<vmem>>, %arg5: memref<8x128xbf16, #tpu.memory_space<vmem>>) attributes {dimension_semantics = [#tpu.dimension_semantics<parallel>, #tpu.dimension_semantics<parallel>], iteration_bounds = array<i64: 1, 1>, scalar_prefetch = 0 : i64, scratch_operands = 0 : i64, tpu.core_type = #tpu.core_type<tc>, window_params = [{transform_indices = @transform_0, window_bounds = array<i64: 8, 512>}, {transform_indices = @transform_1, window_bounds = array<i64: 512, 128>}, {transform_indices = @transform_2, window_bounds = array<i64: 1, 128>}, {transform_indices = @transform_3, window_bounds = array<i64: 8, 128>}]} {
    %c0 = arith.constant 0 : index
    %c0_0 = arith.constant 0 : index
    %0 = vector.load %arg2[%c0, %c0_0] : memref<8x512xbf16, #tpu.memory_space<vmem>>, vector<8x512xbf16>
    %c0_1 = arith.constant 0 : index
    %c0_2 = arith.constant 0 : index
    %1 = vector.load %arg3[%c0_1, %c0_2] : memref<512x128xbf16, #tpu.memory_space<vmem>>, vector<512x128xbf16>
    %cst = arith.constant dense<0.000000e+00> : vector<8x128xf32>
    %2 = tpu.matmul %0, %1, %cst {dimension_numbers = #tpu.dot_dimension_numbers<[1], [0], [0], [1], [0, 0, 1, 1], [], []>} : vector<8x512xbf16>, vector<512x128xbf16>, vector<8x128xf32> -> vector<8x128xf32>
    %c0_3 = arith.constant 0 : index
    %c0_4 = arith.constant 0 : index
    %3 = vector.load %arg4[%c0_3, %c0_4] : memref<1x128xf32, #tpu.memory_space<vmem>>, vector<1x128xf32>
    %4 = vector.broadcast %3 : vector<1x128xf32> to vector<8x128xf32>
    %5 = arith.addf %2, %4 : vector<8x128xf32>
    %cst_5 = arith.constant 0.000000e+00 : f32
    %6 = vector.broadcast %cst_5 : f32 to vector<8x128xf32>
    %7 = arith.maximumf %5, %6 : vector<8x128xf32>
    %8 = arith.truncf %7 : vector<8x128xf32> to vector<8x128xbf16>
    %c0_6 = arith.constant 0 : index
    %c0_7 = arith.constant 0 : index
    %9 = vector.load %arg5[%c0_6, %c0_7] : memref<8x128xbf16, #tpu.memory_space<vmem>>, vector<8x128xbf16>
    tpu.vector_store %arg5[%c0_6, %c0_7], %8 {strides = array<i32>} : memref<8x128xbf16, #tpu.memory_space<vmem>>, vector<8x128xbf16>,
    return
  }
  func.func @transform_0(%arg0: i32, %arg1: i32) -> (i32, i32) {
    %c0_i32 = arith.constant 0 : i32
    %c0_i32_0 = arith.constant 0 : i32
    return %arg0, %c0_i32 : i32, i32
  }
  func.func @transform_1(%arg0: i32, %arg1: i32) -> (i32, i32) {
    %c0_i32 = arith.constant 0 : i32
    %c0_i32_0 = arith.constant 0 : i32
    return %c0_i32, %arg1 : i32, i32
  }
  func.func @transform_2(%arg0: i32, %arg1: i32) -> (i32, i32) {
    %c0_i32 = arith.constant 0 : i32
    %c0_i32_0 = arith.constant 0 : i32
    return %c0_i32, %arg1 : i32, i32
  }
  func.func @transform_3(%arg0: i32, %arg1: i32) -> (i32, i32) {
    %c0_i32 = arith.constant 0 : i32
    return %arg0, %arg1 : i32, i32
  }
}

module attributes {stable_mosaic.version = 11 : i64} {
  func.func @_mm_kernel(%arg0: i32, %arg1: i32, %arg2: memref<8x128xbf16, #tpu.memory_space<vmem>>, %arg3: memref<128x128xbf16, #tpu.memory_space<vmem>>, %arg4: memref<1x128xf32, #tpu.memory_space<vmem>>, %arg5: memref<8x128xbf16, #tpu.memory_space<vmem>>) attributes {dimension_semantics = [#tpu.dimension_semantics<parallel>, #tpu.dimension_semantics<parallel>], iteration_bounds = array<i64: 1, 1>, scalar_prefetch = 0 : i64, scratch_operands = 0 : i64, tpu.core_type = #tpu.core_type<tc>, window_params = [{transform_indices = @transform_0, window_bounds = array<i64: 8, 128>}, {transform_indices = @transform_1, window_bounds = array<i64: 128, 128>}, {transform_indices = @transform_2, window_bounds = array<i64: 1, 128>}, {transform_indices = @transform_3, window_bounds = array<i64: 8, 128>}]} {
    %c0 = arith.constant 0 : index
    %c0_0 = arith.constant 0 : index
    %0 = vector.load %arg2[%c0, %c0_0] : memref<8x128xbf16, #tpu.memory_space<vmem>>, vector<8x128xbf16>
    %c0_1 = arith.constant 0 : index
    %c0_2 = arith.constant 0 : index
    %1 = vector.load %arg3[%c0_1, %c0_2] : memref<128x128xbf16, #tpu.memory_space<vmem>>, vector<128x128xbf16>
    %cst = arith.constant dense<0.000000e+00> : vector<8x128xf32>
    %2 = tpu.matmul %0, %1, %cst {dimension_numbers = #tpu.dot_dimension_numbers<[1], [0], [0], [1], [0, 0, 1, 1], [], []>} : vector<8x128xbf16>, vector<128x128xbf16>, vector<8x128xf32> -> vector<8x128xf32>
    %c0_3 = arith.constant 0 : index
    %c0_4 = arith.constant 0 : index
    %3 = vector.load %arg4[%c0_3, %c0_4] : memref<1x128xf32, #tpu.memory_space<vmem>>, vector<1x128xf32>
    %4 = vector.broadcast %3 : vector<1x128xf32> to vector<8x128xf32>
    %5 = arith.addf %2, %4 : vector<8x128xf32>
    %cst_5 = arith.constant 0.000000e+00 : f32
    %6 = vector.broadcast %cst_5 : f32 to vector<8x128xf32>
    %7 = arith.maximumf %5, %6 : vector<8x128xf32>
    %8 = arith.truncf %7 : vector<8x128xf32> to vector<8x128xbf16>
    %c0_6 = arith.constant 0 : index
    %c0_7 = arith.constant 0 : index
    %9 = vector.load %arg5[%c0_6, %c0_7] : memref<8x128xbf16, #tpu.memory_space<vmem>>, vector<8x128xbf16>
    tpu.vector_store %arg5[%c0_6, %c0_7], %8 {strides = array<i32>} : memref<8x128xbf16, #tpu.memory_space<vmem>>, vector<8x128xbf16>,
    return
  }
  func.func @transform_0(%arg0: i32, %arg1: i32) -> (i32, i32) {
    %c0_i32 = arith.constant 0 : i32
    %c0_i32_0 = arith.constant 0 : i32
    return %arg0, %c0_i32 : i32, i32
  }
  func.func @transform_1(%arg0: i32, %arg1: i32) -> (i32, i32) {
    %c0_i32 = arith.constant 0 : i32
    %c0_i32_0 = arith.constant 0 : i32
    return %c0_i32, %arg1 : i32, i32
  }
  func.func @transform_2(%arg0: i32, %arg1: i32) -> (i32, i32) {
    %c0_i32 = arith.constant 0 : i32
    %c0_i32_0 = arith.constant 0 : i32
    return %c0_i32, %arg1 : i32, i32
  }
  func.func @transform_3(%arg0: i32, %arg1: i32) -> (i32, i32) {
    %c0_i32 = arith.constant 0 : i32
    return %arg0, %arg1 : i32, i32
  }
}

module attributes {stable_mosaic.version = 11 : i64} {
  func.func @_mm_kernel(%arg0: i32, %arg1: i32, %arg2: memref<24x128xbf16, #tpu.memory_space<vmem>>, %arg3: memref<24x128xbf16, #tpu.memory_space<vmem>>, %arg4: memref<128x128xbf16, #tpu.memory_space<vmem>>, %arg5: memref<128x128xbf16, #tpu.memory_space<vmem>>, %arg6: memref<1x128xf32, #tpu.memory_space<vmem>>, %arg7: memref<24x128xbf16, #tpu.memory_space<vmem>>) attributes {dimension_semantics = [#tpu.dimension_semantics<parallel>, #tpu.dimension_semantics<parallel>], iteration_bounds = array<i64: 1, 1>, scalar_prefetch = 0 : i64, scratch_operands = 0 : i64, tpu.core_type = #tpu.core_type<tc>, window_params = [{transform_indices = @transform_0, window_bounds = array<i64: 24, 128>}, {transform_indices = @transform_1, window_bounds = array<i64: 24, 128>}, {transform_indices = @transform_2, window_bounds = array<i64: 128, 128>}, {transform_indices = @transform_3, window_bounds = array<i64: 128, 128>}, {transform_indices = @transform_4, window_bounds = array<i64: 1, 128>}, {transform_indices = @transform_5, window_bounds = array<i64: 24, 128>}]} {
    %c0 = arith.constant 0 : index
    %c0_0 = arith.constant 0 : index
    %0 = vector.load %arg2[%c0, %c0_0] : memref<24x128xbf16, #tpu.memory_space<vmem>>, vector<24x128xbf16>
    %c0_1 = arith.constant 0 : index
    %c0_2 = arith.constant 0 : index
    %1 = vector.load %arg4[%c0_1, %c0_2] : memref<128x128xbf16, #tpu.memory_space<vmem>>, vector<128x128xbf16>
    %cst = arith.constant dense<0.000000e+00> : vector<24x128xf32>
    %2 = tpu.matmul %0, %1, %cst {dimension_numbers = #tpu.dot_dimension_numbers<[1], [0], [0], [1], [0, 0, 1, 1], [], []>} : vector<24x128xbf16>, vector<128x128xbf16>, vector<24x128xf32> -> vector<24x128xf32>
    %c0_3 = arith.constant 0 : index
    %c0_4 = arith.constant 0 : index
    %3 = vector.load %arg3[%c0_3, %c0_4] : memref<24x128xbf16, #tpu.memory_space<vmem>>, vector<24x128xbf16>
    %c0_5 = arith.constant 0 : index
    %c0_6 = arith.constant 0 : index
    %4 = vector.load %arg5[%c0_5, %c0_6] : memref<128x128xbf16, #tpu.memory_space<vmem>>, vector<128x128xbf16>
    %cst_7 = arith.constant dense<0.000000e+00> : vector<24x128xf32>
    %5 = tpu.matmul %3, %4, %cst_7 {dimension_numbers = #tpu.dot_dimension_numbers<[1], [0], [0], [1], [0, 0, 1, 1], [], []>} : vector<24x128xbf16>, vector<128x128xbf16>, vector<24x128xf32> -> vector<24x128xf32>
    %6 = arith.addf %2, %5 : vector<24x128xf32>
    %c0_8 = arith.constant 0 : index
    %c0_9 = arith.constant 0 : index
    %7 = vector.load %arg6[%c0_8, %c0_9] : memref<1x128xf32, #tpu.memory_space<vmem>>, vector<1x128xf32>
    %8 = vector.broadcast %7 : vector<1x128xf32> to vector<24x128xf32>
    %9 = arith.addf %6, %8 : vector<24x128xf32>
    %cst_10 = arith.constant 0.000000e+00 : f32
    %10 = vector.broadcast %cst_10 : f32 to vector<24x128xf32>
    %11 = arith.maximumf %9, %10 : vector<24x128xf32>
    %12 = arith.truncf %11 : vector<24x128xf32> to vector<24x128xbf16>
    %c0_11 = arith.constant 0 : index
    %c0_12 = arith.constant 0 : index
    %13 = vector.load %arg7[%c0_11, %c0_12] : memref<24x128xbf16, #tpu.memory_space<vmem>>, vector<24x128xbf16>
    tpu.vector_store %arg7[%c0_11, %c0_12], %12 {strides = array<i32>} : memref<24x128xbf16, #tpu.memory_space<vmem>>, vector<24x128xbf16>,
    return
  }
  func.func @transform_0(%arg0: i32, %arg1: i32) -> (i32, i32) {
    %c0_i32 = arith.constant 0 : i32
    %c0_i32_0 = arith.constant 0 : i32
    return %arg0, %c0_i32 : i32, i32
  }
  func.func @transform_1(%arg0: i32, %arg1: i32) -> (i32, i32) {
    %c0_i32 = arith.constant 0 : i32
    %c0_i32_0 = arith.constant 0 : i32
    return %arg0, %c0_i32 : i32, i32
  }
  func.func @transform_2(%arg0: i32, %arg1: i32) -> (i32, i32) {
    %c0_i32 = arith.constant 0 : i32
    %c0_i32_0 = arith.constant 0 : i32
    return %c0_i32, %arg1 : i32, i32
  }
  func.func @transform_3(%arg0: i32, %arg1: i32) -> (i32, i32) {
    %c0_i32 = arith.constant 0 : i32
    %c0_i32_0 = arith.constant 0 : i32
    return %c0_i32, %arg1 : i32, i32
  }
  func.func @transform_4(%arg0: i32, %arg1: i32) -> (i32, i32) {
    %c0_i32 = arith.constant 0 : i32
    %c0_i32_0 = arith.constant 0 : i32
    return %c0_i32, %arg1 : i32, i32
  }
  func.func @transform_5(%arg0: i32, %arg1: i32) -> (i32, i32) {
    %c0_i32 = arith.constant 0 : i32
    return %arg0, %arg1 : i32, i32
  }
}

module attributes {stable_mosaic.version = 11 : i64} {
  func.func @_mm_kernel(%arg0: i32, %arg1: i32, %arg2: memref<56x64xbf16, #tpu.memory_space<vmem>>, %arg3: memref<56x64xbf16, #tpu.memory_space<vmem>>, %arg4: memref<64x128xbf16, #tpu.memory_space<vmem>>, %arg5: memref<64x128xbf16, #tpu.memory_space<vmem>>, %arg6: memref<1x128xf32, #tpu.memory_space<vmem>>, %arg7: memref<56x128xbf16, #tpu.memory_space<vmem>>) attributes {dimension_semantics = [#tpu.dimension_semantics<parallel>, #tpu.dimension_semantics<parallel>], iteration_bounds = array<i64: 1, 1>, scalar_prefetch = 0 : i64, scratch_operands = 0 : i64, tpu.core_type = #tpu.core_type<tc>, window_params = [{transform_indices = @transform_0, window_bounds = array<i64: 56, 64>}, {transform_indices = @transform_1, window_bounds = array<i64: 56, 64>}, {transform_indices = @transform_2, window_bounds = array<i64: 64, 128>}, {transform_indices = @transform_3, window_bounds = array<i64: 64, 128>}, {transform_indices = @transform_4, window_bounds = array<i64: 1, 128>}, {transform_indices = @transform_5, window_bounds = array<i64: 56, 128>}]} {
    %c0 = arith.constant 0 : index
    %c0_0 = arith.constant 0 : index
    %0 = vector.load %arg2[%c0, %c0_0] : memref<56x64xbf16, #tpu.memory_space<vmem>>, vector<56x64xbf16>
    %c0_1 = arith.constant 0 : index
    %c0_2 = arith.constant 0 : index
    %1 = vector.load %arg4[%c0_1, %c0_2] : memref<64x128xbf16, #tpu.memory_space<vmem>>, vector<64x128xbf16>
    %cst = arith.constant dense<0.000000e+00> : vector<56x128xf32>
    %2 = tpu.matmul %0, %1, %cst {dimension_numbers = #tpu.dot_dimension_numbers<[1], [0], [0], [1], [0, 0, 1, 1], [], []>} : vector<56x64xbf16>, vector<64x128xbf16>, vector<56x128xf32> -> vector<56x128xf32>
    %c0_3 = arith.constant 0 : index
    %c0_4 = arith.constant 0 : index
    %3 = vector.load %arg3[%c0_3, %c0_4] : memref<56x64xbf16, #tpu.memory_space<vmem>>, vector<56x64xbf16>
    %c0_5 = arith.constant 0 : index
    %c0_6 = arith.constant 0 : index
    %4 = vector.load %arg5[%c0_5, %c0_6] : memref<64x128xbf16, #tpu.memory_space<vmem>>, vector<64x128xbf16>
    %cst_7 = arith.constant dense<0.000000e+00> : vector<56x128xf32>
    %5 = tpu.matmul %3, %4, %cst_7 {dimension_numbers = #tpu.dot_dimension_numbers<[1], [0], [0], [1], [0, 0, 1, 1], [], []>} : vector<56x64xbf16>, vector<64x128xbf16>, vector<56x128xf32> -> vector<56x128xf32>
    %6 = arith.addf %2, %5 : vector<56x128xf32>
    %c0_8 = arith.constant 0 : index
    %c0_9 = arith.constant 0 : index
    %7 = vector.load %arg6[%c0_8, %c0_9] : memref<1x128xf32, #tpu.memory_space<vmem>>, vector<1x128xf32>
    %8 = vector.broadcast %7 : vector<1x128xf32> to vector<56x128xf32>
    %9 = arith.addf %6, %8 : vector<56x128xf32>
    %cst_10 = arith.constant 0.000000e+00 : f32
    %10 = vector.broadcast %cst_10 : f32 to vector<56x128xf32>
    %11 = arith.maximumf %9, %10 : vector<56x128xf32>
    %12 = arith.truncf %11 : vector<56x128xf32> to vector<56x128xbf16>
    %c0_11 = arith.constant 0 : index
    %c0_12 = arith.constant 0 : index
    %13 = vector.load %arg7[%c0_11, %c0_12] : memref<56x128xbf16, #tpu.memory_space<vmem>>, vector<56x128xbf16>
    tpu.vector_store %arg7[%c0_11, %c0_12], %12 {strides = array<i32>} : memref<56x128xbf16, #tpu.memory_space<vmem>>, vector<56x128xbf16>,
    return
  }
  func.func @transform_0(%arg0: i32, %arg1: i32) -> (i32, i32) {
    %c0_i32 = arith.constant 0 : i32
    %c0_i32_0 = arith.constant 0 : i32
    return %arg0, %c0_i32 : i32, i32
  }
  func.func @transform_1(%arg0: i32, %arg1: i32) -> (i32, i32) {
    %c0_i32 = arith.constant 0 : i32
    %c0_i32_0 = arith.constant 0 : i32
    return %arg0, %c0_i32 : i32, i32
  }
  func.func @transform_2(%arg0: i32, %arg1: i32) -> (i32, i32) {
    %c0_i32 = arith.constant 0 : i32
    %c0_i32_0 = arith.constant 0 : i32
    return %c0_i32, %arg1 : i32, i32
  }
  func.func @transform_3(%arg0: i32, %arg1: i32) -> (i32, i32) {
    %c0_i32 = arith.constant 0 : i32
    %c0_i32_0 = arith.constant 0 : i32
    return %c0_i32, %arg1 : i32, i32
  }
  func.func @transform_4(%arg0: i32, %arg1: i32) -> (i32, i32) {
    %c0_i32 = arith.constant 0 : i32
    %c0_i32_0 = arith.constant 0 : i32
    return %c0_i32, %arg1 : i32, i32
  }
  func.func @transform_5(%arg0: i32, %arg1: i32) -> (i32, i32) {
    %c0_i32 = arith.constant 0 : i32
    return %arg0, %arg1 : i32, i32
  }
}

module attributes {stable_mosaic.version = 11 : i64} {
  func.func @_mm_kernel(%arg0: i32, %arg1: i32, %arg2: memref<168x32xbf16, #tpu.memory_space<vmem>>, %arg3: memref<168x32xbf16, #tpu.memory_space<vmem>>, %arg4: memref<32x128xbf16, #tpu.memory_space<vmem>>, %arg5: memref<32x128xbf16, #tpu.memory_space<vmem>>, %arg6: memref<1x128xf32, #tpu.memory_space<vmem>>, %arg7: memref<168x128xbf16, #tpu.memory_space<vmem>>) attributes {dimension_semantics = [#tpu.dimension_semantics<parallel>, #tpu.dimension_semantics<parallel>], iteration_bounds = array<i64: 1, 1>, scalar_prefetch = 0 : i64, scratch_operands = 0 : i64, tpu.core_type = #tpu.core_type<tc>, window_params = [{transform_indices = @transform_0, window_bounds = array<i64: 168, 32>}, {transform_indices = @transform_1, window_bounds = array<i64: 168, 32>}, {transform_indices = @transform_2, window_bounds = array<i64: 32, 128>}, {transform_indices = @transform_3, window_bounds = array<i64: 32, 128>}, {transform_indices = @transform_4, window_bounds = array<i64: 1, 128>}, {transform_indices = @transform_5, window_bounds = array<i64: 168, 128>}]} {
    %c0 = arith.constant 0 : index
    %c0_0 = arith.constant 0 : index
    %0 = vector.load %arg2[%c0, %c0_0] : memref<168x32xbf16, #tpu.memory_space<vmem>>, vector<168x32xbf16>
    %c0_1 = arith.constant 0 : index
    %c0_2 = arith.constant 0 : index
    %1 = vector.load %arg4[%c0_1, %c0_2] : memref<32x128xbf16, #tpu.memory_space<vmem>>, vector<32x128xbf16>
    %cst = arith.constant dense<0.000000e+00> : vector<168x128xf32>
    %2 = tpu.matmul %0, %1, %cst {dimension_numbers = #tpu.dot_dimension_numbers<[1], [0], [0], [1], [0, 0, 1, 1], [], []>} : vector<168x32xbf16>, vector<32x128xbf16>, vector<168x128xf32> -> vector<168x128xf32>
    %c0_3 = arith.constant 0 : index
    %c0_4 = arith.constant 0 : index
    %3 = vector.load %arg3[%c0_3, %c0_4] : memref<168x32xbf16, #tpu.memory_space<vmem>>, vector<168x32xbf16>
    %c0_5 = arith.constant 0 : index
    %c0_6 = arith.constant 0 : index
    %4 = vector.load %arg5[%c0_5, %c0_6] : memref<32x128xbf16, #tpu.memory_space<vmem>>, vector<32x128xbf16>
    %cst_7 = arith.constant dense<0.000000e+00> : vector<168x128xf32>
    %5 = tpu.matmul %3, %4, %cst_7 {dimension_numbers = #tpu.dot_dimension_numbers<[1], [0], [0], [1], [0, 0, 1, 1], [], []>} : vector<168x32xbf16>, vector<32x128xbf16>, vector<168x128xf32> -> vector<168x128xf32>
    %6 = arith.addf %2, %5 : vector<168x128xf32>
    %c0_8 = arith.constant 0 : index
    %c0_9 = arith.constant 0 : index
    %7 = vector.load %arg6[%c0_8, %c0_9] : memref<1x128xf32, #tpu.memory_space<vmem>>, vector<1x128xf32>
    %8 = vector.broadcast %7 : vector<1x128xf32> to vector<168x128xf32>
    %9 = arith.addf %6, %8 : vector<168x128xf32>
    %cst_10 = arith.constant 0.000000e+00 : f32
    %10 = vector.broadcast %cst_10 : f32 to vector<168x128xf32>
    %11 = arith.maximumf %9, %10 : vector<168x128xf32>
    %12 = arith.truncf %11 : vector<168x128xf32> to vector<168x128xbf16>
    %c0_11 = arith.constant 0 : index
    %c0_12 = arith.constant 0 : index
    %13 = vector.load %arg7[%c0_11, %c0_12] : memref<168x128xbf16, #tpu.memory_space<vmem>>, vector<168x128xbf16>
    tpu.vector_store %arg7[%c0_11, %c0_12], %12 {strides = array<i32>} : memref<168x128xbf16, #tpu.memory_space<vmem>>, vector<168x128xbf16>,
    return
  }
  func.func @transform_0(%arg0: i32, %arg1: i32) -> (i32, i32) {
    %c0_i32 = arith.constant 0 : i32
    %c0_i32_0 = arith.constant 0 : i32
    return %arg0, %c0_i32 : i32, i32
  }
  func.func @transform_1(%arg0: i32, %arg1: i32) -> (i32, i32) {
    %c0_i32 = arith.constant 0 : i32
    %c0_i32_0 = arith.constant 0 : i32
    return %arg0, %c0_i32 : i32, i32
  }
  func.func @transform_2(%arg0: i32, %arg1: i32) -> (i32, i32) {
    %c0_i32 = arith.constant 0 : i32
    %c0_i32_0 = arith.constant 0 : i32
    return %c0_i32, %arg1 : i32, i32
  }
  func.func @transform_3(%arg0: i32, %arg1: i32) -> (i32, i32) {
    %c0_i32 = arith.constant 0 : i32
    %c0_i32_0 = arith.constant 0 : i32
    return %c0_i32, %arg1 : i32, i32
  }
  func.func @transform_4(%arg0: i32, %arg1: i32) -> (i32, i32) {
    %c0_i32 = arith.constant 0 : i32
    %c0_i32_0 = arith.constant 0 : i32
    return %c0_i32, %arg1 : i32, i32
  }
  func.func @transform_5(%arg0: i32, %arg1: i32) -> (i32, i32) {
    %c0_i32 = arith.constant 0 : i32
    return %arg0, %arg1 : i32, i32
  }
}

module attributes {stable_mosaic.version = 11 : i64} {
  func.func @_mm_kernel(%arg0: i32, %arg1: i32, %arg2: memref<584x16xbf16, #tpu.memory_space<vmem>>, %arg3: memref<584x16xbf16, #tpu.memory_space<vmem>>, %arg4: memref<16x128xbf16, #tpu.memory_space<vmem>>, %arg5: memref<16x128xbf16, #tpu.memory_space<vmem>>, %arg6: memref<1x128xf32, #tpu.memory_space<vmem>>, %arg7: memref<584x128xf32, #tpu.memory_space<vmem>>) attributes {dimension_semantics = [#tpu.dimension_semantics<parallel>, #tpu.dimension_semantics<parallel>], iteration_bounds = array<i64: 1, 1>, scalar_prefetch = 0 : i64, scratch_operands = 0 : i64, tpu.core_type = #tpu.core_type<tc>, window_params = [{transform_indices = @transform_0, window_bounds = array<i64: 584, 16>}, {transform_indices = @transform_1, window_bounds = array<i64: 584, 16>}, {transform_indices = @transform_2, window_bounds = array<i64: 16, 128>}, {transform_indices = @transform_3, window_bounds = array<i64: 16, 128>}, {transform_indices = @transform_4, window_bounds = array<i64: 1, 128>}, {transform_indices = @transform_5, window_bounds = array<i64: 584, 128>}]} {
    %c0 = arith.constant 0 : index
    %c0_0 = arith.constant 0 : index
    %0 = vector.load %arg2[%c0, %c0_0] : memref<584x16xbf16, #tpu.memory_space<vmem>>, vector<584x16xbf16>
    %c0_1 = arith.constant 0 : index
    %c0_2 = arith.constant 0 : index
    %1 = vector.load %arg4[%c0_1, %c0_2] : memref<16x128xbf16, #tpu.memory_space<vmem>>, vector<16x128xbf16>
    %cst = arith.constant dense<0.000000e+00> : vector<584x128xf32>
    %2 = tpu.matmul %0, %1, %cst {dimension_numbers = #tpu.dot_dimension_numbers<[1], [0], [0], [1], [0, 0, 1, 1], [], []>} : vector<584x16xbf16>, vector<16x128xbf16>, vector<584x128xf32> -> vector<584x128xf32>
    %c0_3 = arith.constant 0 : index
    %c0_4 = arith.constant 0 : index
    %3 = vector.load %arg3[%c0_3, %c0_4] : memref<584x16xbf16, #tpu.memory_space<vmem>>, vector<584x16xbf16>
    %c0_5 = arith.constant 0 : index
    %c0_6 = arith.constant 0 : index
    %4 = vector.load %arg5[%c0_5, %c0_6] : memref<16x128xbf16, #tpu.memory_space<vmem>>, vector<16x128xbf16>
    %cst_7 = arith.constant dense<0.000000e+00> : vector<584x128xf32>
    %5 = tpu.matmul %3, %4, %cst_7 {dimension_numbers = #tpu.dot_dimension_numbers<[1], [0], [0], [1], [0, 0, 1, 1], [], []>} : vector<584x16xbf16>, vector<16x128xbf16>, vector<584x128xf32> -> vector<584x128xf32>
    %6 = arith.addf %2, %5 : vector<584x128xf32>
    %c0_8 = arith.constant 0 : index
    %c0_9 = arith.constant 0 : index
    %7 = vector.load %arg6[%c0_8, %c0_9] : memref<1x128xf32, #tpu.memory_space<vmem>>, vector<1x128xf32>
    %8 = vector.broadcast %7 : vector<1x128xf32> to vector<584x128xf32>
    %9 = arith.addf %6, %8 : vector<584x128xf32>
    %cst_10 = arith.constant 0.000000e+00 : f32
    %10 = vector.broadcast %cst_10 : f32 to vector<584x128xf32>
    %11 = arith.subf %10, %9 : vector<584x128xf32>
    %12 = math.exp %11 : vector<584x128xf32>
    %cst_11 = arith.constant 1.000000e+00 : f32
    %13 = vector.broadcast %cst_11 : f32 to vector<584x128xf32>
    %14 = arith.addf %13, %12 : vector<584x128xf32>
    %15 = tpu.reciprocal %14 {approx = true} : vector<584x128xf32> -> vector<584x128xf32>
    %cst_12 = arith.constant 0.000000e+00 : f32
    %cst_13 = arith.constant 1.000000e+00 : f32
    %16 = vector.broadcast %cst_12 : f32 to vector<584x128xf32>
    %17 = arith.maximumf %16, %15 : vector<584x128xf32>
    %18 = vector.broadcast %cst_13 : f32 to vector<584x128xf32>
    %19 = arith.minimumf %18, %17 : vector<584x128xf32>
    %c0_14 = arith.constant 0 : index
    %c0_15 = arith.constant 0 : index
    %20 = vector.load %arg7[%c0_14, %c0_15] : memref<584x128xf32, #tpu.memory_space<vmem>>, vector<584x128xf32>
    tpu.vector_store %arg7[%c0_14, %c0_15], %19 {strides = array<i32>} : memref<584x128xf32, #tpu.memory_space<vmem>>, vector<584x128xf32>,
    return
  }
  func.func @transform_0(%arg0: i32, %arg1: i32) -> (i32, i32) {
    %c0_i32 = arith.constant 0 : i32
    %c0_i32_0 = arith.constant 0 : i32
    return %arg0, %c0_i32 : i32, i32
  }
  func.func @transform_1(%arg0: i32, %arg1: i32) -> (i32, i32) {
    %c0_i32 = arith.constant 0 : i32
    %c0_i32_0 = arith.constant 0 : i32
    return %arg0, %c0_i32 : i32, i32
  }
  func.func @transform_2(%arg0: i32, %arg1: i32) -> (i32, i32) {
    %c0_i32 = arith.constant 0 : i32
    %c0_i32_0 = arith.constant 0 : i32
    return %c0_i32, %arg1 : i32, i32
  }
  func.func @transform_3(%arg0: i32, %arg1: i32) -> (i32, i32) {
    %c0_i32 = arith.constant 0 : i32
    %c0_i32_0 = arith.constant 0 : i32
    return %c0_i32, %arg1 : i32, i32
  }
  func.func @transform_4(%arg0: i32, %arg1: i32) -> (i32, i32) {
    %c0_i32 = arith.constant 0 : i32
    %c0_i32_0 = arith.constant 0 : i32
    return %c0_i32, %arg1 : i32, i32
  }
  func.func @transform_5(%arg0: i32, %arg1: i32) -> (i32, i32) {
    %c0_i32 = arith.constant 0 : i32
    return %arg0, %arg1 : i32, i32
  }
}

</mosaic_0001>

<bundles_post_ra>
// kernel: forward.10
= control target key start
LH: loop header
LB: loop body
LE: loop exit
PB: predicated region body
PF: predicated region fallthrough
CT: control target
= control target key end

     0   :  { %vm254_vm0 = vcmask 130048   ;;  %s1863_s1 = inlined_call_operand.vmem [shape: bf16[16,128], index: 1, kind: input, shape index: {}]   ;;  %s1864_s0 = inlined_call_operand.vmem [shape: bf16[512,16], index: 0, kind: input, shape index: {}]   ;;  %s1865_s2 = inlined_call_operand.vmem [shape: f32[1,128], index: 2, kind: input, shape index: {}]   ;;  %s1866_s3 = inlined_call_operand.vmem [shape: bf16[512,128], index: 3, kind: output, shape index: {}]  }
   0x1   :  { %v1514_v0 = vld [vmem:[%s1863_s1] sm:$0xff]   ;;  %v1517_v3 = vld [vmem:[%s1864_s0 + $0x8] sm:$0xff]   ;;  %v1519_v5 = vld [vmem:[%s1864_s0 + $0x10] sm:$0xff]  }
   0x2   :  { %v1515_v1 = vld [vmem:[%s1864_s0] sm:$0xff]   ;;  %1446 = vmatprep.subr.bf16.mxu0 %v1514_v0  ;;  %1512 = vmatprep.subr.bf16.mxu1 %v1514_v0  ;;  %v1518_v4 = vld [vmem:[%s1864_s0 + $0x88] sm:$0xff]   ;;  %v1520_v6 = vld [vmem:[%s1864_s0 + $0x90] sm:$0xff]  }
   0x3   :  { %v1516_v2 = vld [vmem:[%s1864_s0 + $0x80] sm:$0xff]   ;;  %1447 = vmatpush3.bf16.msra.mxu0 %v1514_v0  ;;  %1513 = vmatpush3.bf16.msra.mxu1 %v1514_v0  ;;  %v1521_v7 = vld [vmem:[%s1864_s0 + $0x18] sm:$0xff]   ;;  %v1525_v11 = vld [vmem:[%s1864_s0 + $0x28] sm:$0xff]  }
   0x4   :  { %1448 = vmatprep.mubr.msk.bf16.mxu0 %vm254_vm0, %v1515_v1  ;;  %1480 = vmatprep.mubr.msk.bf16.mxu1 %vm254_vm0, %v1516_v2  ;;  %v1522_v8 = vld [vmem:[%s1864_s0 + $0x98] sm:$0xff]   ;;  %v1523_v9 = vld [vmem:[%s1864_s0 + $0x20] sm:$0xff]   ;;  %v1526_v12 = vld [vmem:[%s1864_s0 + $0xa8] sm:$0xff]  }
   0x5   :  { %v1524_v10 = vld [vmem:[%s1864_s0 + $0xa0] sm:$0xff]   ;;  %v1527_v13 = vld [vmem:[%s1864_s0 + $0x30] sm:$0xff]   ;;  %v1529_v15 = vld [vmem:[%s1864_s0 + $0x38] sm:$0xff]  }
   0x6   :  { %1449 = vmatmul.mubr.msk.bf16.vlgmr.msra.gmra.mxu0 %vm254_vm0, %v1517_v3  ;;  %1481 = vmatmul.mubr.msk.bf16.vlgmr.msra.gmra.mxu1 %vm254_vm0, %v1518_v4  ;;  %v1528_v14 = vld [vmem:[%s1864_s0 + $0xb0] sm:$0xff]   ;;  %v1530_v16 = vld [vmem:[%s1864_s0 + $0xb8] sm:$0xff]   ;;  %v1531_v17 = vld [vmem:[%s1864_s0 + $0x40] sm:$0xff]  }
   0x7   :  { %1452 = vmatprep.mubr.msk.bf16.mxu0 %vm254_vm0, %v1519_v5  ;;  %1484 = vmatprep.mubr.msk.bf16.mxu1 %vm254_vm0, %v1520_v6  ;;  %v1532_v18 = vld [vmem:[%s1864_s0 + $0xc0] sm:$0xff]   ;;  %v1533_v19 = vld [vmem:[%s1864_s0 + $0x48] sm:$0xff]   ;;  %v1535_v21 = vld [vmem:[%s1864_s0 + $0x50] sm:$0xff]  }
   0x8   :  { %v1534_v20 = vld [vmem:[%s1864_s0 + $0xc8] sm:$0xff]   ;;  %v1536_v22 = vld [vmem:[%s1864_s0 + $0xd0] sm:$0xff]   ;;  %v1537_v23 = vld [vmem:[%s1864_s0 + $0x58] sm:$0xff]  }
   0x9   :  { %v1538_v24 = vld [vmem:[%s1864_s0 + $0xd8] sm:$0xff]   ;;  %v1539_v25 = vld [vmem:[%s1864_s0 + $0x60] sm:$0xff]   ;;  %v1541_v27 = vld [vmem:[%s1864_s0 + $0x68] sm:$0xff]  }
   0xa   :  { %v1540_v26 = vld [vmem:[%s1864_s0 + $0xe0] sm:$0xff]   ;;  %v1542_v28 = vld [vmem:[%s1864_s0 + $0xe8] sm:$0xff]   ;;  %v1543_v29 = vld [vmem:[%s1864_s0 + $0x70] sm:$0xff]  }
   0xb   :  { %v1544_v30 = vld [vmem:[%s1864_s0 + $0xf0] sm:$0xff]   ;;  %v1545_v31 = vld [vmem:[%s1864_s0 + $0x78] sm:$0xff]   ;;  %v1701_v33 = vld [vmem:[%s1865_s2] ss:$0 sm:$0xff] }
   0xc   :  { %v1546_v32 = vld [vmem:[%s1864_s0 + $0xf8] sm:$0xff]  }
   0xe   :  { %1453 = vmatmul.mubr.msk.bf16.gmra.mxu0 %vm254_vm0, %v1521_v7  ;;  %1485 = vmatmul.mubr.msk.bf16.gmra.mxu1 %vm254_vm0, %v1522_v8 }
   0xf   :  { %1456 = vmatprep.mubr.msk.bf16.mxu0 %vm254_vm0, %v1523_v9  ;;  %1488 = vmatprep.mubr.msk.bf16.mxu1 %vm254_vm0, %v1524_v10 }
  0x16   :  { %1457 = vmatmul.mubr.msk.bf16.gmra.mxu0 %vm254_vm0, %v1525_v11  ;;  %1489 = vmatmul.mubr.msk.bf16.gmra.mxu1 %vm254_vm0, %v1526_v12 }
  0x17   :  { %1460 = vmatprep.mubr.msk.bf16.mxu0 %vm254_vm0, %v1527_v13  ;;  %1492 = vmatprep.mubr.msk.bf16.mxu1 %vm254_vm0, %v1528_v14 }
  0x1e   :  { %1461 = vmatmul.mubr.msk.bf16.gmra.mxu0 %vm254_vm0, %v1529_v15  ;;  %1493 = vmatmul.mubr.msk.bf16.gmra.mxu1 %vm254_vm0, %v1530_v16 }
  0x1f   :  { %1464 = vmatprep.mubr.msk.bf16.mxu0 %vm254_vm0, %v1531_v17  ;;  %1496 = vmatprep.mubr.msk.bf16.mxu1 %vm254_vm0, %v1532_v18 }
  0x26   :  { %1465 = vmatmul.mubr.msk.bf16.gmra.mxu0 %vm254_vm0, %v1533_v19  ;;  %1497 = vmatmul.mubr.msk.bf16.gmra.mxu1 %vm254_vm0, %v1534_v20 }
  0x27   :  { %1468 = vmatprep.mubr.msk.bf16.mxu0 %vm254_vm0, %v1535_v21  ;;  %1500 = vmatprep.mubr.msk.bf16.mxu1 %vm254_vm0, %v1536_v22 }
  0x2e   :  { %1469 = vmatmul.mubr.msk.bf16.gmra.mxu0 %vm254_vm0, %v1537_v23  ;;  %1501 = vmatmul.mubr.msk.bf16.gmra.mxu1 %vm254_vm0, %v1538_v24 }
  0x2f   :  { %1472 = vmatprep.mubr.msk.bf16.mxu0 %vm254_vm0, %v1539_v25  ;;  %1504 = vmatprep.mubr.msk.bf16.mxu1 %vm254_vm0, %v1540_v26 }
  0x36   :  { %1473 = vmatmul.mubr.msk.bf16.gmra.mxu0 %vm254_vm0, %v1541_v27  ;;  %1505 = vmatmul.mubr.msk.bf16.gmra.mxu1 %vm254_vm0, %v1542_v28 }
  0x37   :  { %1476 = vmatprep.mubr.msk.bf16.mxu0 %vm254_vm0, %v1543_v29  ;;  %1508 = vmatprep.mubr.msk.bf16.mxu1 %vm254_vm0, %v1544_v30 }
  0x3e   :  { %1477 = vmatmul.mubr.msk.bf16.gmra.mxu0 %vm254_vm0, %v1545_v31  ;;  %1509 = vmatmul.mubr.msk.bf16.gmra.mxu1 %vm254_vm0, %v1546_v32 }
  0xc6   :  { %v1450_v34 = vpop.f32.mrf.mxu0  ;;  %v1482_v35 = vpop.f32.mrf.mxu1 }
  0xc7   :  { %v394_v36 = vadd.f32 %v1450_v34, %v1701_v33  ;;  %v522_v37 = vadd.f32 %v1482_v35, %v1701_v33 }
  0xc8   :  { %v385_v38 = vpop.f32.mrf.mxu0  ;;  %v513_v39 = vpop.f32.mrf.mxu1 }
  0xc9   :  { %v386_v40 = vadd.f32 %v1701_v33, %v385_v38  ;;  %v514_v41 = vadd.f32 %v1701_v33, %v513_v39  ;;  %v642_v46 = vmax.f32 %v394_v36, 0.0  ;;  %v674_v47 = vmax.f32 %v522_v37, 0.0 }
  0xca   :  { %v1451_v42 = vpop.f32.mrf.mxu0  ;;  %v1483_v43 = vpop.f32.mrf.mxu1 }
  0xcb   :  { %v397_v44 = vadd.f32 %v1451_v42, %v1701_v33  ;;  %v525_v45 = vadd.f32 %v1483_v43, %v1701_v33  ;;  %v640_v54 = vmax.f32 %v386_v40, 0.0  ;;  %v672_v55 = vmax.f32 %v514_v41, 0.0 }
  0xcc   :  { %v388_v48 = vpop.f32.mrf.mxu0  ;;  %v516_v49 = vpop.f32.mrf.mxu1 }
  0xcd   :  { %v643_v50 = vmax.f32 %v397_v44, 0.0  ;;  %v675_v51 = vmax.f32 %v525_v45, 0.0  ;;  %v389_v52 = vadd.f32 %v1701_v33, %v388_v48  ;;  %v517_v53 = vadd.f32 %v1701_v33, %v516_v49 }
  0xce   :  { %v1454_v56 = vpop.f32.mrf.mxu0  ;;  %v1486_v57 = vpop.f32.mrf.mxu1 }
  0xcf   :  { %v1230_v58 = vpack.c.bf16 %v643_v50, %v642_v46  ;;  %v1310_v59 = vpack.c.bf16 %v675_v51, %v674_v47  ;;  %v641_v60 = vmax.f32 %v389_v52, 0.0  ;;  %v673_v61 = vmax.f32 %v517_v53, 0.0 }
  0xd0   :  { %v410_v62 = vadd.f32 %v1454_v56, %v1701_v33  ;;  %v538_v63 = vadd.f32 %v1486_v57, %v1701_v33  ;;  %v401_v0 = vpop.f32.mrf.mxu0  ;;  %v529_v1 = vpop.f32.mrf.mxu1 }
  0xd1   :  { %1382 = vst [vmem:[%s1866_s3 + $0x8] sm:$0xff] %v1230_v58   ;;  %1398 = vst [vmem:[%s1866_s3 + $0x88] sm:$0xff] %v1310_v59   ;;  %v1225_v2 = vpack.c.bf16 %v641_v60, %v640_v54  ;;  %v1305_v3 = vpack.c.bf16 %v673_v61, %v672_v55  ;;  %v402_v4 = vadd.f32 %v1701_v33, %v401_v0 }
  0xd2   :  { %v530_v5 = vadd.f32 %v1701_v33, %v529_v1  ;;  %v1455_v6 = vpop.f32.mrf.mxu0  ;;  %v1487_v7 = vpop.f32.mrf.mxu1  ;;  %v646_v10 = vmax.f32 %v410_v62, 0.0  ;;  %v678_v11 = vmax.f32 %v538_v63, 0.0 }
  0xd3   :  { %1226 = vst [vmem:[%s1866_s3] sm:$0xff] %v1225_v2   ;;  %1397 = vst [vmem:[%s1866_s3 + $0x80] sm:$0xff] %v1305_v3   ;;  %v413_v8 = vadd.f32 %v1455_v6, %v1701_v33  ;;  %v541_v9 = vadd.f32 %v1487_v7, %v1701_v33  ;;  %v644_v18 = vmax.f32 %v402_v4, 0.0 }
  0xd4   :  { %v404_v12 = vpop.f32.mrf.mxu0  ;;  %v532_v13 = vpop.f32.mrf.mxu1  ;;  %v676_v19 = vmax.f32 %v530_v5, 0.0 }
  0xd5   :  { %v647_v14 = vmax.f32 %v413_v8, 0.0  ;;  %v679_v15 = vmax.f32 %v541_v9, 0.0  ;;  %v405_v16 = vadd.f32 %v1701_v33, %v404_v12  ;;  %v533_v17 = vadd.f32 %v1701_v33, %v532_v13 }
  0xd6   :  { %v1458_v20 = vpop.f32.mrf.mxu0  ;;  %v1490_v21 = vpop.f32.mrf.mxu1 }
  0xd7   :  { %v1240_v22 = vpack.c.bf16 %v647_v14, %v646_v10  ;;  %v1320_v23 = vpack.c.bf16 %v679_v15, %v678_v11  ;;  %v645_v24 = vmax.f32 %v405_v16, 0.0  ;;  %v677_v25 = vmax.f32 %v533_v17, 0.0 }
  0xd8   :  { %v426_v26 = vadd.f32 %v1458_v20, %v1701_v33  ;;  %v554_v27 = vadd.f32 %v1490_v21, %v1701_v33  ;;  %v417_v28 = vpop.f32.mrf.mxu0  ;;  %v545_v29 = vpop.f32.mrf.mxu1 }
  0xd9   :  { %1384 = vst [vmem:[%s1866_s3 + $0x18] sm:$0xff] %v1240_v22   ;;  %1400 = vst [vmem:[%s1866_s3 + $0x98] sm:$0xff] %v1320_v23   ;;  %v1235_v30 = vpack.c.bf16 %v645_v24, %v644_v18  ;;  %v1315_v31 = vpack.c.bf16 %v677_v25, %v676_v19  ;;  %v418_v32 = vadd.f32 %v1701_v33, %v417_v28 }
  0xda   :  { %v546_v34 = vadd.f32 %v1701_v33, %v545_v29  ;;  %v1459_v35 = vpop.f32.mrf.mxu0  ;;  %v1491_v36 = vpop.f32.mrf.mxu1  ;;  %v650_v39 = vmax.f32 %v426_v26, 0.0  ;;  %v682_v40 = vmax.f32 %v554_v27, 0.0 }
  0xdb   :  { %1383 = vst [vmem:[%s1866_s3 + $0x10] sm:$0xff] %v1235_v30   ;;  %1399 = vst [vmem:[%s1866_s3 + $0x90] sm:$0xff] %v1315_v31   ;;  %v429_v37 = vadd.f32 %v1459_v35, %v1701_v33  ;;  %v557_v38 = vadd.f32 %v1491_v36, %v1701_v33  ;;  %v648_v47 = vmax.f32 %v418_v32, 0.0 }
  0xdc   :  { %v420_v41 = vpop.f32.mrf.mxu0  ;;  %v548_v42 = vpop.f32.mrf.mxu1  ;;  %v680_v48 = vmax.f32 %v546_v34, 0.0 }
  0xdd   :  { %v651_v43 = vmax.f32 %v429_v37, 0.0  ;;  %v683_v44 = vmax.f32 %v557_v38, 0.0  ;;  %v421_v45 = vadd.f32 %v1701_v33, %v420_v41  ;;  %v549_v46 = vadd.f32 %v1701_v33, %v548_v42 }
  0xde   :  { %v1462_v49 = vpop.f32.mrf.mxu0  ;;  %v1494_v50 = vpop.f32.mrf.mxu1 }
  0xdf   :  { %v1250_v51 = vpack.c.bf16 %v651_v43, %v650_v39  ;;  %v1330_v52 = vpack.c.bf16 %v683_v44, %v682_v40  ;;  %v649_v53 = vmax.f32 %v421_v45, 0.0  ;;  %v681_v54 = vmax.f32 %v549_v46, 0.0 }
  0xe0   :  { %v442_v55 = vadd.f32 %v1462_v49, %v1701_v33  ;;  %v570_v56 = vadd.f32 %v1494_v50, %v1701_v33  ;;  %v433_v57 = vpop.f32.mrf.mxu0  ;;  %v561_v58 = vpop.f32.mrf.mxu1 }
  0xe1   :  { %1386 = vst [vmem:[%s1866_s3 + $0x28] sm:$0xff] %v1250_v51   ;;  %1402 = vst [vmem:[%s1866_s3 + $0xa8] sm:$0xff] %v1330_v52   ;;  %v1245_v59 = vpack.c.bf16 %v649_v53, %v648_v47  ;;  %v1325_v60 = vpack.c.bf16 %v681_v54, %v680_v48  ;;  %v434_v61 = vadd.f32 %v1701_v33, %v433_v57 }
  0xe2   :  { %v562_v62 = vadd.f32 %v1701_v33, %v561_v58  ;;  %v1463_v63 = vpop.f32.mrf.mxu0  ;;  %v1495_v0 = vpop.f32.mrf.mxu1  ;;  %v654_v3 = vmax.f32 %v442_v55, 0.0  ;;  %v686_v4 = vmax.f32 %v570_v56, 0.0 }
  0xe3   :  { %1385 = vst [vmem:[%s1866_s3 + $0x20] sm:$0xff] %v1245_v59   ;;  %1401 = vst [vmem:[%s1866_s3 + $0xa0] sm:$0xff] %v1325_v60   ;;  %v445_v1 = vadd.f32 %v1463_v63, %v1701_v33  ;;  %v573_v2 = vadd.f32 %v1495_v0, %v1701_v33  ;;  %v652_v11 = vmax.f32 %v434_v61, 0.0 }
  0xe4   :  { %v436_v5 = vpop.f32.mrf.mxu0  ;;  %v564_v6 = vpop.f32.mrf.mxu1  ;;  %v684_v12 = vmax.f32 %v562_v62, 0.0 }
  0xe5   :  { %v655_v7 = vmax.f32 %v445_v1, 0.0  ;;  %v687_v8 = vmax.f32 %v573_v2, 0.0  ;;  %v437_v9 = vadd.f32 %v1701_v33, %v436_v5  ;;  %v565_v10 = vadd.f32 %v1701_v33, %v564_v6 }
  0xe6   :  { %v1466_v13 = vpop.f32.mrf.mxu0  ;;  %v1498_v14 = vpop.f32.mrf.mxu1 }
  0xe7   :  { %v1260_v15 = vpack.c.bf16 %v655_v7, %v654_v3  ;;  %v1340_v16 = vpack.c.bf16 %v687_v8, %v686_v4  ;;  %v653_v17 = vmax.f32 %v437_v9, 0.0  ;;  %v685_v18 = vmax.f32 %v565_v10, 0.0 }
  0xe8   :  { %v458_v19 = vadd.f32 %v1466_v13, %v1701_v33  ;;  %v586_v20 = vadd.f32 %v1498_v14, %v1701_v33  ;;  %v449_v21 = vpop.f32.mrf.mxu0  ;;  %v577_v22 = vpop.f32.mrf.mxu1 }
  0xe9   :  { %1388 = vst [vmem:[%s1866_s3 + $0x38] sm:$0xff] %v1260_v15   ;;  %1404 = vst [vmem:[%s1866_s3 + $0xb8] sm:$0xff] %v1340_v16   ;;  %v1255_v23 = vpack.c.bf16 %v653_v17, %v652_v11  ;;  %v1335_v24 = vpack.c.bf16 %v685_v18, %v684_v12  ;;  %v450_v25 = vadd.f32 %v1701_v33, %v449_v21 }
  0xea   :  { %v578_v26 = vadd.f32 %v1701_v33, %v577_v22  ;;  %v1467_v27 = vpop.f32.mrf.mxu0  ;;  %v1499_v28 = vpop.f32.mrf.mxu1  ;;  %v658_v31 = vmax.f32 %v458_v19, 0.0  ;;  %v690_v32 = vmax.f32 %v586_v20, 0.0 }
  0xeb   :  { %1387 = vst [vmem:[%s1866_s3 + $0x30] sm:$0xff] %v1255_v23   ;;  %1403 = vst [vmem:[%s1866_s3 + $0xb0] sm:$0xff] %v1335_v24   ;;  %v461_v29 = vadd.f32 %v1467_v27, %v1701_v33  ;;  %v589_v30 = vadd.f32 %v1499_v28, %v1701_v33  ;;  %v656_v40 = vmax.f32 %v450_v25, 0.0 }
  0xec   :  { %v452_v34 = vpop.f32.mrf.mxu0  ;;  %v580_v35 = vpop.f32.mrf.mxu1  ;;  %v688_v41 = vmax.f32 %v578_v26, 0.0 }
  0xed   :  { %v659_v36 = vmax.f32 %v461_v29, 0.0  ;;  %v691_v37 = vmax.f32 %v589_v30, 0.0  ;;  %v453_v38 = vadd.f32 %v1701_v33, %v452_v34  ;;  %v581_v39 = vadd.f32 %v1701_v33, %v580_v35 }
  0xee   :  { %v1470_v42 = vpop.f32.mrf.mxu0  ;;  %v1502_v43 = vpop.f32.mrf.mxu1 }
  0xef   :  { %v1270_v44 = vpack.c.bf16 %v659_v36, %v658_v31  ;;  %v1350_v45 = vpack.c.bf16 %v691_v37, %v690_v32  ;;  %v657_v46 = vmax.f32 %v453_v38, 0.0  ;;  %v689_v47 = vmax.f32 %v581_v39, 0.0 }
  0xf0   :  { %v474_v48 = vadd.f32 %v1470_v42, %v1701_v33  ;;  %v602_v49 = vadd.f32 %v1502_v43, %v1701_v33  ;;  %v465_v50 = vpop.f32.mrf.mxu0  ;;  %v593_v51 = vpop.f32.mrf.mxu1 }
  0xf1   :  { %1390 = vst [vmem:[%s1866_s3 + $0x48] sm:$0xff] %v1270_v44   ;;  %1406 = vst [vmem:[%s1866_s3 + $0xc8] sm:$0xff] %v1350_v45   ;;  %v1265_v52 = vpack.c.bf16 %v657_v46, %v656_v40  ;;  %v1345_v53 = vpack.c.bf16 %v689_v47, %v688_v41  ;;  %v466_v54 = vadd.f32 %v1701_v33, %v465_v50 }
  0xf2   :  { %v594_v55 = vadd.f32 %v1701_v33, %v593_v51  ;;  %v1471_v56 = vpop.f32.mrf.mxu0  ;;  %v1503_v57 = vpop.f32.mrf.mxu1  ;;  %v662_v60 = vmax.f32 %v474_v48, 0.0  ;;  %v694_v61 = vmax.f32 %v602_v49, 0.0 }
  0xf3   :  { %1389 = vst [vmem:[%s1866_s3 + $0x40] sm:$0xff] %v1265_v52   ;;  %1405 = vst [vmem:[%s1866_s3 + $0xc0] sm:$0xff] %v1345_v53   ;;  %v477_v58 = vadd.f32 %v1471_v56, %v1701_v33  ;;  %v605_v59 = vadd.f32 %v1503_v57, %v1701_v33  ;;  %v660_v4 = vmax.f32 %v466_v54, 0.0 }
  0xf4   :  { %v468_v62 = vpop.f32.mrf.mxu0  ;;  %v596_v63 = vpop.f32.mrf.mxu1  ;;  %v692_v5 = vmax.f32 %v594_v55, 0.0 }
  0xf5   :  { %v663_v0 = vmax.f32 %v477_v58, 0.0  ;;  %v695_v1 = vmax.f32 %v605_v59, 0.0  ;;  %v469_v2 = vadd.f32 %v1701_v33, %v468_v62  ;;  %v597_v3 = vadd.f32 %v1701_v33, %v596_v63 }
  0xf6   :  { %v1474_v6 = vpop.f32.mrf.mxu0  ;;  %v1506_v7 = vpop.f32.mrf.mxu1 }
  0xf7   :  { %v1280_v8 = vpack.c.bf16 %v663_v0, %v662_v60  ;;  %v1360_v9 = vpack.c.bf16 %v695_v1, %v694_v61  ;;  %v661_v10 = vmax.f32 %v469_v2, 0.0  ;;  %v693_v11 = vmax.f32 %v597_v3, 0.0 }
  0xf8   :  { %v490_v12 = vadd.f32 %v1474_v6, %v1701_v33  ;;  %v618_v13 = vadd.f32 %v1506_v7, %v1701_v33  ;;  %v481_v14 = vpop.f32.mrf.mxu0  ;;  %v609_v15 = vpop.f32.mrf.mxu1 }
  0xf9   :  { %1392 = vst [vmem:[%s1866_s3 + $0x58] sm:$0xff] %v1280_v8   ;;  %1408 = vst [vmem:[%s1866_s3 + $0xd8] sm:$0xff] %v1360_v9   ;;  %v1275_v16 = vpack.c.bf16 %v661_v10, %v660_v4  ;;  %v1355_v17 = vpack.c.bf16 %v693_v11, %v692_v5  ;;  %v482_v18 = vadd.f32 %v1701_v33, %v481_v14 }
  0xfa   :  { %v610_v19 = vadd.f32 %v1701_v33, %v609_v15  ;;  %v1475_v20 = vpop.f32.mrf.mxu0  ;;  %v1507_v21 = vpop.f32.mrf.mxu1  ;;  %v666_v24 = vmax.f32 %v490_v12, 0.0  ;;  %v698_v25 = vmax.f32 %v618_v13, 0.0 }
  0xfb   :  { %1391 = vst [vmem:[%s1866_s3 + $0x50] sm:$0xff] %v1275_v16   ;;  %1407 = vst [vmem:[%s1866_s3 + $0xd0] sm:$0xff] %v1355_v17   ;;  %v493_v22 = vadd.f32 %v1475_v20, %v1701_v33  ;;  %v621_v23 = vadd.f32 %v1507_v21, %v1701_v33  ;;  %v664_v32 = vmax.f32 %v482_v18, 0.0 }
  0xfc   :  { %v484_v26 = vpop.f32.mrf.mxu0  ;;  %v612_v27 = vpop.f32.mrf.mxu1  ;;  %v696_v34 = vmax.f32 %v610_v19, 0.0 }
  0xfd   :  { %v667_v28 = vmax.f32 %v493_v22, 0.0  ;;  %v699_v29 = vmax.f32 %v621_v23, 0.0  ;;  %v485_v30 = vadd.f32 %v1701_v33, %v484_v26  ;;  %v613_v31 = vadd.f32 %v1701_v33, %v612_v27 }
  0xfe   :  { %v1478_v35 = vpop.f32.mrf.mxu0  ;;  %v1510_v36 = vpop.f32.mrf.mxu1 }
  0xff   :  { %v1290_v37 = vpack.c.bf16 %v667_v28, %v666_v24  ;;  %v1370_v38 = vpack.c.bf16 %v699_v29, %v698_v25  ;;  %v665_v39 = vmax.f32 %v485_v30, 0.0  ;;  %v697_v40 = vmax.f32 %v613_v31, 0.0 }
 0x100   :  { %v506_v41 = vadd.f32 %v1478_v35, %v1701_v33  ;;  %v634_v42 = vadd.f32 %v1510_v36, %v1701_v33  ;;  %v497_v43 = vpop.f32.mrf.mxu0  ;;  %v625_v44 = vpop.f32.mrf.mxu1 }
 0x101   :  { %1394 = vst [vmem:[%s1866_s3 + $0x68] sm:$0xff] %v1290_v37   ;;  %1410 = vst [vmem:[%s1866_s3 + $0xe8] sm:$0xff] %v1370_v38   ;;  %v1285_v45 = vpack.c.bf16 %v665_v39, %v664_v32  ;;  %v1365_v46 = vpack.c.bf16 %v697_v40, %v696_v34  ;;  %v498_v47 = vadd.f32 %v1701_v33, %v497_v43 }
 0x102   :  { %v626_v48 = vadd.f32 %v1701_v33, %v625_v44  ;;  %v1479_v49 = vpop.f32.mrf.mxu0  ;;  %v1511_v50 = vpop.f32.mrf.mxu1  ;;  %v670_v53 = vmax.f32 %v506_v41, 0.0  ;;  %v702_v54 = vmax.f32 %v634_v42, 0.0 }
 0x103   :  { %1393 = vst [vmem:[%s1866_s3 + $0x60] sm:$0xff] %v1285_v45   ;;  %1409 = vst [vmem:[%s1866_s3 + $0xe0] sm:$0xff] %v1365_v46   ;;  %v509_v51 = vadd.f32 %v1479_v49, %v1701_v33  ;;  %v637_v52 = vadd.f32 %v1511_v50, %v1701_v33  ;;  %v668_v61 = vmax.f32 %v498_v47, 0.0 }
 0x104   :  { %v500_v55 = vpop.f32.mrf.mxu0  ;;  %v628_v56 = vpop.f32.mrf.mxu1  ;;  %v700_v62 = vmax.f32 %v626_v48, 0.0 }
 0x105   :  { %v671_v57 = vmax.f32 %v509_v51, 0.0  ;;  %v703_v58 = vmax.f32 %v637_v52, 0.0  ;;  %v501_v59 = vadd.f32 %v1701_v33, %v500_v55  ;;  %v629_v60 = vadd.f32 %v1701_v33, %v628_v56 }
 0x107   :  { %v1300_v63 = vpack.c.bf16 %v671_v57, %v670_v53  ;;  %v1380_v0 = vpack.c.bf16 %v703_v58, %v702_v54  ;;  %v669_v1 = vmax.f32 %v501_v59, 0.0  ;;  %v701_v2 = vmax.f32 %v629_v60, 0.0 }
 0x109   :  { %1396 = vst [vmem:[%s1866_s3 + $0x78] sm:$0xff] %v1300_v63   ;;  %1412 = vst [vmem:[%s1866_s3 + $0xf8] sm:$0xff] %v1380_v0   ;;  %v1295_v3 = vpack.c.bf16 %v669_v1, %v668_v61  ;;  %v1375_v4 = vpack.c.bf16 %v701_v2, %v700_v62 }
 0x10b   :  { %1395 = vst [vmem:[%s1866_s3 + $0x70] sm:$0xff] %v1295_v3   ;;  %1411 = vst [vmem:[%s1866_s3 + $0xf0] sm:$0xff] %v1375_v4  }

// kernel: forward.11
= control target key start
LH: loop header
LB: loop body
LE: loop exit
PB: predicated region body
PF: predicated region fallthrough
CT: control target
= control target key end

     0   :  { %vm110_vm0 = vcmask 523264   ;;  %s579_s1 = inlined_call_operand.vmem [shape: bf16[64,128], index: 1, kind: input, shape index: {}]   ;;  %s580_s0 = inlined_call_operand.vmem [shape: bf16[128,64], index: 0, kind: input, shape index: {}]   ;;  %s581_s2 = inlined_call_operand.vmem [shape: f32[1,128], index: 2, kind: input, shape index: {}]   ;;  %s582_s3 = inlined_call_operand.vmem [shape: bf16[128,128], index: 3, kind: output, shape index: {}]  }
   0x1   :  { %v476_v0 = vld [vmem:[%s579_s1 + $0x18] sm:$0xff]   ;;  %v477_v1 = vld [vmem:[%s579_s1 + $0x10] sm:$0xff]   ;;  %v478_v2 = vld [vmem:[%s579_s1 + $0x8] sm:$0xff]  }
   0x2   :  { %444 = vmatprep.subr.bf16.mxu0 %v476_v0  ;;  %468 = vmatprep.subr.bf16.mxu1 %v476_v0  ;;  %v480_v3 = vld [vmem:[%s580_s0] sm:$0xff]   ;;  %v482_v6 = vld [vmem:[%s580_s0 + $0x8] sm:$0xff]   ;;  %v484_v8 = vld [vmem:[%s580_s0 + $0x10] sm:$0xff]  }
   0x3   :  { %445 = vmatpush3.bf16.msra.mxu0 %v476_v0  ;;  %472 = vmatpush3.bf16.msra.mxu1 %v476_v0  ;;  %v481_v4 = vld [vmem:[%s580_s0 + $0x20] sm:$0xff]   ;;  %v483_v7 = vld [vmem:[%s580_s0 + $0x28] sm:$0xff]   ;;  %v485_v9 = vld [vmem:[%s580_s0 + $0x30] sm:$0xff]  }
   0x4   :  { %446 = vmatprep.subr.bf16.mxu0 %v477_v1  ;;  %469 = vmatprep.subr.bf16.mxu1 %v477_v1  ;;  %v479_v5 = vld [vmem:[%s579_s1] sm:$0xff]   ;;  %v486_v10 = vld [vmem:[%s580_s0 + $0x18] sm:$0xff]  }
   0x5   :  { %452 = vmatprep.mubr.msk.bf16.mxu0 %vm110_vm0, %v480_v3  ;;  %460 = vmatprep.mubr.msk.bf16.mxu1 %vm110_vm0, %v481_v4  ;;  %v487_v11 = vld [vmem:[%s580_s0 + $0x38] sm:$0xff]   ;;  %v332_v12 = vld [vmem:[%s581_s2] ss:$0 sm:$0xff] }
   0x7   :  { %447 = vmatpush3.bf16.msra.mxu0 %v477_v1  ;;  %473 = vmatpush3.bf16.msra.mxu1 %v477_v1 }
   0x8   :  { %448 = vmatprep.subr.bf16.mxu0 %v478_v2  ;;  %470 = vmatprep.subr.bf16.mxu1 %v478_v2 }
   0xb   :  { %449 = vmatpush3.bf16.msra.mxu0 %v478_v2  ;;  %474 = vmatpush3.bf16.msra.mxu1 %v478_v2 }
   0xc   :  { %450 = vmatprep.subr.bf16.mxu0 %v479_v5  ;;  %471 = vmatprep.subr.bf16.mxu1 %v479_v5 }
   0xf   :  { %451 = vmatpush3.bf16.msra.mxu0 %v479_v5  ;;  %475 = vmatpush3.bf16.msra.mxu1 %v479_v5 }
  0x12   :  { %453 = vmatmul.mubr.msk.bf16.vlgmr.msra.gmra.mxu0 %vm110_vm0, %v482_v6  ;;  %461 = vmatmul.mubr.msk.bf16.vlgmr.msra.gmra.mxu1 %vm110_vm0, %v483_v7 }
  0x13   :  { %456 = vmatprep.mubr.msk.bf16.mxu0 %vm110_vm0, %v484_v8  ;;  %464 = vmatprep.mubr.msk.bf16.mxu1 %vm110_vm0, %v485_v9 }
  0x1a   :  { %457 = vmatmul.mubr.msk.bf16.gmra.mxu0 %vm110_vm0, %v486_v10  ;;  %465 = vmatmul.mubr.msk.bf16.gmra.mxu1 %vm110_vm0, %v487_v11 }
  0xd2   :  { %v454_v13 = vpop.f32.mrf.mxu0  ;;  %v462_v14 = vpop.f32.mrf.mxu1 }
  0xd3   :  { %v178_v15 = vadd.f32 %v454_v13, %v332_v12  ;;  %v210_v16 = vadd.f32 %v462_v14, %v332_v12 }
  0xd4   :  { %v169_v17 = vpop.f32.mrf.mxu0  ;;  %v201_v18 = vpop.f32.mrf.mxu1 }
  0xd5   :  { %v170_v19 = vadd.f32 %v332_v12, %v169_v17  ;;  %v202_v20 = vadd.f32 %v332_v12, %v201_v18  ;;  %v234_v25 = vmax.f32 %v178_v15, 0.0  ;;  %v242_v26 = vmax.f32 %v210_v16, 0.0 }
  0xd6   :  { %v455_v21 = vpop.f32.mrf.mxu0  ;;  %v463_v22 = vpop.f32.mrf.mxu1 }
  0xd7   :  { %v181_v23 = vadd.f32 %v455_v21, %v332_v12  ;;  %v213_v24 = vadd.f32 %v463_v22, %v332_v12  ;;  %v232_v33 = vmax.f32 %v170_v19, 0.0  ;;  %v240_v34 = vmax.f32 %v202_v20, 0.0 }
  0xd8   :  { %v172_v27 = vpop.f32.mrf.mxu0  ;;  %v204_v28 = vpop.f32.mrf.mxu1 }
  0xd9   :  { %v235_v29 = vmax.f32 %v181_v23, 0.0  ;;  %v243_v30 = vmax.f32 %v213_v24, 0.0  ;;  %v173_v31 = vadd.f32 %v332_v12, %v172_v27  ;;  %v205_v32 = vadd.f32 %v332_v12, %v204_v28 }
  0xda   :  { %v458_v35 = vpop.f32.mrf.mxu0  ;;  %v466_v36 = vpop.f32.mrf.mxu1 }
  0xdb   :  { %v393_v37 = vpack.c.bf16 %v235_v29, %v234_v25  ;;  %v413_v38 = vpack.c.bf16 %v243_v30, %v242_v26  ;;  %v233_v39 = vmax.f32 %v173_v31, 0.0  ;;  %v241_v40 = vmax.f32 %v205_v32, 0.0 }
  0xdc   :  { %v194_v41 = vadd.f32 %v458_v35, %v332_v12  ;;  %v226_v42 = vadd.f32 %v466_v36, %v332_v12  ;;  %v185_v43 = vpop.f32.mrf.mxu0  ;;  %v217_v44 = vpop.f32.mrf.mxu1 }
  0xdd   :  { %425 = vst [vmem:[%s582_s3 + $0x8] sm:$0xff] %v393_v37   ;;  %429 = vst [vmem:[%s582_s3 + $0x28] sm:$0xff] %v413_v38   ;;  %v388_v45 = vpack.c.bf16 %v233_v39, %v232_v33  ;;  %v408_v46 = vpack.c.bf16 %v241_v40, %v240_v34  ;;  %v186_v47 = vadd.f32 %v332_v12, %v185_v43 }
  0xde   :  { %v218_v48 = vadd.f32 %v332_v12, %v217_v44  ;;  %v459_v49 = vpop.f32.mrf.mxu0  ;;  %v467_v50 = vpop.f32.mrf.mxu1  ;;  %v238_v53 = vmax.f32 %v194_v41, 0.0  ;;  %v246_v54 = vmax.f32 %v226_v42, 0.0 }
  0xdf   :  { %389 = vst [vmem:[%s582_s3] sm:$0xff] %v388_v45   ;;  %428 = vst [vmem:[%s582_s3 + $0x20] sm:$0xff] %v408_v46   ;;  %v197_v51 = vadd.f32 %v459_v49, %v332_v12  ;;  %v229_v52 = vadd.f32 %v467_v50, %v332_v12  ;;  %v236_v61 = vmax.f32 %v186_v47, 0.0 }
  0xe0   :  { %v188_v55 = vpop.f32.mrf.mxu0  ;;  %v220_v56 = vpop.f32.mrf.mxu1  ;;  %v244_v62 = vmax.f32 %v218_v48, 0.0 }
  0xe1   :  { %v239_v57 = vmax.f32 %v197_v51, 0.0  ;;  %v247_v58 = vmax.f32 %v229_v52, 0.0  ;;  %v189_v59 = vadd.f32 %v332_v12, %v188_v55  ;;  %v221_v60 = vadd.f32 %v332_v12, %v220_v56 }
  0xe3   :  { %v403_v63 = vpack.c.bf16 %v239_v57, %v238_v53  ;;  %v423_v0 = vpack.c.bf16 %v247_v58, %v246_v54  ;;  %v237_v1 = vmax.f32 %v189_v59, 0.0  ;;  %v245_v2 = vmax.f32 %v221_v60, 0.0 }
  0xe5   :  { %427 = vst [vmem:[%s582_s3 + $0x18] sm:$0xff] %v403_v63   ;;  %431 = vst [vmem:[%s582_s3 + $0x38] sm:$0xff] %v423_v0   ;;  %v398_v3 = vpack.c.bf16 %v237_v1, %v236_v61  ;;  %v418_v4 = vpack.c.bf16 %v245_v2, %v244_v62 }
  0xe7   :  { %426 = vst [vmem:[%s582_s3 + $0x10] sm:$0xff] %v398_v3   ;;  %430 = vst [vmem:[%s582_s3 + $0x30] sm:$0xff] %v418_v4  }

// kernel: forward.12
= control target key start
LH: loop header
LB: loop body
LE: loop exit
PB: predicated region body
PF: predicated region fallthrough
CT: control target
= control target key end

     0   :  { %s308_s1 = inlined_call_operand.vmem [shape: bf16[128,128], index: 1, kind: input, shape index: {}]   ;;  %s309_s0 = inlined_call_operand.vmem [shape: bf16[32,128], index: 0, kind: input, shape index: {}]   ;;  %s310_s2 = inlined_call_operand.vmem [shape: f32[1,128], index: 2, kind: input, shape index: {}]   ;;  %s311_s3 = inlined_call_operand.vmem [shape: bf16[32,128], index: 3, kind: output, shape index: {}]  }
   0x1   :  { %v239_v0 = vld [vmem:[%s308_s1 + $0x38] sm:$0xff]   ;;  %v240_v1 = vld [vmem:[%s308_s1 + $0x30] sm:$0xff]   ;;  %v241_v2 = vld [vmem:[%s308_s1 + $0x28] sm:$0xff]  }
   0x2   :  { %219 = vmatprep.subr.bf16.mxu0 %v239_v0  ;;  %v242_v3 = vld [vmem:[%s308_s1 + $0x20] sm:$0xff]   ;;  %v243_v5 = vld [vmem:[%s308_s1 + $0x18] sm:$0xff]   ;;  %v244_v6 = vld [vmem:[%s308_s1 + $0x10] sm:$0xff]  }
   0x3   :  { %220 = vmatpush3.bf16.msra.mxu0 %v239_v0  ;;  %v247_v4 = vld [vmem:[%s309_s0] sm:$0xff]   ;;  %v245_v7 = vld [vmem:[%s308_s1 + $0x8] sm:$0xff]  }
   0x4   :  { %221 = vmatprep.subr.bf16.mxu0 %v240_v1  ;;  %235 = vmatprep.mubr.bf16.mxu0 %v247_v4  ;;  %v246_v8 = vld [vmem:[%s308_s1] sm:$0xff]   ;;  %v248_v9 = vld [vmem:[%s309_s0 + $0x8] sm:$0xff]  }
   0x5   :  { %v179_v11 = vld [vmem:[%s310_s2] ss:$0 sm:$0xff] }
   0x7   :  { %222 = vmatpush3.bf16.msra.mxu0 %v240_v1 }
   0x8   :  { %223 = vmatprep.subr.bf16.mxu0 %v241_v2 }
   0xb   :  { %224 = vmatpush3.bf16.msra.mxu0 %v241_v2 }
   0xc   :  { %225 = vmatprep.subr.bf16.mxu0 %v242_v3 }
   0xf   :  { %226 = vmatpush3.bf16.msra.mxu0 %v242_v3 }
  0x10   :  { %227 = vmatprep.subr.bf16.mxu0 %v243_v5 }
  0x13   :  { %228 = vmatpush3.bf16.msra.mxu0 %v243_v5 }
  0x14   :  { %229 = vmatprep.subr.bf16.mxu0 %v244_v6 }
  0x17   :  { %230 = vmatpush3.bf16.msra.mxu0 %v244_v6 }
  0x18   :  { %231 = vmatprep.subr.bf16.mxu0 %v245_v7 }
  0x1b   :  { %232 = vmatpush3.bf16.msra.mxu0 %v245_v7 }
  0x1c   :  { %233 = vmatprep.subr.bf16.mxu0 %v246_v8 }
  0x1f   :  { %234 = vmatpush3.bf16.msra.mxu0 %v246_v8 }
  0x22   :  { %236 = vmatmul.mubr.bf16.vlgmr.msra.gmra.mxu0 %v248_v9 }
  0xe2   :  { %v237_v10 = vpop.f32.mrf.mxu0 }
  0xe3   :  { %v145_v13 = vadd.f32 %v237_v10, %v179_v11 }
  0xe4   :  { %v136_v12 = vpop.f32.mrf.mxu0 }
  0xe5   :  { %v137_v15 = vadd.f32 %v179_v11, %v136_v12  ;;  %v153_v18 = vmax.f32 %v145_v13, 0.0 }
  0xe6   :  { %v238_v14 = vpop.f32.mrf.mxu0 }
  0xe7   :  { %v148_v16 = vadd.f32 %v238_v14, %v179_v11  ;;  %v151_v21 = vmax.f32 %v137_v15, 0.0 }
  0xe8   :  { %v139_v17 = vpop.f32.mrf.mxu0 }
  0xe9   :  { %v154_v19 = vmax.f32 %v148_v16, 0.0  ;;  %v140_v20 = vadd.f32 %v179_v11, %v139_v17 }
  0xeb   :  { %v206_v22 = vpack.c.bf16 %v154_v19, %v153_v18  ;;  %v152_v23 = vmax.f32 %v140_v20, 0.0 }
  0xed   :  { %208 = vst [vmem:[%s311_s3 + $0x8] sm:$0xff] %v206_v22   ;;  %v201_v24 = vpack.c.bf16 %v152_v23, %v151_v21 }
  0xef   :  { %202 = vst [vmem:[%s311_s3] sm:$0xff] %v201_v24  }

// kernel: forward.13
= control target key start
LH: loop header
LB: loop body
LE: loop exit
PB: predicated region body
PF: predicated region fallthrough
CT: control target
= control target key end

     0   :  { %s341_s1 = inlined_call_operand.vmem [shape: bf16[256,128], index: 1, kind: input, shape index: {}]   ;;  %s342_s0 = inlined_call_operand.vmem [shape: bf16[8,256], index: 0, kind: input, shape index: {}]   ;;  %s343_s2 = inlined_call_operand.vmem [shape: f32[1,128], index: 2, kind: input, shape index: {}]   ;;  %s344_s3 = inlined_call_operand.vmem [shape: bf16[8,128], index: 3, kind: output, shape index: {}]  }
   0x1   :  { %v246_v0 = vld [vmem:[%s341_s1 + $0x78] sm:$0xff]   ;;  %v248_v2 = vld [vmem:[%s341_s1 + $0x70] sm:$0xff]   ;;  %v250_v4 = vld [vmem:[%s341_s1 + $0x68] sm:$0xff]  }
   0x2   :  { %v247_v1 = vld [vmem:[%s341_s1 + $0x38] sm:$0xff]   ;;  %224 = vmatprep.subr.bf16.mxu0 %v246_v0  ;;  %v249_v3 = vld [vmem:[%s341_s1 + $0x30] sm:$0xff]   ;;  %v251_v5 = vld [vmem:[%s341_s1 + $0x28] sm:$0xff]  }
   0x3   :  { %225 = vmatpush3.bf16.msra.mxu0 %v247_v1  ;;  %v252_v6 = vld [vmem:[%s341_s1 + $0x60] sm:$0xff]   ;;  %v254_v8 = vld [vmem:[%s341_s1 + $0x58] sm:$0xff]   ;;  %v256_v10 = vld [vmem:[%s341_s1 + $0x50] sm:$0xff]  }
   0x4   :  { %226 = vmatprep.subr.bf16.mxu0 %v248_v2  ;;  %v253_v7 = vld [vmem:[%s341_s1 + $0x20] sm:$0xff]   ;;  %v255_v9 = vld [vmem:[%s341_s1 + $0x18] sm:$0xff]   ;;  %v257_v13 = vld [vmem:[%s341_s1 + $0x10] sm:$0xff]  }
   0x5   :  { %v15_v11 = vld [vmem:[%s342_s0] sm:$0xff]  ;;  %v258_v14 = vld [vmem:[%s341_s1 + $0x48] sm:$0xff]  }
   0x6   :  { %v207_v12 = vcombine.high %v15_v11, %v15_v11  ;;  %v259_v15 = vld [vmem:[%s341_s1 + $0x8] sm:$0xff]   ;;  %v260_v16 = vld [vmem:[%s341_s1 + $0x40] sm:$0xff]   ;;  %v206_v18 = vcombine.low %v15_v11, %v15_v11 }
   0x7   :  { %227 = vmatpush3.bf16.msra.mxu0 %v249_v3  ;;  %v261_v17 = vld [vmem:[%s341_s1] sm:$0xff]  }
   0x8   :  { %228 = vmatprep.subr.bf16.mxu0 %v250_v4  ;;  %190 = vmatprep.mubr.bf16.mxu0 %v207_v12  ;;  %v205_v20 = vld [vmem:[%s343_s2] ss:$0 sm:$0xff] }
   0xb   :  { %229 = vmatpush3.bf16.msra.mxu0 %v251_v5 }
   0xc   :  { %230 = vmatprep.subr.bf16.mxu0 %v252_v6 }
   0xf   :  { %231 = vmatpush3.bf16.msra.mxu0 %v253_v7 }
  0x10   :  { %232 = vmatprep.subr.bf16.mxu0 %v254_v8 }
  0x13   :  { %233 = vmatpush3.bf16.msra.mxu0 %v255_v9 }
  0x14   :  { %234 = vmatprep.subr.bf16.mxu0 %v256_v10 }
  0x17   :  { %235 = vmatpush3.bf16.msra.mxu0 %v257_v13 }
  0x18   :  { %236 = vmatprep.subr.bf16.mxu0 %v258_v14 }
  0x1b   :  { %237 = vmatpush3.bf16.msra.mxu0 %v259_v15 }
  0x1c   :  { %238 = vmatprep.subr.bf16.mxu0 %v260_v16 }
  0x1f   :  { %239 = vmatpush3.bf16.msra.mxu0 %v261_v17 }
  0x22   :  { %191 = vmatmul.mubr.bf16.vlgmr.msra.gmra.mxu0 %v206_v18 }
  0xe2   :  { %v240_v19 = vpop.f32.mrf.mxu0 }
  0xe4   :  { %v241_v21 = vpop.f32.mrf.mxu0 }
  0xe5   :  { %v242_v22 = vadd.f32 %v241_v21, %v240_v19 }
  0xe6   :  { %v243_v23 = vpop.f32.mrf.mxu0 }
  0xe7   :  { %v193_v24 = vadd.f32 %v242_v22, %v205_v20 }
  0xe8   :  { %v244_v25 = vpop.f32.mrf.mxu0 }
  0xe9   :  { %v198_v26 = vmax.f32 %v193_v24, 0.0 }
  0xeb   :  { %v199_v27 = vpack.c.bf16 %v198_v26, %v198_v26 }
  0xed   :  { %200 = vst [vmem:[%s344_s3] sm:$0xf] %v199_v27 }

// kernel: forward.14
= control target key start
LH: loop header
LB: loop body
LE: loop exit
PB: predicated region body
PF: predicated region fallthrough
CT: control target
= control target key end

     0   :  { %s626_s1 = inlined_call_operand.vmem [shape: bf16[512,128], index: 1, kind: input, shape index: {}]   ;;  %s627_s0 = inlined_call_operand.vmem [shape: bf16[8,512], index: 0, kind: input, shape index: {}]   ;;  %s628_s2 = inlined_call_operand.vmem [shape: f32[1,128], index: 2, kind: input, shape index: {}]   ;;  %s629_s3 = inlined_call_operand.vmem [shape: bf16[8,128], index: 3, kind: output, shape index: {}]  }
   0x1   :  { %v462_v0 = vld [vmem:[%s626_s1 + $0x78] sm:$0xff]   ;;  %v466_v4 = vld [vmem:[%s626_s1 + $0x70] sm:$0xff]   ;;  %v470_v8 = vld [vmem:[%s626_s1 + $0x68] sm:$0xff]  }
   0x2   :  { %v463_v1 = vld [vmem:[%s626_s1 + $0xf8] sm:$0xff]   ;;  %418 = vmatprep.subr.bf16.mxu0 %v462_v0  ;;  %v467_v5 = vld [vmem:[%s626_s1 + $0xf0] sm:$0xff]   ;;  %v471_v9 = vld [vmem:[%s626_s1 + $0xe8] sm:$0xff]  }
   0x3   :  { %v464_v2 = vld [vmem:[%s626_s1 + $0x38] sm:$0xff]   ;;  %440 = vmatprep.subr.bf16.mxu1 %v463_v1  ;;  %v468_v6 = vld [vmem:[%s626_s1 + $0x30] sm:$0xff]   ;;  %v472_v10 = vld [vmem:[%s626_s1 + $0x28] sm:$0xff]  }
   0x4   :  { %v465_v3 = vld [vmem:[%s626_s1 + $0xb8] sm:$0xff]   ;;  %419 = vmatpush3.bf16.msra.mxu0 %v464_v2  ;;  %v469_v7 = vld [vmem:[%s626_s1 + $0xb0] sm:$0xff]   ;;  %v473_v11 = vld [vmem:[%s626_s1 + $0xa8] sm:$0xff]  }
   0x5   :  { %441 = vmatpush3.bf16.msra.mxu1 %v465_v3  ;;  %420 = vmatprep.subr.bf16.mxu0 %v466_v4  ;;  %v474_v12 = vld [vmem:[%s626_s1 + $0x60] sm:$0xff]   ;;  %v478_v16 = vld [vmem:[%s626_s1 + $0x58] sm:$0xff]   ;;  %v482_v20 = vld [vmem:[%s626_s1 + $0x50] sm:$0xff]  }
   0x6   :  { %442 = vmatprep.subr.bf16.mxu1 %v467_v5  ;;  %v475_v13 = vld [vmem:[%s626_s1 + $0xe0] sm:$0xff]   ;;  %v479_v17 = vld [vmem:[%s626_s1 + $0xd8] sm:$0xff]   ;;  %v483_v21 = vld [vmem:[%s626_s1 + $0xd0] sm:$0xff]  }
   0x7   :  { %v476_v14 = vld [vmem:[%s626_s1 + $0x20] sm:$0xff]   ;;  %v480_v18 = vld [vmem:[%s626_s1 + $0x18] sm:$0xff]   ;;  %v484_v22 = vld [vmem:[%s626_s1 + $0x10] sm:$0xff]  }
   0x8   :  { %421 = vmatpush3.bf16.msra.mxu0 %v468_v6  ;;  %v477_v15 = vld [vmem:[%s626_s1 + $0xa0] sm:$0xff]   ;;  %v481_v19 = vld [vmem:[%s626_s1 + $0x98] sm:$0xff]   ;;  %v485_v23 = vld [vmem:[%s626_s1 + $0x90] sm:$0xff]  }
   0x9   :  { %443 = vmatpush3.bf16.msra.mxu1 %v469_v7  ;;  %422 = vmatprep.subr.bf16.mxu0 %v470_v8  ;;  %v486_v24 = vld [vmem:[%s626_s1 + $0x48] sm:$0xff]   ;;  %v490_v28 = vld [vmem:[%s626_s1 + $0x40] sm:$0xff]  }
   0xa   :  { %444 = vmatprep.subr.bf16.mxu1 %v471_v9  ;;  %v487_v25 = vld [vmem:[%s626_s1 + $0xc8] sm:$0xff]   ;;  %v491_v29 = vld [vmem:[%s626_s1 + $0xc0] sm:$0xff]  }
   0xb   :  { %v488_v26 = vld [vmem:[%s626_s1 + $0x8] sm:$0xff]   ;;  %v492_v30 = vld [vmem:[%s626_s1] sm:$0xff]  }
   0xc   :  { %423 = vmatpush3.bf16.msra.mxu0 %v472_v10  ;;  %v489_v27 = vld [vmem:[%s626_s1 + $0x88] sm:$0xff]   ;;  %v493_v31 = vld [vmem:[%s626_s1 + $0x80] sm:$0xff]  }
   0xd   :  { %445 = vmatpush3.bf16.msra.mxu1 %v473_v11  ;;  %424 = vmatprep.subr.bf16.mxu0 %v474_v12  ;;  %v15_v32 = vld [vmem:[%s627_s0] sm:$0xff]  ;;  %v16_v33 = vld [vmem:[%s627_s0 + $0x8] sm:$0xff] }
   0xe   :  { %446 = vmatprep.subr.bf16.mxu1 %v475_v13  ;;  %v382_v34 = vcombine.low %v15_v32, %v15_v32  ;;  %v383_v35 = vcombine.high %v15_v32, %v15_v32  ;;  %v384_v36 = vcombine.low %v16_v33, %v16_v33  ;;  %v385_v37 = vcombine.high %v16_v33, %v16_v33  ;;  %v381_v40 = vld [vmem:[%s628_s2] ss:$0 sm:$0xff] }
  0x10   :  { %425 = vmatpush3.bf16.msra.mxu0 %v476_v14  ;;  %326 = vmatprep.mubr.bf16.mxu0 %v383_v35 }
  0x11   :  { %447 = vmatpush3.bf16.msra.mxu1 %v477_v15  ;;  %426 = vmatprep.subr.bf16.mxu0 %v478_v16 }
  0x12   :  { %448 = vmatprep.subr.bf16.mxu1 %v479_v17  ;;  %366 = vmatprep.mubr.bf16.mxu1 %v385_v37 }
  0x14   :  { %427 = vmatpush3.bf16.msra.mxu0 %v480_v18 }
  0x15   :  { %449 = vmatpush3.bf16.msra.mxu1 %v481_v19  ;;  %428 = vmatprep.subr.bf16.mxu0 %v482_v20 }
  0x16   :  { %450 = vmatprep.subr.bf16.mxu1 %v483_v21 }
  0x18   :  { %429 = vmatpush3.bf16.msra.mxu0 %v484_v22 }
  0x19   :  { %451 = vmatpush3.bf16.msra.mxu1 %v485_v23  ;;  %430 = vmatprep.subr.bf16.mxu0 %v486_v24 }
  0x1a   :  { %452 = vmatprep.subr.bf16.mxu1 %v487_v25 }
  0x1c   :  { %431 = vmatpush3.bf16.msra.mxu0 %v488_v26 }
  0x1d   :  { %453 = vmatpush3.bf16.msra.mxu1 %v489_v27  ;;  %432 = vmatprep.subr.bf16.mxu0 %v490_v28 }
  0x1e   :  { %454 = vmatprep.subr.bf16.mxu1 %v491_v29 }
  0x20   :  { %433 = vmatpush3.bf16.msra.mxu0 %v492_v30 }
  0x21   :  { %455 = vmatpush3.bf16.msra.mxu1 %v493_v31 }
  0x23   :  { %327 = vmatmul.mubr.bf16.vlgmr.msra.gmra.mxu0 %v382_v34 }
  0x24   :  { %367 = vmatmul.mubr.bf16.vlgmr.msra.gmra.mxu1 %v384_v36 }
  0xe3   :  { %v434_v38 = vpop.f32.mrf.mxu0 }
  0xe4   :  { %v456_v39 = vpop.f32.mrf.mxu1 }
  0xe5   :  { %v435_v41 = vpop.f32.mrf.mxu0 }
  0xe6   :  { %v457_v42 = vpop.f32.mrf.mxu1  ;;  %v436_v43 = vadd.f32 %v435_v41, %v434_v38 }
  0xe7   :  { %v437_v44 = vpop.f32.mrf.mxu0  ;;  %v458_v47 = vadd.f32 %v457_v42, %v456_v39 }
  0xe8   :  { %v459_v45 = vpop.f32.mrf.mxu1  ;;  %v329_v46 = vadd.f32 %v436_v43, %v381_v40 }
  0xe9   :  { %v438_v48 = vpop.f32.mrf.mxu0 }
  0xea   :  { %v460_v49 = vpop.f32.mrf.mxu1  ;;  %v369_v50 = vadd.f32 %v458_v47, %v329_v46 }
  0xec   :  { %v374_v51 = vmax.f32 %v369_v50, 0.0 }
  0xee   :  { %v375_v52 = vpack.c.bf16 %v374_v51, %v374_v51 }
  0xf0   :  { %376 = vst [vmem:[%s629_s3] sm:$0xf] %v375_v52 }

// kernel: forward.15
= control target key start
LH: loop header
LB: loop body
LE: loop exit
PB: predicated region body
PF: predicated region fallthrough
CT: control target
= control target key end

     0   :  { %v182_v0 = vmov 0.0   ;;  %vm183_vm0 = vmmov 0   ;;  %s237_s1 = inlined_call_operand.vmem [shape: bf16[128,128], index: 1, kind: input, shape index: {}]   ;;  %s238_s0 = inlined_call_operand.vmem [shape: bf16[8,128], index: 0, kind: input, shape index: {}]   ;;  %s239_s2 = inlined_call_operand.vmem [shape: f32[1,128], index: 2, kind: input, shape index: {}]   ;;  %s240_s3 = inlined_call_operand.vmem [shape: bf16[8,128], index: 3, kind: output, shape index: {}]  }
   0x1   :  { %152 = vmatprep.subr.bf16.mxu0 %v182_v0  ;;  %v174_v1 = vld [vmem:[%s237_s1 + $0x38] sm:$0xff]   ;;  %168 = vmatprep.mubr.msk.bf16.mxu0 %vm183_vm0, %v182_v0  ;;  %v175_v2 = vld [vmem:[%s237_s1 + $0x30] sm:$0xff]   ;;  %v176_v3 = vld [vmem:[%s237_s1 + $0x28] sm:$0xff]  }
   0x2   :  { %153 = vmatpush3.bf16.msra.mxu0 %v174_v1  ;;  %v177_v4 = vld [vmem:[%s237_s1 + $0x20] sm:$0xff]   ;;  %v178_v5 = vld [vmem:[%s237_s1 + $0x18] sm:$0xff]   ;;  %v179_v6 = vld [vmem:[%s237_s1 + $0x10] sm:$0xff]  }
   0x3   :  { %154 = vmatprep.subr.bf16.mxu0 %v182_v0  ;;  %v180_v7 = vld [vmem:[%s237_s1 + $0x8] sm:$0xff]   ;;  %v181_v8 = vld [vmem:[%s237_s1] sm:$0xff]  }
   0x4   :  { %v15_v9 = vld [vmem:[%s238_s0] sm:$0xf] }
   0x5   :  { %v134_v10 = vld [vmem:[%s239_s2] ss:$0 sm:$0xff] }
   0x6   :  { %155 = vmatpush3.bf16.msra.mxu0 %v175_v2 }
   0x7   :  { %156 = vmatprep.subr.bf16.mxu0 %v182_v0 }
   0xa   :  { %157 = vmatpush3.bf16.msra.mxu0 %v176_v3 }
   0xb   :  { %158 = vmatprep.subr.bf16.mxu0 %v182_v0 }
   0xe   :  { %159 = vmatpush3.bf16.msra.mxu0 %v177_v4 }
   0xf   :  { %160 = vmatprep.subr.bf16.mxu0 %v182_v0 }
  0x12   :  { %161 = vmatpush3.bf16.msra.mxu0 %v178_v5 }
  0x13   :  { %162 = vmatprep.subr.bf16.mxu0 %v182_v0 }
  0x16   :  { %163 = vmatpush3.bf16.msra.mxu0 %v179_v6 }
  0x17   :  { %164 = vmatprep.subr.bf16.mxu0 %v182_v0 }
  0x1a   :  { %165 = vmatpush3.bf16.msra.mxu0 %v180_v7 }
  0x1b   :  { %166 = vmatprep.subr.bf16.mxu0 %v182_v0 }
  0x1e   :  { %167 = vmatpush3.bf16.msra.mxu0 %v181_v8 }
  0x21   :  { %169 = vmatmul.mubr.bf16.vlgmr.msra.gmra.mxu0 %v15_v9 }
  0xe1   :  { %v121_v11 = vpop.f32.mrf.mxu0 }
  0xe2   :  { %v122_v12 = vadd.f32 %v134_v10, %v121_v11 }
  0xe3   :  { %v170_v13 = vpop.f32.mrf.mxu0 }
  0xe4   :  { %v127_v14 = vmax.f32 %v122_v12, 0.0 }
  0xe5   :  { %v124_v15 = vpop.f32.mrf.mxu0 }
  0xe6   :  { %v128_v16 = vpack.c.bf16 %v127_v14, %v127_v14 }
  0xe7   :  { %v171_v17 = vpop.f32.mrf.mxu0 }
  0xe8   :  { %129 = vst [vmem:[%s240_s3] sm:$0xf] %v128_v16 }

// kernel: forward.16
= control target key start
LH: loop header
LB: loop body
LE: loop exit
PB: predicated region body
PF: predicated region fallthrough
CT: control target
= control target key end

     0   :  { %s515_s3 = inlined_call_operand.vmem [shape: bf16[128,128], index: 3, kind: input, shape index: {}]   ;;  %s516_s2 = inlined_call_operand.vmem [shape: bf16[128,128], index: 2, kind: input, shape index: {}]   ;;  %s517_s1 = inlined_call_operand.vmem [shape: bf16[24,128], index: 1, kind: input, shape index: {}]   ;;  %s518_s0 = inlined_call_operand.vmem [shape: bf16[24,128], index: 0, kind: input, shape index: {}]   ;;  %s519_s4 = inlined_call_operand.vmem [shape: f32[1,128], index: 4, kind: input, shape index: {}]   ;;  %s520_s5 = inlined_call_operand.vmem [shape: bf16[24,128], index: 5, kind: output, shape index: {}]  }
   0x1   :  { %v396_v0 = vld [vmem:[%s515_s3 + $0x38] sm:$0xff]   ;;  %v398_v2 = vld [vmem:[%s515_s3 + $0x30] sm:$0xff]   ;;  %v400_v4 = vld [vmem:[%s515_s3 + $0x28] sm:$0xff]  }
   0x2   :  { %v397_v1 = vld [vmem:[%s516_s2 + $0x38] sm:$0xff]   ;;  %356 = vmatprep.subr.bf16.mxu0 %v396_v0  ;;  %v399_v3 = vld [vmem:[%s516_s2 + $0x30] sm:$0xff]   ;;  %v401_v5 = vld [vmem:[%s516_s2 + $0x28] sm:$0xff]  }
   0x3   :  { %376 = vmatprep.subr.bf16.mxu1 %v397_v1  ;;  %357 = vmatpush3.bf16.msra.mxu0 %v396_v0  ;;  %v402_v6 = vld [vmem:[%s515_s3 + $0x20] sm:$0xff]   ;;  %v404_v8 = vld [vmem:[%s515_s3 + $0x18] sm:$0xff]   ;;  %v406_v10 = vld [vmem:[%s515_s3 + $0x10] sm:$0xff]  }
   0x4   :  { %377 = vmatpush3.bf16.msra.mxu1 %v397_v1  ;;  %358 = vmatprep.subr.bf16.mxu0 %v398_v2  ;;  %v403_v7 = vld [vmem:[%s516_s2 + $0x20] sm:$0xff]   ;;  %v405_v9 = vld [vmem:[%s516_s2 + $0x18] sm:$0xff]   ;;  %v407_v11 = vld [vmem:[%s516_s2 + $0x10] sm:$0xff]  }
   0x5   :  { %378 = vmatprep.subr.bf16.mxu1 %v399_v3  ;;  %v412_v12 = vld [vmem:[%s517_s1] sm:$0xff]   ;;  %v408_v14 = vld [vmem:[%s515_s3 + $0x8] sm:$0xff]  }
   0x6   :  { %v413_v13 = vld [vmem:[%s518_s0] sm:$0xff]   ;;  %372 = vmatprep.mubr.bf16.mxu0 %v412_v12  ;;  %v409_v15 = vld [vmem:[%s516_s2 + $0x8] sm:$0xff]  }
   0x7   :  { %359 = vmatpush3.bf16.msra.mxu0 %v398_v2  ;;  %392 = vmatprep.mubr.bf16.mxu1 %v413_v13  ;;  %v410_v16 = vld [vmem:[%s515_s3] sm:$0xff]   ;;  %v414_v18 = vld [vmem:[%s517_s1 + $0x8] ss:$0 sps:$4 sm:$0xff]  }
   0x8   :  { %379 = vmatpush3.bf16.msra.mxu1 %v399_v3  ;;  %360 = vmatprep.subr.bf16.mxu0 %v400_v4  ;;  %v411_v17 = vld [vmem:[%s516_s2] sm:$0xff]   ;;  %v415_v19 = vld [vmem:[%s518_s0 + $0x8] ss:$0 sps:$4 sm:$0xff]  }
   0x9   :  { %380 = vmatprep.subr.bf16.mxu1 %v401_v5  ;;  %v324_v22 = vld [vmem:[%s519_s4] ss:$0 sm:$0xff] }
   0xb   :  { %361 = vmatpush3.bf16.msra.mxu0 %v400_v4 }
   0xc   :  { %381 = vmatpush3.bf16.msra.mxu1 %v401_v5  ;;  %362 = vmatprep.subr.bf16.mxu0 %v402_v6 }
   0xd   :  { %382 = vmatprep.subr.bf16.mxu1 %v403_v7 }
   0xf   :  { %363 = vmatpush3.bf16.msra.mxu0 %v402_v6 }
  0x10   :  { %383 = vmatpush3.bf16.msra.mxu1 %v403_v7  ;;  %364 = vmatprep.subr.bf16.mxu0 %v404_v8 }
  0x11   :  { %384 = vmatprep.subr.bf16.mxu1 %v405_v9 }
  0x13   :  { %365 = vmatpush3.bf16.msra.mxu0 %v404_v8 }
  0x14   :  { %385 = vmatpush3.bf16.msra.mxu1 %v405_v9  ;;  %366 = vmatprep.subr.bf16.mxu0 %v406_v10 }
  0x15   :  { %386 = vmatprep.subr.bf16.mxu1 %v407_v11 }
  0x17   :  { %367 = vmatpush3.bf16.msra.mxu0 %v406_v10 }
  0x18   :  { %387 = vmatpush3.bf16.msra.mxu1 %v407_v11  ;;  %368 = vmatprep.subr.bf16.mxu0 %v408_v14 }
  0x19   :  { %388 = vmatprep.subr.bf16.mxu1 %v409_v15 }
  0x1b   :  { %369 = vmatpush3.bf16.msra.mxu0 %v408_v14 }
  0x1c   :  { %389 = vmatpush3.bf16.msra.mxu1 %v409_v15  ;;  %370 = vmatprep.subr.bf16.mxu0 %v410_v16 }
  0x1d   :  { %390 = vmatprep.subr.bf16.mxu1 %v411_v17 }
  0x1f   :  { %371 = vmatpush3.bf16.msra.mxu0 %v410_v16 }
  0x20   :  { %391 = vmatpush3.bf16.msra.mxu1 %v411_v17 }
  0x22   :  { %373 = vmatmul.mubr.bf16.vlgmr.msra.gmra.mxu0 %v414_v18 }
  0x23   :  { %393 = vmatmul.mubr.bf16.vlgmr.msra.gmra.mxu1 %v415_v19 }
  0xe2   :  { %v374_v20 = vpop.f32.mrf.mxu0 }
  0xe3   :  { %v394_v21 = vpop.f32.mrf.mxu1 }
  0xe4   :  { %v266_v23 = vadd.f32 %v394_v21, %v374_v20  ;;  %v151_v24 = vpop.f32.mrf.mxu0 }
  0xe5   :  { %v257_v25 = vpop.f32.mrf.mxu1 }
  0xe6   :  { %v280_v26 = vadd.f32 %v324_v22, %v266_v23  ;;  %v258_v27 = vadd.f32 %v257_v25, %v151_v24  ;;  %v375_v28 = vpop.f32.mrf.mxu0 }
  0xe7   :  { %v395_v29 = vpop.f32.mrf.mxu1 }
  0xe8   :  { %v283_v30 = vmax.f32 %v280_v26, 0.0  ;;  %v154_v31 = vpop.f32.mrf.mxu0  ;;  %v278_v34 = vadd.f32 %v324_v22, %v258_v27 }
  0xe9   :  { %v260_v32 = vpop.f32.mrf.mxu1 }
  0xea   :  { %v330_v33 = vpack.c.bf16 %v283_v30, %v283_v30  ;;  %v261_v35 = vadd.f32 %v260_v32, %v154_v31  ;;  %v281_v37 = vmax.f32 %v278_v34, 0.0 }
  0xec   :  { %299 = vst [vmem:[%s520_s5 + $0x8] sm:$0xf] %v330_v33  ;;  %v279_v36 = vadd.f32 %v324_v22, %v261_v35 }
  0xee   :  { %v282_v38 = vmax.f32 %v279_v36, 0.0 }
  0xf0   :  { %v334_v39 = vpack.c.bf16 %v282_v38, %v281_v37 }
  0xf2   :  { %335 = vst [vmem:[%s520_s5] sm:$0xff] %v334_v39  }

// kernel: forward.17
= control target key start
LH: loop header
LB: loop body
LE: loop exit
PB: predicated region body
PF: predicated region fallthrough
CT: control target
= control target key end

     0   :  { %vm93_vm0 = vcmask 523264   ;;  %s570_s3 = inlined_call_operand.vmem [shape: bf16[64,128], index: 3, kind: input, shape index: {}]   ;;  %s571_s2 = inlined_call_operand.vmem [shape: bf16[64,128], index: 2, kind: input, shape index: {}]   ;;  %s572_s1 = inlined_call_operand.vmem [shape: bf16[56,64], index: 1, kind: input, shape index: {}]   ;;  %s573_s0 = inlined_call_operand.vmem [shape: bf16[56,64], index: 0, kind: input, shape index: {}]   ;;  %s574_s4 = inlined_call_operand.vmem [shape: f32[1,128], index: 4, kind: input, shape index: {}]   ;;  %s575_s5 = inlined_call_operand.vmem [shape: bf16[56,128], index: 5, kind: output, shape index: {}]  }
   0x1   :  { %v453_v0 = vld [vmem:[%s570_s3 + $0x18] sm:$0xff]   ;;  %v455_v2 = vld [vmem:[%s570_s3 + $0x10] sm:$0xff]   ;;  %v457_v4 = vld [vmem:[%s570_s3 + $0x8] sm:$0xff]  }
   0x2   :  { %v454_v1 = vld [vmem:[%s571_s2 + $0x18] sm:$0xff]   ;;  %421 = vmatprep.subr.bf16.mxu0 %v453_v0  ;;  %v456_v3 = vld [vmem:[%s571_s2 + $0x10] sm:$0xff]   ;;  %v458_v5 = vld [vmem:[%s571_s2 + $0x8] sm:$0xff]  }
   0x3   :  { %437 = vmatprep.subr.bf16.mxu1 %v454_v1  ;;  %422 = vmatpush3.bf16.msra.mxu0 %v453_v0  ;;  %v459_v6 = vld [vmem:[%s570_s3] sm:$0xff]   ;;  %v463_v10 = vld [vmem:[%s572_s1 + $0x8] sm:$0xff]   ;;  %v465_v12 = vld [vmem:[%s572_s1 + $0x10] sm:$0xff]  }
   0x4   :  { %438 = vmatpush3.bf16.msra.mxu1 %v454_v1  ;;  %423 = vmatprep.subr.bf16.mxu0 %v455_v2  ;;  %v460_v7 = vld [vmem:[%s571_s2] sm:$0xff]   ;;  %v464_v11 = vld [vmem:[%s573_s0 + $0x8] sm:$0xff]   ;;  %v466_v13 = vld [vmem:[%s573_s0 + $0x10] sm:$0xff]  }
   0x5   :  { %439 = vmatprep.subr.bf16.mxu1 %v456_v3  ;;  %v461_v8 = vld [vmem:[%s572_s1] sm:$0xff]   ;;  %v467_v14 = vld [vmem:[%s572_s1 + $0x18] ss:$0 sps:$4 sm:$0xff]  }
   0x6   :  { %v462_v9 = vld [vmem:[%s573_s0] sm:$0xff]   ;;  %429 = vmatprep.mubr.msk.bf16.mxu0 %vm93_vm0, %v461_v8  ;;  %v468_v15 = vld [vmem:[%s573_s0 + $0x18] ss:$0 sps:$4 sm:$0xff]  }
   0x7   :  { %424 = vmatpush3.bf16.msra.mxu0 %v455_v2  ;;  %445 = vmatprep.mubr.msk.bf16.mxu1 %vm93_vm0, %v462_v9  ;;  %v373_v20 = vld [vmem:[%s574_s4] ss:$0 sm:$0xff] }
   0x8   :  { %440 = vmatpush3.bf16.msra.mxu1 %v456_v3  ;;  %425 = vmatprep.subr.bf16.mxu0 %v457_v4 }
   0x9   :  { %441 = vmatprep.subr.bf16.mxu1 %v458_v5 }
   0xb   :  { %426 = vmatpush3.bf16.msra.mxu0 %v457_v4 }
   0xc   :  { %442 = vmatpush3.bf16.msra.mxu1 %v458_v5  ;;  %427 = vmatprep.subr.bf16.mxu0 %v459_v6 }
   0xd   :  { %443 = vmatprep.subr.bf16.mxu1 %v460_v7 }
   0xf   :  { %428 = vmatpush3.bf16.msra.mxu0 %v459_v6 }
  0x10   :  { %444 = vmatpush3.bf16.msra.mxu1 %v460_v7 }
  0x12   :  { %430 = vmatmul.mubr.msk.bf16.vlgmr.msra.gmra.mxu0 %vm93_vm0, %v463_v10 }
  0x13   :  { %446 = vmatmul.mubr.msk.bf16.vlgmr.msra.gmra.mxu1 %vm93_vm0, %v464_v11  ;;  %433 = vmatprep.mubr.msk.bf16.mxu0 %vm93_vm0, %v465_v12 }
  0x14   :  { %449 = vmatprep.mubr.msk.bf16.mxu1 %vm93_vm0, %v466_v13 }
  0x1a   :  { %434 = vmatmul.mubr.msk.bf16.gmra.mxu0 %vm93_vm0, %v467_v14 }
  0x1b   :  { %450 = vmatmul.mubr.msk.bf16.gmra.mxu1 %vm93_vm0, %v468_v15 }
  0xd2   :  { %v431_v16 = vpop.f32.mrf.mxu0 }
  0xd3   :  { %v447_v17 = vpop.f32.mrf.mxu1 }
  0xd4   :  { %v267_v18 = vadd.f32 %v447_v17, %v431_v16  ;;  %v140_v19 = vpop.f32.mrf.mxu0 }
  0xd5   :  { %v258_v21 = vpop.f32.mrf.mxu1 }
  0xd6   :  { %v259_v22 = vadd.f32 %v258_v21, %v140_v19  ;;  %v432_v23 = vpop.f32.mrf.mxu0  ;;  %v297_v25 = vadd.f32 %v373_v20, %v267_v18 }
  0xd7   :  { %v448_v24 = vpop.f32.mrf.mxu1 }
  0xd8   :  { %v270_v26 = vadd.f32 %v448_v24, %v432_v23  ;;  %v143_v27 = vpop.f32.mrf.mxu0  ;;  %v295_v28 = vadd.f32 %v373_v20, %v259_v22  ;;  %v304_v34 = vmax.f32 %v297_v25, 0.0 }
  0xd9   :  { %v261_v29 = vpop.f32.mrf.mxu1 }
  0xda   :  { %v298_v30 = vadd.f32 %v373_v20, %v270_v26  ;;  %v262_v31 = vadd.f32 %v261_v29, %v143_v27  ;;  %v435_v32 = vpop.f32.mrf.mxu0  ;;  %v302_v39 = vmax.f32 %v295_v28, 0.0 }
  0xdb   :  { %v451_v33 = vpop.f32.mrf.mxu1 }
  0xdc   :  { %v305_v35 = vmax.f32 %v298_v30, 0.0  ;;  %v296_v36 = vadd.f32 %v373_v20, %v262_v31  ;;  %v283_v37 = vadd.f32 %v451_v33, %v435_v32  ;;  %v156_v38 = vpop.f32.mrf.mxu0 }
  0xdd   :  { %v274_v40 = vpop.f32.mrf.mxu1 }
  0xde   :  { %v396_v41 = vpack.c.bf16 %v305_v35, %v304_v34  ;;  %v303_v42 = vmax.f32 %v296_v36, 0.0  ;;  %v301_v43 = vadd.f32 %v373_v20, %v283_v37  ;;  %v275_v44 = vadd.f32 %v274_v40, %v156_v38  ;;  %v436_v45 = vpop.f32.mrf.mxu0 }
  0xdf   :  { %v452_v46 = vpop.f32.mrf.mxu1 }
  0xe0   :  { %403 = vst [vmem:[%s575_s5 + $0x8] sm:$0xff] %v396_v41   ;;  %v391_v47 = vpack.c.bf16 %v303_v42, %v302_v39  ;;  %v308_v48 = vmax.f32 %v301_v43, 0.0  ;;  %v159_v49 = vpop.f32.mrf.mxu0  ;;  %v299_v52 = vadd.f32 %v373_v20, %v275_v44 }
  0xe1   :  { %v277_v50 = vpop.f32.mrf.mxu1 }
  0xe2   :  { %392 = vst [vmem:[%s575_s5] sm:$0xff] %v391_v47   ;;  %v387_v51 = vpack.c.bf16 %v308_v48, %v308_v48  ;;  %v278_v53 = vadd.f32 %v277_v50, %v159_v49  ;;  %v306_v55 = vmax.f32 %v299_v52, 0.0 }
  0xe4   :  { %344 = vst [vmem:[%s575_s5 + $0x18] sm:$0xf] %v387_v51  ;;  %v300_v54 = vadd.f32 %v373_v20, %v278_v53 }
  0xe6   :  { %v307_v56 = vmax.f32 %v300_v54, 0.0 }
  0xe8   :  { %v401_v57 = vpack.c.bf16 %v307_v56, %v306_v55 }
  0xea   :  { %404 = vst [vmem:[%s575_s5 + $0x10] sm:$0xff] %v401_v57  }

// kernel: forward.18
= control target key start
LH: loop header
LB: loop body
LE: loop exit
PB: predicated region body
PF: predicated region fallthrough
CT: control target
= control target key end

     0   :  { %v967_v0 = vmov 0.0   ;;  %vm968_vm0 = vmmov 0   ;;  %vm136_vm1 = vcmask 261120   ;;  %s1206_s3 = inlined_call_operand.vmem [shape: bf16[32,128], index: 3, kind: input, shape index: {}]   ;;  %s1207_s2 = inlined_call_operand.vmem [shape: bf16[32,128], index: 2, kind: input, shape index: {}]   ;;  %s1208_s1 = inlined_call_operand.vmem [shape: bf16[168,32], index: 1, kind: input, shape index: {}]   ;;  %s1209_s0 = inlined_call_operand.vmem [shape: bf16[168,32], index: 0, kind: input, shape index: {}]   ;;  %s1210_s4 = inlined_call_operand.vmem [shape: f32[1,128], index: 4, kind: input, shape index: {}]   ;;  %s1211_s5 = inlined_call_operand.vmem [shape: bf16[168,128], index: 5, kind: output, shape index: {}]  }
   0x1   :  { %843 = vmatprep.subr.bf16.mxu0 %v967_v0  ;;  %891 = vmatprep.subr.bf16.mxu1 %v967_v0  ;;  %v941_v1 = vld [vmem:[%s1206_s3 + $0x8] sm:$0xff]   ;;  %v943_v3 = vld [vmem:[%s1206_s3] sm:$0xff]   ;;  %v949_v9 = vld [vmem:[%s1208_s1 + $0x10] sm:$0xff]  }
   0x2   :  { %v942_v2 = vld [vmem:[%s1207_s2 + $0x8] sm:$0xff]   ;;  %847 = vmatprep.mubr.msk.bf16.mxu0 %vm968_vm0, %v967_v0  ;;  %895 = vmatprep.mubr.msk.bf16.mxu1 %vm968_vm0, %v967_v0  ;;  %v944_v4 = vld [vmem:[%s1207_s2] sm:$0xff]   ;;  %v950_v10 = vld [vmem:[%s1209_s0 + $0x10] sm:$0xff]  }
   0x3   :  { %844 = vmatpush3.bf16.msra.mxu0 %v941_v1  ;;  %892 = vmatpush3.bf16.msra.mxu1 %v942_v2  ;;  %v945_v5 = vld [vmem:[%s1208_s1] sm:$0xff]   ;;  %v947_v7 = vld [vmem:[%s1208_s1 + $0x8] sm:$0xff]   ;;  %v951_v11 = vld [vmem:[%s1208_s1 + $0x18] sm:$0xff]  }
   0x4   :  { %845 = vmatprep.subr.bf16.mxu0 %v967_v0  ;;  %893 = vmatprep.subr.bf16.mxu1 %v967_v0  ;;  %v946_v6 = vld [vmem:[%s1209_s0] sm:$0xff]   ;;  %v948_v8 = vld [vmem:[%s1209_s0 + $0x8] sm:$0xff]   ;;  %v952_v12 = vld [vmem:[%s1209_s0 + $0x18] sm:$0xff]  }
   0x5   :  { %v953_v13 = vld [vmem:[%s1208_s1 + $0x20] sm:$0xff]   ;;  %v955_v15 = vld [vmem:[%s1208_s1 + $0x28] sm:$0xff]   ;;  %v957_v17 = vld [vmem:[%s1208_s1 + $0x30] sm:$0xff]  }
   0x6   :  { %v954_v14 = vld [vmem:[%s1209_s0 + $0x20] sm:$0xff]   ;;  %v956_v16 = vld [vmem:[%s1209_s0 + $0x28] sm:$0xff]   ;;  %v958_v18 = vld [vmem:[%s1209_s0 + $0x30] sm:$0xff]  }
   0x7   :  { %846 = vmatpush3.bf16.msra.mxu0 %v943_v3  ;;  %894 = vmatpush3.bf16.msra.mxu1 %v944_v4  ;;  %v959_v19 = vld [vmem:[%s1208_s1 + $0x38] sm:$0xff]   ;;  %v961_v21 = vld [vmem:[%s1208_s1 + $0x40] sm:$0xff]   ;;  %v963_v23 = vld [vmem:[%s1208_s1 + $0x48] sm:$0xff]  }
   0x8   :  { %v960_v20 = vld [vmem:[%s1209_s0 + $0x38] sm:$0xff]   ;;  %v962_v22 = vld [vmem:[%s1209_s0 + $0x40] sm:$0xff]   ;;  %v964_v24 = vld [vmem:[%s1209_s0 + $0x48] sm:$0xff]  }
   0x9   :  { %v965_v25 = vld [vmem:[%s1208_s1 + $0x50] ss:$0 sps:$4 sm:$0xff]   ;;  %v1150_v31 = vld [vmem:[%s1210_s4] ss:$0 sm:$0xff] }
   0xa   :  { %848 = vmatmul.mubr.msk.bf16.vlgmr.msra.gmra.mxu0 %vm136_vm1, %v945_v5  ;;  %896 = vmatmul.mubr.msk.bf16.vlgmr.msra.gmra.mxu1 %vm136_vm1, %v946_v6  ;;  %v966_v26 = vld [vmem:[%s1209_s0 + $0x50] ss:$0 sps:$4 sm:$0xff]  }
   0xb   :  { %851 = vmatprep.mubr.msk.bf16.mxu0 %vm968_vm0, %v967_v0  ;;  %899 = vmatprep.mubr.msk.bf16.mxu1 %vm968_vm0, %v967_v0 }
  0x12   :  { %852 = vmatmul.mubr.msk.bf16.gmra.mxu0 %vm136_vm1, %v947_v7  ;;  %900 = vmatmul.mubr.msk.bf16.gmra.mxu1 %vm136_vm1, %v948_v8 }
  0x13   :  { %855 = vmatprep.mubr.msk.bf16.mxu0 %vm968_vm0, %v967_v0  ;;  %903 = vmatprep.mubr.msk.bf16.mxu1 %vm968_vm0, %v967_v0 }
  0x1a   :  { %856 = vmatmul.mubr.msk.bf16.gmra.mxu0 %vm136_vm1, %v949_v9  ;;  %904 = vmatmul.mubr.msk.bf16.gmra.mxu1 %vm136_vm1, %v950_v10 }
  0x1b   :  { %859 = vmatprep.mubr.msk.bf16.mxu0 %vm968_vm0, %v967_v0  ;;  %907 = vmatprep.mubr.msk.bf16.mxu1 %vm968_vm0, %v967_v0 }
  0x22   :  { %860 = vmatmul.mubr.msk.bf16.gmra.mxu0 %vm136_vm1, %v951_v11  ;;  %908 = vmatmul.mubr.msk.bf16.gmra.mxu1 %vm136_vm1, %v952_v12 }
  0x23   :  { %863 = vmatprep.mubr.msk.bf16.mxu0 %vm968_vm0, %v967_v0  ;;  %911 = vmatprep.mubr.msk.bf16.mxu1 %vm968_vm0, %v967_v0 }
  0x2a   :  { %864 = vmatmul.mubr.msk.bf16.gmra.mxu0 %vm136_vm1, %v953_v13  ;;  %912 = vmatmul.mubr.msk.bf16.gmra.mxu1 %vm136_vm1, %v954_v14 }
  0x2b   :  { %867 = vmatprep.mubr.msk.bf16.mxu0 %vm968_vm0, %v967_v0  ;;  %915 = vmatprep.mubr.msk.bf16.mxu1 %vm968_vm0, %v967_v0 }
  0x32   :  { %868 = vmatmul.mubr.msk.bf16.gmra.mxu0 %vm136_vm1, %v955_v15  ;;  %916 = vmatmul.mubr.msk.bf16.gmra.mxu1 %vm136_vm1, %v956_v16 }
  0x33   :  { %871 = vmatprep.mubr.msk.bf16.mxu0 %vm968_vm0, %v967_v0  ;;  %919 = vmatprep.mubr.msk.bf16.mxu1 %vm968_vm0, %v967_v0 }
  0x3a   :  { %872 = vmatmul.mubr.msk.bf16.gmra.mxu0 %vm136_vm1, %v957_v17  ;;  %920 = vmatmul.mubr.msk.bf16.gmra.mxu1 %vm136_vm1, %v958_v18 }
  0x3b   :  { %875 = vmatprep.mubr.msk.bf16.mxu0 %vm968_vm0, %v967_v0  ;;  %923 = vmatprep.mubr.msk.bf16.mxu1 %vm968_vm0, %v967_v0 }
  0x42   :  { %876 = vmatmul.mubr.msk.bf16.gmra.mxu0 %vm136_vm1, %v959_v19  ;;  %924 = vmatmul.mubr.msk.bf16.gmra.mxu1 %vm136_vm1, %v960_v20 }
  0x43   :  { %879 = vmatprep.mubr.msk.bf16.mxu0 %vm968_vm0, %v967_v0  ;;  %927 = vmatprep.mubr.msk.bf16.mxu1 %vm968_vm0, %v967_v0 }
  0x4a   :  { %880 = vmatmul.mubr.msk.bf16.gmra.mxu0 %vm136_vm1, %v961_v21  ;;  %928 = vmatmul.mubr.msk.bf16.gmra.mxu1 %vm136_vm1, %v962_v22 }
  0x4b   :  { %883 = vmatprep.mubr.msk.bf16.mxu0 %vm968_vm0, %v967_v0  ;;  %931 = vmatprep.mubr.msk.bf16.mxu1 %vm968_vm0, %v967_v0 }
  0x52   :  { %884 = vmatmul.mubr.msk.bf16.gmra.mxu0 %vm136_vm1, %v963_v23  ;;  %932 = vmatmul.mubr.msk.bf16.gmra.mxu1 %vm136_vm1, %v964_v24 }
  0x53   :  { %887 = vmatprep.mubr.msk.bf16.mxu0 %vm968_vm0, %v967_v0  ;;  %935 = vmatprep.mubr.msk.bf16.mxu1 %vm968_vm0, %v967_v0 }
  0x5a   :  { %888 = vmatmul.mubr.msk.bf16.gmra.mxu0 %vm136_vm1, %v965_v25  ;;  %936 = vmatmul.mubr.msk.bf16.gmra.mxu1 %vm136_vm1, %v966_v26 }
  0xca   :  { %v204_v27 = vpop.f32.mrf.mxu0  ;;  %v422_v28 = vpop.f32.mrf.mxu1 }
  0xcb   :  { %v423_v29 = vadd.f32 %v422_v28, %v204_v27 }
  0xcc   :  { %v849_v30 = vpop.f32.mrf.mxu0  ;;  %v897_v32 = vpop.f32.mrf.mxu1 }
  0xcd   :  { %v515_v35 = vadd.f32 %v1150_v31, %v423_v29 }
  0xce   :  { %v207_v33 = vpop.f32.mrf.mxu0  ;;  %v425_v34 = vpop.f32.mrf.mxu1 }
  0xcf   :  { %v426_v36 = vadd.f32 %v425_v34, %v207_v33  ;;  %v536_v42 = vmax.f32 %v515_v35, 0.0 }
  0xd0   :  { %v850_v37 = vpop.f32.mrf.mxu0  ;;  %v898_v38 = vpop.f32.mrf.mxu1 }
  0xd1   :  { %v516_v39 = vadd.f32 %v1150_v31, %v426_v36 }
  0xd2   :  { %v212_v40 = vpop.f32.mrf.mxu0  ;;  %v430_v41 = vpop.f32.mrf.mxu1 }
  0xd3   :  { %v537_v43 = vmax.f32 %v516_v39, 0.0  ;;  %v431_v44 = vadd.f32 %v430_v41, %v212_v40 }
  0xd4   :  { %v853_v45 = vpop.f32.mrf.mxu0  ;;  %v901_v46 = vpop.f32.mrf.mxu1 }
  0xd5   :  { %v761_v47 = vpack.c.bf16 %v537_v43, %v536_v42  ;;  %v517_v50 = vadd.f32 %v1150_v31, %v431_v44 }
  0xd6   :  { %v215_v48 = vpop.f32.mrf.mxu0  ;;  %v433_v49 = vpop.f32.mrf.mxu1 }
  0xd7   :  { %762 = vst [vmem:[%s1211_s5] sm:$0xff] %v761_v47   ;;  %v434_v51 = vadd.f32 %v433_v49, %v215_v48  ;;  %v538_v57 = vmax.f32 %v517_v50, 0.0 }
  0xd8   :  { %v854_v52 = vpop.f32.mrf.mxu0  ;;  %v902_v53 = vpop.f32.mrf.mxu1 }
  0xd9   :  { %v518_v54 = vadd.f32 %v1150_v31, %v434_v51 }
  0xda   :  { %v220_v55 = vpop.f32.mrf.mxu0  ;;  %v438_v56 = vpop.f32.mrf.mxu1 }
  0xdb   :  { %v539_v58 = vmax.f32 %v518_v54, 0.0  ;;  %v439_v59 = vadd.f32 %v438_v56, %v220_v55 }
  0xdc   :  { %v857_v60 = vpop.f32.mrf.mxu0  ;;  %v905_v61 = vpop.f32.mrf.mxu1 }
  0xdd   :  { %v766_v62 = vpack.c.bf16 %v539_v58, %v538_v57  ;;  %v519_v1 = vadd.f32 %v1150_v31, %v439_v59 }
  0xde   :  { %v223_v63 = vpop.f32.mrf.mxu0  ;;  %v441_v0 = vpop.f32.mrf.mxu1 }
  0xdf   :  { %808 = vst [vmem:[%s1211_s5 + $0x8] sm:$0xff] %v766_v62   ;;  %v442_v2 = vadd.f32 %v441_v0, %v223_v63  ;;  %v540_v8 = vmax.f32 %v519_v1, 0.0 }
  0xe0   :  { %v858_v3 = vpop.f32.mrf.mxu0  ;;  %v906_v4 = vpop.f32.mrf.mxu1 }
  0xe1   :  { %v520_v5 = vadd.f32 %v1150_v31, %v442_v2 }
  0xe2   :  { %v228_v6 = vpop.f32.mrf.mxu0  ;;  %v446_v7 = vpop.f32.mrf.mxu1 }
  0xe3   :  { %v541_v9 = vmax.f32 %v520_v5, 0.0  ;;  %v447_v10 = vadd.f32 %v446_v7, %v228_v6 }
  0xe4   :  { %v861_v11 = vpop.f32.mrf.mxu0  ;;  %v909_v12 = vpop.f32.mrf.mxu1 }
  0xe5   :  { %v771_v13 = vpack.c.bf16 %v541_v9, %v540_v8  ;;  %v521_v16 = vadd.f32 %v1150_v31, %v447_v10 }
  0xe6   :  { %v231_v14 = vpop.f32.mrf.mxu0  ;;  %v449_v15 = vpop.f32.mrf.mxu1 }
  0xe7   :  { %809 = vst [vmem:[%s1211_s5 + $0x10] sm:$0xff] %v771_v13   ;;  %v450_v17 = vadd.f32 %v449_v15, %v231_v14  ;;  %v542_v23 = vmax.f32 %v521_v16, 0.0 }
  0xe8   :  { %v862_v18 = vpop.f32.mrf.mxu0  ;;  %v910_v19 = vpop.f32.mrf.mxu1 }
  0xe9   :  { %v522_v20 = vadd.f32 %v1150_v31, %v450_v17 }
  0xea   :  { %v236_v21 = vpop.f32.mrf.mxu0  ;;  %v454_v22 = vpop.f32.mrf.mxu1 }
  0xeb   :  { %v543_v24 = vmax.f32 %v522_v20, 0.0  ;;  %v455_v25 = vadd.f32 %v454_v22, %v236_v21 }
  0xec   :  { %v865_v26 = vpop.f32.mrf.mxu0  ;;  %v913_v27 = vpop.f32.mrf.mxu1 }
  0xed   :  { %v776_v28 = vpack.c.bf16 %v543_v24, %v542_v23  ;;  %v523_v32 = vadd.f32 %v1150_v31, %v455_v25 }
  0xee   :  { %v239_v29 = vpop.f32.mrf.mxu0  ;;  %v457_v30 = vpop.f32.mrf.mxu1 }
  0xef   :  { %810 = vst [vmem:[%s1211_s5 + $0x18] sm:$0xff] %v776_v28   ;;  %v458_v33 = vadd.f32 %v457_v30, %v239_v29  ;;  %v544_v39 = vmax.f32 %v523_v32, 0.0 }
  0xf0   :  { %v866_v34 = vpop.f32.mrf.mxu0  ;;  %v914_v35 = vpop.f32.mrf.mxu1 }
  0xf1   :  { %v524_v36 = vadd.f32 %v1150_v31, %v458_v33 }
  0xf2   :  { %v244_v37 = vpop.f32.mrf.mxu0  ;;  %v462_v38 = vpop.f32.mrf.mxu1 }
  0xf3   :  { %v545_v40 = vmax.f32 %v524_v36, 0.0  ;;  %v463_v41 = vadd.f32 %v462_v38, %v244_v37 }
  0xf4   :  { %v869_v42 = vpop.f32.mrf.mxu0  ;;  %v917_v43 = vpop.f32.mrf.mxu1 }
  0xf5   :  { %v781_v44 = vpack.c.bf16 %v545_v40, %v544_v39  ;;  %v525_v47 = vadd.f32 %v1150_v31, %v463_v41 }
  0xf6   :  { %v247_v45 = vpop.f32.mrf.mxu0  ;;  %v465_v46 = vpop.f32.mrf.mxu1 }
  0xf7   :  { %811 = vst [vmem:[%s1211_s5 + $0x20] sm:$0xff] %v781_v44   ;;  %v466_v48 = vadd.f32 %v465_v46, %v247_v45  ;;  %v546_v54 = vmax.f32 %v525_v47, 0.0 }
  0xf8   :  { %v870_v49 = vpop.f32.mrf.mxu0  ;;  %v918_v50 = vpop.f32.mrf.mxu1 }
  0xf9   :  { %v526_v51 = vadd.f32 %v1150_v31, %v466_v48 }
  0xfa   :  { %v252_v52 = vpop.f32.mrf.mxu0  ;;  %v470_v53 = vpop.f32.mrf.mxu1 }
  0xfb   :  { %v547_v55 = vmax.f32 %v526_v51, 0.0  ;;  %v471_v56 = vadd.f32 %v470_v53, %v252_v52 }
  0xfc   :  { %v873_v57 = vpop.f32.mrf.mxu0  ;;  %v921_v58 = vpop.f32.mrf.mxu1 }
  0xfd   :  { %v786_v59 = vpack.c.bf16 %v547_v55, %v546_v54  ;;  %v527_v62 = vadd.f32 %v1150_v31, %v471_v56 }
  0xfe   :  { %v255_v60 = vpop.f32.mrf.mxu0  ;;  %v473_v61 = vpop.f32.mrf.mxu1 }
  0xff   :  { %812 = vst [vmem:[%s1211_s5 + $0x28] sm:$0xff] %v786_v59   ;;  %v474_v63 = vadd.f32 %v473_v61, %v255_v60  ;;  %v548_v5 = vmax.f32 %v527_v62, 0.0 }
 0x100   :  { %v874_v0 = vpop.f32.mrf.mxu0  ;;  %v922_v1 = vpop.f32.mrf.mxu1 }
 0x101   :  { %v528_v2 = vadd.f32 %v1150_v31, %v474_v63 }
 0x102   :  { %v260_v3 = vpop.f32.mrf.mxu0  ;;  %v478_v4 = vpop.f32.mrf.mxu1 }
 0x103   :  { %v549_v6 = vmax.f32 %v528_v2, 0.0  ;;  %v479_v7 = vadd.f32 %v478_v4, %v260_v3 }
 0x104   :  { %v877_v8 = vpop.f32.mrf.mxu0  ;;  %v925_v9 = vpop.f32.mrf.mxu1 }
 0x105   :  { %v791_v10 = vpack.c.bf16 %v549_v6, %v548_v5  ;;  %v529_v13 = vadd.f32 %v1150_v31, %v479_v7 }
 0x106   :  { %v263_v11 = vpop.f32.mrf.mxu0  ;;  %v481_v12 = vpop.f32.mrf.mxu1 }
 0x107   :  { %813 = vst [vmem:[%s1211_s5 + $0x30] sm:$0xff] %v791_v10   ;;  %v482_v14 = vadd.f32 %v481_v12, %v263_v11  ;;  %v550_v20 = vmax.f32 %v529_v13, 0.0 }
 0x108   :  { %v878_v15 = vpop.f32.mrf.mxu0  ;;  %v926_v16 = vpop.f32.mrf.mxu1 }
 0x109   :  { %v530_v17 = vadd.f32 %v1150_v31, %v482_v14 }
 0x10a   :  { %v268_v18 = vpop.f32.mrf.mxu0  ;;  %v486_v19 = vpop.f32.mrf.mxu1 }
 0x10b   :  { %v551_v21 = vmax.f32 %v530_v17, 0.0  ;;  %v487_v22 = vadd.f32 %v486_v19, %v268_v18 }
 0x10c   :  { %v881_v23 = vpop.f32.mrf.mxu0  ;;  %v929_v24 = vpop.f32.mrf.mxu1 }
 0x10d   :  { %v796_v25 = vpack.c.bf16 %v551_v21, %v550_v20  ;;  %v531_v28 = vadd.f32 %v1150_v31, %v487_v22 }
 0x10e   :  { %v271_v26 = vpop.f32.mrf.mxu0  ;;  %v489_v27 = vpop.f32.mrf.mxu1 }
 0x10f   :  { %814 = vst [vmem:[%s1211_s5 + $0x38] sm:$0xff] %v796_v25   ;;  %v490_v29 = vadd.f32 %v489_v27, %v271_v26  ;;  %v552_v36 = vmax.f32 %v531_v28, 0.0 }
 0x110   :  { %v882_v30 = vpop.f32.mrf.mxu0  ;;  %v930_v32 = vpop.f32.mrf.mxu1 }
 0x111   :  { %v532_v33 = vadd.f32 %v1150_v31, %v490_v29 }
 0x112   :  { %v276_v34 = vpop.f32.mrf.mxu0  ;;  %v494_v35 = vpop.f32.mrf.mxu1 }
 0x113   :  { %v553_v37 = vmax.f32 %v532_v33, 0.0  ;;  %v495_v38 = vadd.f32 %v494_v35, %v276_v34 }
 0x114   :  { %v885_v39 = vpop.f32.mrf.mxu0  ;;  %v933_v40 = vpop.f32.mrf.mxu1 }
 0x115   :  { %v801_v41 = vpack.c.bf16 %v553_v37, %v552_v36  ;;  %v533_v44 = vadd.f32 %v1150_v31, %v495_v38 }
 0x116   :  { %v279_v42 = vpop.f32.mrf.mxu0  ;;  %v497_v43 = vpop.f32.mrf.mxu1 }
 0x117   :  { %815 = vst [vmem:[%s1211_s5 + $0x40] sm:$0xff] %v801_v41   ;;  %v498_v45 = vadd.f32 %v497_v43, %v279_v42  ;;  %v554_v51 = vmax.f32 %v533_v44, 0.0 }
 0x118   :  { %v886_v46 = vpop.f32.mrf.mxu0  ;;  %v934_v47 = vpop.f32.mrf.mxu1 }
 0x119   :  { %v534_v48 = vadd.f32 %v1150_v31, %v498_v45 }
 0x11a   :  { %v284_v49 = vpop.f32.mrf.mxu0  ;;  %v502_v50 = vpop.f32.mrf.mxu1 }
 0x11b   :  { %v555_v52 = vmax.f32 %v534_v48, 0.0  ;;  %v503_v53 = vadd.f32 %v502_v50, %v284_v49 }
 0x11c   :  { %v889_v54 = vpop.f32.mrf.mxu0  ;;  %v937_v55 = vpop.f32.mrf.mxu1 }
 0x11d   :  { %v806_v56 = vpack.c.bf16 %v555_v52, %v554_v51  ;;  %v535_v57 = vadd.f32 %v1150_v31, %v503_v53 }
 0x11e   :  { %v287_v58 = vpop.f32.mrf.mxu0  ;;  %v505_v59 = vpop.f32.mrf.mxu1 }
 0x11f   :  { %816 = vst [vmem:[%s1211_s5 + $0x48] sm:$0xff] %v806_v56   ;;  %v556_v60 = vmax.f32 %v535_v57, 0.0 }
 0x120   :  { %v890_v61 = vpop.f32.mrf.mxu0  ;;  %v938_v62 = vpop.f32.mrf.mxu1 }
 0x121   :  { %v757_v63 = vpack.c.bf16 %v556_v60, %v556_v60 }
 0x123   :  { %662 = vst [vmem:[%s1211_s5 + $0x50] sm:$0xf] %v757_v63 }

// kernel: forward.19
= control target key start
LH: loop header
LB: loop body
LE: loop exit
PB: predicated region body
PF: predicated region fallthrough
CT: control target
= control target key end

     0   :  { %v2995_v0 = vmov 0.0   ;;  %vm2996_vm0 = vmmov 0   ;;  %vm360_vm1 = vcmask 130048   ;;  %s3786_s3 = inlined_call_operand.vmem [shape: bf16[16,128], index: 3, kind: input, shape index: {}]   ;;  %s3787_s2 = inlined_call_operand.vmem [shape: bf16[16,128], index: 2, kind: input, shape index: {}]   ;;  %s3788_s1 = inlined_call_operand.vmem [shape: bf16[584,16], index: 1, kind: input, shape index: {}]   ;;  %s3789_s0 = inlined_call_operand.vmem [shape: bf16[584,16], index: 0, kind: input, shape index: {}]   ;;  %s3790_s4 = inlined_call_operand.vmem [shape: f32[1,128], index: 4, kind: input, shape index: {}]   ;;  %s3791_s5 = inlined_call_operand.vmem [shape: f32[584,128], index: 5, kind: output, shape index: {}]  }
   0x1   :  { %2323 = vmatprep.subr.bf16.mxu0 %v2995_v0  ;;  %2473 = vmatprep.subr.bf16.mxu1 %v2995_v0  ;;  %v2625_v1 = vld [vmem:[%s3786_s3] sm:$0xff]   ;;  %v2629_v5 = vld [vmem:[%s3788_s1 + $0x8] sm:$0xff]   ;;  %v2631_v7 = vld [vmem:[%s3788_s1 + $0x10] sm:$0xff]  }
   0x2   :  { %v2626_v2 = vld [vmem:[%s3787_s2] sm:$0xff]   ;;  %2325 = vmatprep.mubr.msk.bf16.mxu0 %vm2996_vm0, %v2995_v0  ;;  %2475 = vmatprep.mubr.msk.bf16.mxu1 %vm2996_vm0, %v2995_v0  ;;  %v2630_v6 = vld [vmem:[%s3789_s0 + $0x8] sm:$0xff]   ;;  %v2632_v8 = vld [vmem:[%s3789_s0 + $0x10] sm:$0xff]  }
   0x3   :  { %2324 = vmatpush3.bf16.msra.mxu0 %v2625_v1  ;;  %v2627_v3 = vld [vmem:[%s3788_s1] sm:$0xff]   ;;  %2474 = vmatpush3.bf16.msra.mxu1 %v2626_v2  ;;  %v2633_v9 = vld [vmem:[%s3788_s1 + $0x18] sm:$0xff]   ;;  %v2637_v13 = vld [vmem:[%s3788_s1 + $0x28] sm:$0xff]  }
   0x4   :  { %v2628_v4 = vld [vmem:[%s3789_s0] sm:$0xff]   ;;  %v2634_v10 = vld [vmem:[%s3789_s0 + $0x18] sm:$0xff]   ;;  %v2638_v14 = vld [vmem:[%s3789_s0 + $0x28] sm:$0xff]  }
   0x5   :  { %v2635_v11 = vld [vmem:[%s3788_s1 + $0x20] sm:$0xff]   ;;  %v2639_v15 = vld [vmem:[%s3788_s1 + $0x30] sm:$0xff]   ;;  %v2641_v17 = vld [vmem:[%s3788_s1 + $0x38] sm:$0xff]  }
   0x6   :  { %2326 = vmatmul.mubr.msk.bf16.vlgmr.msra.gmra.mxu0 %vm360_vm1, %v2627_v3  ;;  %2476 = vmatmul.mubr.msk.bf16.vlgmr.msra.gmra.mxu1 %vm360_vm1, %v2628_v4  ;;  %v2636_v12 = vld [vmem:[%s3789_s0 + $0x20] sm:$0xff]   ;;  %v2640_v16 = vld [vmem:[%s3789_s0 + $0x30] sm:$0xff]   ;;  %v2642_v18 = vld [vmem:[%s3789_s0 + $0x38] sm:$0xff]  }
   0x7   :  { %2329 = vmatprep.mubr.msk.bf16.mxu0 %vm2996_vm0, %v2995_v0  ;;  %2479 = vmatprep.mubr.msk.bf16.mxu1 %vm2996_vm0, %v2995_v0  ;;  %v2643_v19 = vld [vmem:[%s3788_s1 + $0x40] sm:$0xff]   ;;  %v2645_v21 = vld [vmem:[%s3788_s1 + $0x48] sm:$0xff]   ;;  %v2647_v23 = vld [vmem:[%s3788_s1 + $0x50] sm:$0xff]  }
   0x8   :  { %v2644_v20 = vld [vmem:[%s3789_s0 + $0x40] sm:$0xff]   ;;  %v2646_v22 = vld [vmem:[%s3789_s0 + $0x48] sm:$0xff]   ;;  %v2648_v24 = vld [vmem:[%s3789_s0 + $0x50] sm:$0xff]  }
   0x9   :  { %v2649_v25 = vld [vmem:[%s3788_s1 + $0x58] sm:$0xff]   ;;  %v2651_v27 = vld [vmem:[%s3788_s1 + $0x60] sm:$0xff]   ;;  %v2653_v29 = vld [vmem:[%s3788_s1 + $0x68] sm:$0xff]  }
   0xa   :  { %v2650_v26 = vld [vmem:[%s3789_s0 + $0x58] sm:$0xff]   ;;  %v2652_v28 = vld [vmem:[%s3789_s0 + $0x60] sm:$0xff]   ;;  %v2654_v30 = vld [vmem:[%s3789_s0 + $0x68] sm:$0xff]  }
   0xb   :  { %v2655_v31 = vld [vmem:[%s3788_s1 + $0x70] sm:$0xff]   ;;  %v2657_v33 = vld [vmem:[%s3788_s1 + $0x78] sm:$0xff]   ;;  %v2659_v35 = vld [vmem:[%s3788_s1 + $0x80] sm:$0xff]  }
   0xc   :  { %v2656_v32 = vld [vmem:[%s3789_s0 + $0x70] sm:$0xff]   ;;  %v2658_v34 = vld [vmem:[%s3789_s0 + $0x78] sm:$0xff]   ;;  %v2660_v36 = vld [vmem:[%s3789_s0 + $0x80] sm:$0xff]  }
   0xd   :  { %v2661_v37 = vld [vmem:[%s3788_s1 + $0x88] sm:$0xff]   ;;  %v2663_v39 = vld [vmem:[%s3788_s1 + $0x90] sm:$0xff]   ;;  %v2665_v41 = vld [vmem:[%s3788_s1 + $0x98] sm:$0xff]  }
   0xe   :  { %2330 = vmatmul.mubr.msk.bf16.gmra.mxu0 %vm360_vm1, %v2629_v5  ;;  %2480 = vmatmul.mubr.msk.bf16.gmra.mxu1 %vm360_vm1, %v2630_v6  ;;  %v2662_v38 = vld [vmem:[%s3789_s0 + $0x88] sm:$0xff]   ;;  %v2664_v40 = vld [vmem:[%s3789_s0 + $0x90] sm:$0xff]   ;;  %v2666_v42 = vld [vmem:[%s3789_s0 + $0x98] sm:$0xff]  }
   0xf   :  { %2333 = vmatprep.mubr.msk.bf16.mxu0 %vm2996_vm0, %v2995_v0  ;;  %2483 = vmatprep.mubr.msk.bf16.mxu1 %vm2996_vm0, %v2995_v0  ;;  %v2667_v43 = vld [vmem:[%s3788_s1 + $0xa0] sm:$0xff]   ;;  %v2669_v45 = vld [vmem:[%s3788_s1 + $0xa8] sm:$0xff]   ;;  %v2671_v47 = vld [vmem:[%s3788_s1 + $0xb0] sm:$0xff]  }
  0x10   :  { %v2668_v44 = vld [vmem:[%s3789_s0 + $0xa0] sm:$0xff]   ;;  %v2670_v46 = vld [vmem:[%s3789_s0 + $0xa8] sm:$0xff]   ;;  %v2672_v48 = vld [vmem:[%s3789_s0 + $0xb0] sm:$0xff]  }
  0x11   :  { %v2673_v49 = vld [vmem:[%s3788_s1 + $0xb8] sm:$0xff]   ;;  %v2675_v51 = vld [vmem:[%s3788_s1 + $0xc0] sm:$0xff]   ;;  %v2677_v61 = vld [vmem:[%s3788_s1 + $0xc8] sm:$0xff]  }
  0x12   :  { %v2674_v50 = vld [vmem:[%s3789_s0 + $0xb8] sm:$0xff]   ;;  %v2676_v52 = vld [vmem:[%s3789_s0 + $0xc0] sm:$0xff]   ;;  %v2678_v63 = vld [vmem:[%s3789_s0 + $0xc8] sm:$0xff]  }
  0x13   :  { %v3337_v55 = vld [vmem:[%s3790_s4] ss:$0 sm:$0xff] }
  0x16   :  { %2334 = vmatmul.mubr.msk.bf16.gmra.mxu0 %vm360_vm1, %v2631_v7  ;;  %2484 = vmatmul.mubr.msk.bf16.gmra.mxu1 %vm360_vm1, %v2632_v8 }
  0x17   :  { %2337 = vmatprep.mubr.msk.bf16.mxu0 %vm2996_vm0, %v2995_v0  ;;  %2487 = vmatprep.mubr.msk.bf16.mxu1 %vm2996_vm0, %v2995_v0 }
  0x1e   :  { %2338 = vmatmul.mubr.msk.bf16.gmra.mxu0 %vm360_vm1, %v2633_v9  ;;  %2488 = vmatmul.mubr.msk.bf16.gmra.mxu1 %vm360_vm1, %v2634_v10 }
  0x1f   :  { %2341 = vmatprep.mubr.msk.bf16.mxu0 %vm2996_vm0, %v2995_v0  ;;  %2491 = vmatprep.mubr.msk.bf16.mxu1 %vm2996_vm0, %v2995_v0 }
  0x26   :  { %2342 = vmatmul.mubr.msk.bf16.gmra.mxu0 %vm360_vm1, %v2635_v11  ;;  %2492 = vmatmul.mubr.msk.bf16.gmra.mxu1 %vm360_vm1, %v2636_v12 }
  0x27   :  { %2345 = vmatprep.mubr.msk.bf16.mxu0 %vm2996_vm0, %v2995_v0  ;;  %2495 = vmatprep.mubr.msk.bf16.mxu1 %vm2996_vm0, %v2995_v0 }
  0x2e   :  { %2346 = vmatmul.mubr.msk.bf16.gmra.mxu0 %vm360_vm1, %v2637_v13  ;;  %2496 = vmatmul.mubr.msk.bf16.gmra.mxu1 %vm360_vm1, %v2638_v14 }
  0x2f   :  { %2349 = vmatprep.mubr.msk.bf16.mxu0 %vm2996_vm0, %v2995_v0  ;;  %2499 = vmatprep.mubr.msk.bf16.mxu1 %vm2996_vm0, %v2995_v0 }
  0x36   :  { %2350 = vmatmul.mubr.msk.bf16.gmra.mxu0 %vm360_vm1, %v2639_v15  ;;  %2500 = vmatmul.mubr.msk.bf16.gmra.mxu1 %vm360_vm1, %v2640_v16  ;;  %v2679_v16 = vld [vmem:[%s3788_s1 + $0xd0] sm:$0xff]  }
  0x37   :  { %2353 = vmatprep.mubr.msk.bf16.mxu0 %vm2996_vm0, %v2995_v0  ;;  %2503 = vmatprep.mubr.msk.bf16.mxu1 %vm2996_vm0, %v2995_v0 }
  0x3e   :  { %2354 = vmatmul.mubr.msk.bf16.gmra.mxu0 %vm360_vm1, %v2641_v17  ;;  %2504 = vmatmul.mubr.msk.bf16.gmra.mxu1 %vm360_vm1, %v2642_v18  ;;  %v2680_v18 = vld [vmem:[%s3789_s0 + $0xd0] sm:$0xff]  }
  0x3f   :  { %2357 = vmatprep.mubr.msk.bf16.mxu0 %vm2996_vm0, %v2995_v0  ;;  %2507 = vmatprep.mubr.msk.bf16.mxu1 %vm2996_vm0, %v2995_v0 }
  0x46   :  { %2358 = vmatmul.mubr.msk.bf16.gmra.mxu0 %vm360_vm1, %v2643_v19  ;;  %2508 = vmatmul.mubr.msk.bf16.gmra.mxu1 %vm360_vm1, %v2644_v20 }
  0x47   :  { %2361 = vmatprep.mubr.msk.bf16.mxu0 %vm2996_vm0, %v2995_v0  ;;  %2511 = vmatprep.mubr.msk.bf16.mxu1 %vm2996_vm0, %v2995_v0 }
  0x4e   :  { %2362 = vmatmul.mubr.msk.bf16.gmra.mxu0 %vm360_vm1, %v2645_v21  ;;  %2512 = vmatmul.mubr.msk.bf16.gmra.mxu1 %vm360_vm1, %v2646_v22 }
  0x4f   :  { %2365 = vmatprep.mubr.msk.bf16.mxu0 %vm2996_vm0, %v2995_v0  ;;  %2515 = vmatprep.mubr.msk.bf16.mxu1 %vm2996_vm0, %v2995_v0 }
  0x56   :  { %2366 = vmatmul.mubr.msk.bf16.gmra.mxu0 %vm360_vm1, %v2647_v23  ;;  %2516 = vmatmul.mubr.msk.bf16.gmra.mxu1 %vm360_vm1, %v2648_v24 }
  0x57   :  { %2369 = vmatprep.mubr.msk.bf16.mxu0 %vm2996_vm0, %v2995_v0  ;;  %2519 = vmatprep.mubr.msk.bf16.mxu1 %vm2996_vm0, %v2995_v0 }
  0x5e   :  { %2370 = vmatmul.mubr.msk.bf16.gmra.mxu0 %vm360_vm1, %v2649_v25  ;;  %2520 = vmatmul.mubr.msk.bf16.gmra.mxu1 %vm360_vm1, %v2650_v26 }
  0x5f   :  { %2373 = vmatprep.mubr.msk.bf16.mxu0 %vm2996_vm0, %v2995_v0  ;;  %2523 = vmatprep.mubr.msk.bf16.mxu1 %vm2996_vm0, %v2995_v0 }
  0x66   :  { %2374 = vmatmul.mubr.msk.bf16.gmra.mxu0 %vm360_vm1, %v2651_v27  ;;  %2524 = vmatmul.mubr.msk.bf16.gmra.mxu1 %vm360_vm1, %v2652_v28 }
  0x67   :  { %2377 = vmatprep.mubr.msk.bf16.mxu0 %vm2996_vm0, %v2995_v0  ;;  %2527 = vmatprep.mubr.msk.bf16.mxu1 %vm2996_vm0, %v2995_v0 }
  0x6e   :  { %2378 = vmatmul.mubr.msk.bf16.gmra.mxu0 %vm360_vm1, %v2653_v29  ;;  %2528 = vmatmul.mubr.msk.bf16.gmra.mxu1 %vm360_vm1, %v2654_v30 }
  0x6f   :  { %2381 = vmatprep.mubr.msk.bf16.mxu0 %vm2996_vm0, %v2995_v0  ;;  %2531 = vmatprep.mubr.msk.bf16.mxu1 %vm2996_vm0, %v2995_v0 }
  0x76   :  { %2382 = vmatmul.mubr.msk.bf16.gmra.mxu0 %vm360_vm1, %v2655_v31  ;;  %2532 = vmatmul.mubr.msk.bf16.gmra.mxu1 %vm360_vm1, %v2656_v32 }
  0x77   :  { %2385 = vmatprep.mubr.msk.bf16.mxu0 %vm2996_vm0, %v2995_v0  ;;  %2535 = vmatprep.mubr.msk.bf16.mxu1 %vm2996_vm0, %v2995_v0 }
  0x7e   :  { %2386 = vmatmul.mubr.msk.bf16.gmra.mxu0 %vm360_vm1, %v2657_v33  ;;  %2536 = vmatmul.mubr.msk.bf16.gmra.mxu1 %vm360_vm1, %v2658_v34  ;;  %v2681_v34 = vld [vmem:[%s3788_s1 + $0xd8] sm:$0xff]  }
  0x7f   :  { %2389 = vmatprep.mubr.msk.bf16.mxu0 %vm2996_vm0, %v2995_v0  ;;  %2539 = vmatprep.mubr.msk.bf16.mxu1 %vm2996_vm0, %v2995_v0 }
  0x86   :  { %2390 = vmatmul.mubr.msk.bf16.gmra.mxu0 %vm360_vm1, %v2659_v35  ;;  %2540 = vmatmul.mubr.msk.bf16.gmra.mxu1 %vm360_vm1, %v2660_v36  ;;  %v2682_v36 = vld [vmem:[%s3789_s0 + $0xd8] sm:$0xff]  }
  0x87   :  { %2393 = vmatprep.mubr.msk.bf16.mxu0 %vm2996_vm0, %v2995_v0  ;;  %2543 = vmatprep.mubr.msk.bf16.mxu1 %vm2996_vm0, %v2995_v0 }
  0x8e   :  { %2394 = vmatmul.mubr.msk.bf16.gmra.mxu0 %vm360_vm1, %v2661_v37  ;;  %2544 = vmatmul.mubr.msk.bf16.gmra.mxu1 %vm360_vm1, %v2662_v38 }
  0x8f   :  { %2397 = vmatprep.mubr.msk.bf16.mxu0 %vm2996_vm0, %v2995_v0  ;;  %2547 = vmatprep.mubr.msk.bf16.mxu1 %vm2996_vm0, %v2995_v0 }
  0x96   :  { %2398 = vmatmul.mubr.msk.bf16.gmra.mxu0 %vm360_vm1, %v2663_v39  ;;  %2548 = vmatmul.mubr.msk.bf16.gmra.mxu1 %vm360_vm1, %v2664_v40 }
  0x97   :  { %2401 = vmatprep.mubr.msk.bf16.mxu0 %vm2996_vm0, %v2995_v0  ;;  %2551 = vmatprep.mubr.msk.bf16.mxu1 %vm2996_vm0, %v2995_v0 }
  0x9e   :  { %2402 = vmatmul.mubr.msk.bf16.gmra.mxu0 %vm360_vm1, %v2665_v41  ;;  %2552 = vmatmul.mubr.msk.bf16.gmra.mxu1 %vm360_vm1, %v2666_v42 }
  0x9f   :  { %2405 = vmatprep.mubr.msk.bf16.mxu0 %vm2996_vm0, %v2995_v0  ;;  %2555 = vmatprep.mubr.msk.bf16.mxu1 %vm2996_vm0, %v2995_v0 }
  0xa6   :  { %2406 = vmatmul.mubr.msk.bf16.gmra.mxu0 %vm360_vm1, %v2667_v43  ;;  %2556 = vmatmul.mubr.msk.bf16.gmra.mxu1 %vm360_vm1, %v2668_v44 }
  0xa7   :  { %2409 = vmatprep.mubr.msk.bf16.mxu0 %vm2996_vm0, %v2995_v0  ;;  %2559 = vmatprep.mubr.msk.bf16.mxu1 %vm2996_vm0, %v2995_v0 }
  0xae   :  { %2410 = vmatmul.mubr.msk.bf16.gmra.mxu0 %vm360_vm1, %v2669_v45  ;;  %2560 = vmatmul.mubr.msk.bf16.gmra.mxu1 %vm360_vm1, %v2670_v46 }
  0xaf   :  { %2413 = vmatprep.mubr.msk.bf16.mxu0 %vm2996_vm0, %v2995_v0  ;;  %2563 = vmatprep.mubr.msk.bf16.mxu1 %vm2996_vm0, %v2995_v0 }
  0xb6   :  { %2414 = vmatmul.mubr.msk.bf16.gmra.mxu0 %vm360_vm1, %v2671_v47  ;;  %2564 = vmatmul.mubr.msk.bf16.gmra.mxu1 %vm360_vm1, %v2672_v48 }
  0xb7   :  { %2417 = vmatprep.mubr.msk.bf16.mxu0 %vm2996_vm0, %v2995_v0  ;;  %2567 = vmatprep.mubr.msk.bf16.mxu1 %vm2996_vm0, %v2995_v0 }
  0xbe   :  { %2418 = vmatmul.mubr.msk.bf16.gmra.mxu0 %vm360_vm1, %v2673_v49  ;;  %2568 = vmatmul.mubr.msk.bf16.gmra.mxu1 %vm360_vm1, %v2674_v50 }
  0xbf   :  { %2421 = vmatprep.mubr.msk.bf16.mxu0 %vm2996_vm0, %v2995_v0  ;;  %2571 = vmatprep.mubr.msk.bf16.mxu1 %vm2996_vm0, %v2995_v0 }
  0xc6   :  { %v506_v53 = vpop.f32.mrf.mxu0  ;;  %2422 = vmatmul.mubr.msk.bf16.gmra.mxu0 %vm360_vm1, %v2675_v51  ;;  %v1134_v54 = vpop.f32.mrf.mxu1  ;;  %2572 = vmatmul.mubr.msk.bf16.gmra.mxu1 %vm360_vm1, %v2676_v52 }
  0xc7   :  { %2425 = vmatprep.mubr.msk.bf16.mxu0 %vm2996_vm0, %v2995_v0  ;;  %v1135_v56 = vadd.f32 %v1134_v54, %v506_v53  ;;  %2575 = vmatprep.mubr.msk.bf16.mxu1 %vm2996_vm0, %v2995_v0 }
  0xc8   :  { %v2327_v57 = vpop.f32.mrf.mxu0  ;;  %v2477_v58 = vpop.f32.mrf.mxu1 }
  0xc9   :  { %v1435_v59 = vadd.f32 %v3337_v55, %v1135_v56  ;;  %v2683_v57 = vld [vmem:[%s3788_s1 + $0xe0] sm:$0xff]  }
  0xca   :  { %v509_v60 = vpop.f32.mrf.mxu0  ;;  %v1137_v62 = vpop.f32.mrf.mxu1 }
  0xcb   :  { %v1508_v1 = vsub.f32 0.0, %v1435_v59  ;;  %v1138_v2 = vadd.f32 %v1137_v62, %v509_v60  ;;  %v2684_v59 = vld [vmem:[%s3789_s0 + $0xe0] sm:$0xff]  }
  0xcc   :  { %v2328_v3 = vpop.f32.mrf.mxu0  ;;  %v2478_v4 = vpop.f32.mrf.mxu1 }
  0xcd   :  { %v1581_v5 = vmul.f32 1.442695, %v1508_v1  ;;  %v1436_v6 = vadd.f32 %v3337_v55, %v1138_v2 }
  0xce   :  { %v514_v7 = vpop.f32.mrf.mxu0  ;;  %2426 = vmatmul.mubr.msk.bf16.gmra.mxu0 %vm360_vm1, %v2677_v61  ;;  %v1142_v8 = vpop.f32.mrf.mxu1  ;;  %2576 = vmatmul.mubr.msk.bf16.gmra.mxu1 %vm360_vm1, %v2678_v63 }
  0xcf   :  { %2429 = vmatprep.mubr.msk.bf16.mxu0 %vm2996_vm0, %v2995_v0  ;;  %2701 = vpow2.f32 %v1581_v5  ;;  %v1509_v9 = vsub.f32 0.0, %v1436_v6  ;;  %v1143_v10 = vadd.f32 %v1142_v8, %v514_v7  ;;  %2579 = vmatprep.mubr.msk.bf16.mxu1 %vm2996_vm0, %v2995_v0 }
  0xd0   :  { %v2331_v11 = vpop.f32.mrf.mxu0  ;;  %v2481_v12 = vpop.f32.mrf.mxu1 }
  0xd1   :  { %v1583_v13 = vmul.f32 1.442695, %v1509_v9  ;;  %v1437_v14 = vadd.f32 %v3337_v55, %v1143_v10 }
  0xd2   :  { %v517_v15 = vpop.f32.mrf.mxu0  ;;  %v1145_v17 = vpop.f32.mrf.mxu1 }
  0xd3   :  { %2703 = vpow2.f32 %v1583_v13  ;;  %v1510_v19 = vsub.f32 0.0, %v1437_v14  ;;  %v1146_v20 = vadd.f32 %v1145_v17, %v517_v15 }
  0xd4   :  { %v2332_v21 = vpop.f32.mrf.mxu0  ;;  %v2482_v22 = vpop.f32.mrf.mxu1 }
  0xd5   :  { %v1585_v23 = vmul.f32 1.442695, %v1510_v19  ;;  %v1438_v24 = vadd.f32 %v3337_v55, %v1146_v20 }
  0xd6   :  { %v522_v25 = vpop.f32.mrf.mxu0  ;;  %2430 = vmatmul.mubr.msk.bf16.gmra.mxu0 %vm360_vm1, %v2679_v16  ;;  %v1150_v26 = vpop.f32.mrf.mxu1  ;;  %2580 = vmatmul.mubr.msk.bf16.gmra.mxu1 %vm360_vm1, %v2680_v18  ;;  %v2685_v16 = vld [vmem:[%s3788_s1 + $0xe8] sm:$0xff]  }
  0xd7   :  { %2433 = vmatprep.mubr.msk.bf16.mxu0 %vm2996_vm0, %v2995_v0  ;;  %2705 = vpow2.f32 %v1585_v23  ;;  %v1511_v27 = vsub.f32 0.0, %v1438_v24  ;;  %v1151_v28 = vadd.f32 %v1150_v26, %v522_v25  ;;  %2583 = vmatprep.mubr.msk.bf16.mxu1 %vm2996_vm0, %v2995_v0  ;;  %v2686_v18 = vld [vmem:[%s3789_s0 + $0xe8] sm:$0xff]  }
  0xd8   :  { %v2335_v29 = vpop.f32.mrf.mxu0  ;;  %v2485_v30 = vpop.f32.mrf.mxu1 }
  0xd9   :  { %v1587_v31 = vmul.f32 1.442695, %v1511_v27  ;;  %v1439_v32 = vadd.f32 %v3337_v55, %v1151_v28 }
  0xda   :  { %v525_v33 = vpop.f32.mrf.mxu0  ;;  %v1153_v35 = vpop.f32.mrf.mxu1 }
  0xdb   :  { %2707 = vpow2.f32 %v1587_v31  ;;  %v1512_v37 = vsub.f32 0.0, %v1439_v32  ;;  %v1154_v38 = vadd.f32 %v1153_v35, %v525_v33 }
  0xdc   :  { %v2336_v39 = vpop.f32.mrf.mxu0  ;;  %v2702_v40 = vpop.eup %2701 }
  0xdd   :  { %v2486_v41 = vpop.f32.mrf.mxu1  ;;  %v1727_v42 = vadd.f32 1.0, %v2702_v40  ;;  %v1589_v43 = vmul.f32 1.442695, %v1512_v37  ;;  %v1440_v44 = vadd.f32 %v3337_v55, %v1154_v38 }
  0xde   :  { %v530_v45 = vpop.f32.mrf.mxu0  ;;  %2434 = vmatmul.mubr.msk.bf16.gmra.mxu0 %vm360_vm1, %v2681_v34  ;;  %2584 = vmatmul.mubr.msk.bf16.gmra.mxu1 %vm360_vm1, %v2682_v36 }
  0xdf   :  { %v1158_v46 = vpop.f32.mrf.mxu1  ;;  %2437 = vmatprep.mubr.msk.bf16.mxu0 %vm2996_vm0, %v2995_v0  ;;  %2709 = vrcp.f32 %v1727_v42  ;;  %v1513_v47 = vsub.f32 0.0, %v1440_v44  ;;  %2587 = vmatprep.mubr.msk.bf16.mxu1 %vm2996_vm0, %v2995_v0  ;;  %v2687_v42 = vld [vmem:[%s3788_s1 + $0xf0] sm:$0xff]  }
  0xe0   :  { %v1159_v48 = vadd.f32 %v1158_v46, %v530_v45  ;;  %v2339_v49 = vpop.f32.mrf.mxu0  ;;  %v2704_v50 = vpop.eup %2703  ;;  %2711 = vpow2.f32 %v1589_v43  ;;  %v2688_v45 = vld [vmem:[%s3789_s0 + $0xf0] sm:$0xff]  }
  0xe1   :  { %v2489_v51 = vpop.f32.mrf.mxu1  ;;  %v1728_v52 = vadd.f32 1.0, %v2704_v50  ;;  %v1591_v53 = vmul.f32 1.442695, %v1513_v47 }
  0xe2   :  { %v1441_v54 = vadd.f32 %v3337_v55, %v1159_v48  ;;  %v533_v56 = vpop.f32.mrf.mxu0 }
  0xe3   :  { %v1161_v58 = vpop.f32.mrf.mxu1  ;;  %2713 = vrcp.f32 %v1728_v52 }
  0xe4   :  { %v1514_v60 = vsub.f32 0.0, %v1441_v54  ;;  %v1162_v61 = vadd.f32 %v1161_v58, %v533_v56  ;;  %v2340_v62 = vpop.f32.mrf.mxu0  ;;  %v2706_v63 = vpop.eup %2705  ;;  %2715 = vpow2.f32 %v1591_v53 }
  0xe5   :  { %v2490_v1 = vpop.f32.mrf.mxu1  ;;  %v1729_v2 = vadd.f32 1.0, %v2706_v63 }
  0xe6   :  { %v1593_v3 = vmul.f32 1.442695, %v1514_v60  ;;  %v1442_v4 = vadd.f32 %v3337_v55, %v1162_v61  ;;  %v538_v5 = vpop.f32.mrf.mxu0  ;;  %2438 = vmatmul.mubr.msk.bf16.gmra.mxu0 %vm360_vm1, %v2683_v57  ;;  %2588 = vmatmul.mubr.msk.bf16.gmra.mxu1 %vm360_vm1, %v2684_v59 }
  0xe7   :  { %v1166_v6 = vpop.f32.mrf.mxu1  ;;  %2441 = vmatprep.mubr.msk.bf16.mxu0 %vm2996_vm0, %v2995_v0  ;;  %2717 = vrcp.f32 %v1729_v2  ;;  %2591 = vmatprep.mubr.msk.bf16.mxu1 %vm2996_vm0, %v2995_v0 }
  0xe8   :  { %v1515_v7 = vsub.f32 0.0, %v1442_v4  ;;  %v1167_v8 = vadd.f32 %v1166_v6, %v538_v5  ;;  %v2343_v9 = vpop.f32.mrf.mxu0  ;;  %v2708_v10 = vpop.eup %2707  ;;  %2719 = vpow2.f32 %v1593_v3 }
  0xe9   :  { %v2493_v11 = vpop.f32.mrf.mxu1  ;;  %v1730_v12 = vadd.f32 1.0, %v2708_v10 }
  0xea   :  { %v1595_v13 = vmul.f32 1.442695, %v1515_v7  ;;  %v1443_v14 = vadd.f32 %v3337_v55, %v1167_v8  ;;  %v541_v15 = vpop.f32.mrf.mxu0  ;;  %v2689_v8 = vld [vmem:[%s3788_s1 + $0xf8] sm:$0xff]  }
  0xeb   :  { %v1169_v17 = vpop.f32.mrf.mxu1  ;;  %2721 = vrcp.f32 %v1730_v12  ;;  %v2690_v11 = vld [vmem:[%s3789_s0 + $0xf8] sm:$0xff]  }
  0xec   :  { %v1516_v19 = vsub.f32 0.0, %v1443_v14  ;;  %v1170_v20 = vadd.f32 %v1169_v17, %v541_v15  ;;  %v2344_v21 = vpop.f32.mrf.mxu0  ;;  %v2710_v22 = vpop.eup %2709  ;;  %2723 = vpow2.f32 %v1595_v13 }
  0xed   :  { %v2494_v23 = vpop.f32.mrf.mxu1  ;;  %v2712_v24 = vpop.eup %2711  ;;  %v1873_v25 = vmax.f32 %v2710_v22, 0.0 }
  0xee   :  { %v1597_v26 = vmul.f32 1.442695, %v1516_v19  ;;  %v1444_v27 = vadd.f32 %v3337_v55, %v1170_v20  ;;  %v546_v28 = vpop.f32.mrf.mxu0  ;;  %2442 = vmatmul.mubr.msk.bf16.gmra.mxu0 %vm360_vm1, %v2685_v16  ;;  %v1731_v29 = vadd.f32 1.0, %v2712_v24  ;;  %2592 = vmatmul.mubr.msk.bf16.gmra.mxu1 %vm360_vm1, %v2686_v18 }
  0xef   :  { %v1174_v30 = vpop.f32.mrf.mxu1  ;;  %2445 = vmatprep.mubr.msk.bf16.mxu0 %vm2996_vm0, %v2995_v0  ;;  %v1946_v31 = vmin.f32 %v1873_v25, 1.0  ;;  %2595 = vmatprep.mubr.msk.bf16.mxu1 %vm2996_vm0, %v2995_v0 }
  0xf0   :  { %2725 = vpow2.f32 %v1597_v26  ;;  %v1517_v32 = vsub.f32 0.0, %v1444_v27  ;;  %v1175_v33 = vadd.f32 %v1174_v30, %v546_v28  ;;  %v2347_v34 = vpop.f32.mrf.mxu0  ;;  %v2714_v35 = vpop.eup %2713 }
  0xf1   :  { %2727 = vrcp.f32 %v1731_v29  ;;  %v2497_v36 = vpop.f32.mrf.mxu1  ;;  %v2716_v37 = vpop.eup %2715  ;;  %2019 = vst [vmem:[%s3791_s5] sm:$0xff] %v1946_v31  ;;  %v1874_v38 = vmax.f32 %v2714_v35, 0.0 }
  0xf2   :  { %v1599_v39 = vmul.f32 1.442695, %v1517_v32  ;;  %v1445_v40 = vadd.f32 %v3337_v55, %v1175_v33  ;;  %v549_v41 = vpop.f32.mrf.mxu0  ;;  %v1732_v43 = vadd.f32 1.0, %v2716_v37  ;;  %v2691_v36 = vld [vmem:[%s3788_s1 + $0x100] sm:$0xff]  }
  0xf3   :  { %v1177_v44 = vpop.f32.mrf.mxu1  ;;  %v1947_v46 = vmin.f32 %v1874_v38, 1.0 }
  0xf4   :  { %2729 = vpow2.f32 %v1599_v39  ;;  %v1518_v47 = vsub.f32 0.0, %v1445_v40  ;;  %v1178_v48 = vadd.f32 %v1177_v44, %v549_v41  ;;  %v2348_v49 = vpop.f32.mrf.mxu0  ;;  %v2718_v50 = vpop.eup %2717  ;;  %v2692_v39 = vld [vmem:[%s3789_s0 + $0x100] sm:$0xff]  }
  0xf5   :  { %2731 = vrcp.f32 %v1732_v43  ;;  %v2498_v51 = vpop.f32.mrf.mxu1  ;;  %v2720_v52 = vpop.eup %2719  ;;  %2020 = vst [vmem:[%s3791_s5 + $0x8] sm:$0xff] %v1947_v46  ;;  %v1875_v53 = vmax.f32 %v2718_v50, 0.0 }
  0xf6   :  { %v1601_v54 = vmul.f32 1.442695, %v1518_v47  ;;  %v1446_v56 = vadd.f32 %v3337_v55, %v1178_v48  ;;  %v554_v57 = vpop.f32.mrf.mxu0  ;;  %2446 = vmatmul.mubr.msk.bf16.gmra.mxu0 %vm360_vm1, %v2687_v42  ;;  %v1733_v58 = vadd.f32 1.0, %v2720_v52  ;;  %2596 = vmatmul.mubr.msk.bf16.gmra.mxu1 %vm360_vm1, %v2688_v45 }
  0xf7   :  { %v1182_v59 = vpop.f32.mrf.mxu1  ;;  %2449 = vmatprep.mubr.msk.bf16.mxu0 %vm2996_vm0, %v2995_v0  ;;  %v1948_v60 = vmin.f32 %v1875_v53, 1.0  ;;  %2599 = vmatprep.mubr.msk.bf16.mxu1 %vm2996_vm0, %v2995_v0 }
  0xf8   :  { %2733 = vpow2.f32 %v1601_v54  ;;  %v1519_v61 = vsub.f32 0.0, %v1446_v56  ;;  %v1183_v62 = vadd.f32 %v1182_v59, %v554_v57  ;;  %v2351_v63 = vpop.f32.mrf.mxu0  ;;  %v2722_v1 = vpop.eup %2721 }
  0xf9   :  { %2735 = vrcp.f32 %v1733_v58  ;;  %v2501_v2 = vpop.f32.mrf.mxu1  ;;  %v2724_v3 = vpop.eup %2723  ;;  %2021 = vst [vmem:[%s3791_s5 + $0x10] sm:$0xff] %v1948_v60  ;;  %v1876_v4 = vmax.f32 %v2722_v1, 0.0 }
  0xfa   :  { %v1603_v5 = vmul.f32 1.442695, %v1519_v61  ;;  %v1447_v6 = vadd.f32 %v3337_v55, %v1183_v62  ;;  %v557_v7 = vpop.f32.mrf.mxu0  ;;  %v1734_v9 = vadd.f32 1.0, %v2724_v3  ;;  %v2693_v2 = vld [vmem:[%s3788_s1 + $0x108] sm:$0xff]  }
  0xfb   :  { %v1185_v10 = vpop.f32.mrf.mxu1  ;;  %v1949_v12 = vmin.f32 %v1876_v4, 1.0 }
  0xfc   :  { %2737 = vpow2.f32 %v1603_v5  ;;  %v1520_v13 = vsub.f32 0.0, %v1447_v6  ;;  %v1186_v14 = vadd.f32 %v1185_v10, %v557_v7  ;;  %v2352_v15 = vpop.f32.mrf.mxu0  ;;  %v2694_v5 = vld [vmem:[%s3789_s0 + $0x108] sm:$0xff]  }
  0xfd   :  { %v2726_v16 = vpop.eup %2725  ;;  %2739 = vrcp.f32 %v1734_v9  ;;  %v2502_v17 = vpop.f32.mrf.mxu1  ;;  %2022 = vst [vmem:[%s3791_s5 + $0x18] sm:$0xff] %v1949_v12 }
  0xfe   :  { %v2728_v18 = vpop.eup %2727  ;;  %v1735_v19 = vadd.f32 1.0, %v2726_v16  ;;  %v1605_v20 = vmul.f32 1.442695, %v1520_v13  ;;  %v1448_v21 = vadd.f32 %v3337_v55, %v1186_v14  ;;  %v562_v22 = vpop.f32.mrf.mxu0  ;;  %2450 = vmatmul.mubr.msk.bf16.gmra.mxu0 %vm360_vm1, %v2689_v8  ;;  %2600 = vmatmul.mubr.msk.bf16.gmra.mxu1 %vm360_vm1, %v2690_v11 }
  0xff   :  { %v1877_v23 = vmax.f32 %v2728_v18, 0.0  ;;  %v1190_v24 = vpop.f32.mrf.mxu1  ;;  %2453 = vmatprep.mubr.msk.bf16.mxu0 %vm2996_vm0, %v2995_v0  ;;  %2603 = vmatprep.mubr.msk.bf16.mxu1 %vm2996_vm0, %v2995_v0 }
 0x100   :  { %2741 = vrcp.f32 %v1735_v19  ;;  %v1521_v25 = vsub.f32 0.0, %v1448_v21  ;;  %v1191_v26 = vadd.f32 %v1190_v24, %v562_v22  ;;  %v2355_v27 = vpop.f32.mrf.mxu0 }
 0x101   :  { %v2730_v28 = vpop.eup %2729  ;;  %v1950_v29 = vmin.f32 %v1877_v23, 1.0  ;;  %2743 = vpow2.f32 %v1605_v20  ;;  %v2505_v30 = vpop.f32.mrf.mxu1 }
 0x102   :  { %v2732_v31 = vpop.eup %2731  ;;  %v1736_v32 = vadd.f32 1.0, %v2730_v28  ;;  %v1607_v33 = vmul.f32 1.442695, %v1521_v25  ;;  %v1449_v34 = vadd.f32 %v3337_v55, %v1191_v26  ;;  %v565_v35 = vpop.f32.mrf.mxu0  ;;  %v2695_v30 = vld [vmem:[%s3788_s1 + $0x110] sm:$0xff]  }
 0x103   :  { %2023 = vst [vmem:[%s3791_s5 + $0x20] sm:$0xff] %v1950_v29  ;;  %v1878_v37 = vmax.f32 %v2732_v31, 0.0  ;;  %v1193_v38 = vpop.f32.mrf.mxu1 }
 0x104   :  { %2745 = vrcp.f32 %v1736_v32  ;;  %v1522_v40 = vsub.f32 0.0, %v1449_v34  ;;  %v1194_v41 = vadd.f32 %v1193_v38, %v565_v35  ;;  %v2356_v42 = vpop.f32.mrf.mxu0 }
 0x105   :  { %v2734_v43 = vpop.eup %2733  ;;  %v1951_v44 = vmin.f32 %v1878_v37, 1.0  ;;  %2747 = vpow2.f32 %v1607_v33  ;;  %v2506_v45 = vpop.f32.mrf.mxu1  ;;  %v2696_v33 = vld [vmem:[%s3789_s0 + $0x110] sm:$0xff]  }
 0x106   :  { %v2736_v46 = vpop.eup %2735  ;;  %v1737_v47 = vadd.f32 1.0, %v2734_v43  ;;  %v1609_v48 = vmul.f32 1.442695, %v1522_v40  ;;  %v1450_v49 = vadd.f32 %v3337_v55, %v1194_v41  ;;  %v570_v50 = vpop.f32.mrf.mxu0  ;;  %2454 = vmatmul.mubr.msk.bf16.gmra.mxu0 %vm360_vm1, %v2691_v36  ;;  %2604 = vmatmul.mubr.msk.bf16.gmra.mxu1 %vm360_vm1, %v2692_v39 }
 0x107   :  { %2024 = vst [vmem:[%s3791_s5 + $0x28] sm:$0xff] %v1951_v44  ;;  %v1879_v51 = vmax.f32 %v2736_v46, 0.0  ;;  %v1198_v52 = vpop.f32.mrf.mxu1  ;;  %2457 = vmatprep.mubr.msk.bf16.mxu0 %vm2996_vm0, %v2995_v0  ;;  %2607 = vmatprep.mubr.msk.bf16.mxu1 %vm2996_vm0, %v2995_v0 }
 0x108   :  { %2749 = vrcp.f32 %v1737_v47  ;;  %v1523_v53 = vsub.f32 0.0, %v1450_v49  ;;  %v1199_v54 = vadd.f32 %v1198_v52, %v570_v50  ;;  %v2359_v56 = vpop.f32.mrf.mxu0 }
 0x109   :  { %v2738_v57 = vpop.eup %2737  ;;  %v1952_v58 = vmin.f32 %v1879_v51, 1.0  ;;  %2751 = vpow2.f32 %v1609_v48  ;;  %v2509_v59 = vpop.f32.mrf.mxu1 }
 0x10a   :  { %v2740_v60 = vpop.eup %2739  ;;  %v1738_v61 = vadd.f32 1.0, %v2738_v57  ;;  %v1611_v62 = vmul.f32 1.442695, %v1523_v53  ;;  %v1451_v63 = vadd.f32 %v3337_v55, %v1199_v54  ;;  %v573_v1 = vpop.f32.mrf.mxu0  ;;  %v2697_v59 = vld [vmem:[%s3788_s1 + $0x118] sm:$0xff]  }
 0x10b   :  { %2025 = vst [vmem:[%s3791_s5 + $0x30] sm:$0xff] %v1952_v58  ;;  %v1880_v3 = vmax.f32 %v2740_v60, 0.0  ;;  %v1201_v4 = vpop.f32.mrf.mxu1 }
 0x10c   :  { %2753 = vrcp.f32 %v1738_v61  ;;  %v1524_v6 = vsub.f32 0.0, %v1451_v63  ;;  %v1202_v7 = vadd.f32 %v1201_v4, %v573_v1  ;;  %v2360_v8 = vpop.f32.mrf.mxu0 }
 0x10d   :  { %v2742_v9 = vpop.eup %2741  ;;  %v1953_v10 = vmin.f32 %v1880_v3, 1.0  ;;  %2755 = vpow2.f32 %v1611_v62  ;;  %v2510_v11 = vpop.f32.mrf.mxu1  ;;  %v2698_v62 = vld [vmem:[%s3789_s0 + $0x118] sm:$0xff]  }
 0x10e   :  { %v2744_v12 = vpop.eup %2743  ;;  %v1881_v13 = vmax.f32 %v2742_v9, 0.0  ;;  %v1613_v14 = vmul.f32 1.442695, %v1524_v6  ;;  %v1452_v15 = vadd.f32 %v3337_v55, %v1202_v7  ;;  %v578_v16 = vpop.f32.mrf.mxu0  ;;  %2458 = vmatmul.mubr.msk.bf16.gmra.mxu0 %vm360_vm1, %v2693_v2  ;;  %2608 = vmatmul.mubr.msk.bf16.gmra.mxu1 %vm360_vm1, %v2694_v5 }
 0x10f   :  { %2026 = vst [vmem:[%s3791_s5 + $0x38] sm:$0xff] %v1953_v10  ;;  %v1739_v17 = vadd.f32 1.0, %v2744_v12  ;;  %v1206_v18 = vpop.f32.mrf.mxu1  ;;  %2461 = vmatprep.mubr.msk.bf16.mxu0 %vm2996_vm0, %v2995_v0  ;;  %2611 = vmatprep.mubr.msk.bf16.mxu1 %vm2996_vm0, %v2995_v0 }
 0x110   :  { %v1954_v19 = vmin.f32 %v1881_v13, 1.0  ;;  %2757 = vpow2.f32 %v1613_v14  ;;  %v1525_v20 = vsub.f32 0.0, %v1452_v15  ;;  %v1207_v21 = vadd.f32 %v1206_v18, %v578_v16  ;;  %v2363_v22 = vpop.f32.mrf.mxu0 }
 0x111   :  { %v2746_v23 = vpop.eup %2745  ;;  %2759 = vrcp.f32 %v1739_v17  ;;  %v2513_v24 = vpop.f32.mrf.mxu1 }
 0x112   :  { %v2748_v25 = vpop.eup %2747  ;;  %2027 = vst [vmem:[%s3791_s5 + $0x40] sm:$0xff] %v1954_v19  ;;  %v1882_v26 = vmax.f32 %v2746_v23, 0.0  ;;  %v1615_v27 = vmul.f32 1.442695, %v1525_v20  ;;  %v1453_v28 = vadd.f32 %v3337_v55, %v1207_v21  ;;  %v581_v29 = vpop.f32.mrf.mxu0  ;;  %v2699_v24 = vld [vmem:[%s3788_s1 + $0x120] ss:$0 sps:$4 sm:$0xff]  }
 0x113   :  { %v1740_v31 = vadd.f32 1.0, %v2748_v25  ;;  %v1209_v32 = vpop.f32.mrf.mxu1 }
 0x114   :  { %v1955_v34 = vmin.f32 %v1882_v26, 1.0  ;;  %2761 = vpow2.f32 %v1615_v27  ;;  %v1526_v35 = vsub.f32 0.0, %v1453_v28  ;;  %v1210_v36 = vadd.f32 %v1209_v32, %v581_v29  ;;  %v2364_v37 = vpop.f32.mrf.mxu0  ;;  %v2700_v26 = vld [vmem:[%s3789_s0 + $0x120] ss:$0 sps:$4 sm:$0xff]  }
 0x115   :  { %v2750_v38 = vpop.eup %2749  ;;  %2763 = vrcp.f32 %v1740_v31  ;;  %v2514_v39 = vpop.f32.mrf.mxu1 }
 0x116   :  { %v2752_v40 = vpop.eup %2751  ;;  %2028 = vst [vmem:[%s3791_s5 + $0x48] sm:$0xff] %v1955_v34  ;;  %v1883_v41 = vmax.f32 %v2750_v38, 0.0  ;;  %v1617_v42 = vmul.f32 1.442695, %v1526_v35  ;;  %v1454_v43 = vadd.f32 %v3337_v55, %v1210_v36  ;;  %v586_v44 = vpop.f32.mrf.mxu0  ;;  %2462 = vmatmul.mubr.msk.bf16.gmra.mxu0 %vm360_vm1, %v2695_v30  ;;  %2612 = vmatmul.mubr.msk.bf16.gmra.mxu1 %vm360_vm1, %v2696_v33 }
 0x117   :  { %v1741_v45 = vadd.f32 1.0, %v2752_v40  ;;  %v1214_v46 = vpop.f32.mrf.mxu1  ;;  %2465 = vmatprep.mubr.msk.bf16.mxu0 %vm2996_vm0, %v2995_v0  ;;  %2615 = vmatprep.mubr.msk.bf16.mxu1 %vm2996_vm0, %v2995_v0 }
 0x118   :  { %v1956_v47 = vmin.f32 %v1883_v41, 1.0  ;;  %2765 = vpow2.f32 %v1617_v42  ;;  %v1527_v48 = vsub.f32 0.0, %v1454_v43  ;;  %v1215_v49 = vadd.f32 %v1214_v46, %v586_v44  ;;  %v2367_v50 = vpop.f32.mrf.mxu0 }
 0x119   :  { %v2754_v51 = vpop.eup %2753  ;;  %2767 = vrcp.f32 %v1741_v45  ;;  %v2517_v52 = vpop.f32.mrf.mxu1 }
 0x11a   :  { %v2756_v53 = vpop.eup %2755  ;;  %2029 = vst [vmem:[%s3791_s5 + $0x50] sm:$0xff] %v1956_v47  ;;  %v1884_v54 = vmax.f32 %v2754_v51, 0.0  ;;  %v1619_v56 = vmul.f32 1.442695, %v1527_v48  ;;  %v1455_v57 = vadd.f32 %v3337_v55, %v1215_v49  ;;  %v589_v58 = vpop.f32.mrf.mxu0 }
 0x11b   :  { %v1742_v60 = vadd.f32 1.0, %v2756_v53  ;;  %v1217_v61 = vpop.f32.mrf.mxu1 }
 0x11c   :  { %v1957_v63 = vmin.f32 %v1884_v54, 1.0  ;;  %2769 = vpow2.f32 %v1619_v56  ;;  %v1528_v1 = vsub.f32 0.0, %v1455_v57  ;;  %v1218_v2 = vadd.f32 %v1217_v61, %v589_v58  ;;  %v2368_v3 = vpop.f32.mrf.mxu0 }
 0x11d   :  { %v2758_v4 = vpop.eup %2757  ;;  %2771 = vrcp.f32 %v1742_v60  ;;  %v2518_v5 = vpop.f32.mrf.mxu1 }
 0x11e   :  { %v2760_v6 = vpop.eup %2759  ;;  %2030 = vst [vmem:[%s3791_s5 + $0x58] sm:$0xff] %v1957_v63  ;;  %v1743_v7 = vadd.f32 1.0, %v2758_v4  ;;  %v1621_v8 = vmul.f32 1.442695, %v1528_v1  ;;  %v1456_v9 = vadd.f32 %v3337_v55, %v1218_v2  ;;  %v594_v10 = vpop.f32.mrf.mxu0  ;;  %2466 = vmatmul.mubr.msk.bf16.gmra.mxu0 %vm360_vm1, %v2697_v59  ;;  %2616 = vmatmul.mubr.msk.bf16.gmra.mxu1 %vm360_vm1, %v2698_v62 }
 0x11f   :  { %v1885_v11 = vmax.f32 %v2760_v6, 0.0  ;;  %v1222_v12 = vpop.f32.mrf.mxu1  ;;  %2469 = vmatprep.mubr.msk.bf16.mxu0 %vm2996_vm0, %v2995_v0  ;;  %2619 = vmatprep.mubr.msk.bf16.mxu1 %vm2996_vm0, %v2995_v0 }
 0x120   :  { %2773 = vrcp.f32 %v1743_v7  ;;  %v1529_v13 = vsub.f32 0.0, %v1456_v9  ;;  %v1223_v14 = vadd.f32 %v1222_v12, %v594_v10  ;;  %v2371_v15 = vpop.f32.mrf.mxu0 }
 0x121   :  { %v2762_v16 = vpop.eup %2761  ;;  %v1958_v17 = vmin.f32 %v1885_v11, 1.0  ;;  %2775 = vpow2.f32 %v1621_v8  ;;  %v2521_v18 = vpop.f32.mrf.mxu1 }
 0x122   :  { %v2764_v19 = vpop.eup %2763  ;;  %v1744_v20 = vadd.f32 1.0, %v2762_v16  ;;  %v1623_v21 = vmul.f32 1.442695, %v1529_v13  ;;  %v1457_v22 = vadd.f32 %v3337_v55, %v1223_v14  ;;  %v597_v23 = vpop.f32.mrf.mxu0 }
 0x123   :  { %2031 = vst [vmem:[%s3791_s5 + $0x60] sm:$0xff] %v1958_v17  ;;  %v1886_v25 = vmax.f32 %v2764_v19, 0.0  ;;  %v1225_v0 = vpop.f32.mrf.mxu1 }
 0x124   :  { %2777 = vrcp.f32 %v1744_v20  ;;  %v1530_v27 = vsub.f32 0.0, %v1457_v22  ;;  %v1226_v28 = vadd.f32 %v1225_v0, %v597_v23  ;;  %v2372_v29 = vpop.f32.mrf.mxu0 }
 0x125   :  { %v2766_v30 = vpop.eup %2765  ;;  %v1959_v31 = vmin.f32 %v1886_v25, 1.0  ;;  %2779 = vpow2.f32 %v1623_v21  ;;  %v2522_v32 = vpop.f32.mrf.mxu1 }
 0x126   :  { %v2768_v33 = vpop.eup %2767  ;;  %v1745_v34 = vadd.f32 1.0, %v2766_v30  ;;  %v1625_v35 = vmul.f32 1.442695, %v1530_v27  ;;  %v1458_v36 = vadd.f32 %v3337_v55, %v1226_v28  ;;  %v602_v37 = vpop.f32.mrf.mxu0  ;;  %2470 = vmatmul.mubr.msk.bf16.gmra.mxu0 %vm360_vm1, %v2699_v24  ;;  %2620 = vmatmul.mubr.msk.bf16.gmra.mxu1 %vm360_vm1, %v2700_v26 }
 0x127   :  { %2032 = vst [vmem:[%s3791_s5 + $0x68] sm:$0xff] %v1959_v31  ;;  %v1887_v38 = vmax.f32 %v2768_v33, 0.0  ;;  %v1230_v39 = vpop.f32.mrf.mxu1 }
 0x128   :  { %2781 = vrcp.f32 %v1745_v34  ;;  %v1531_v40 = vsub.f32 0.0, %v1458_v36  ;;  %v1231_v41 = vadd.f32 %v1230_v39, %v602_v37  ;;  %v2375_v42 = vpop.f32.mrf.mxu0 }
 0x129   :  { %v2770_v43 = vpop.eup %2769  ;;  %v1960_v44 = vmin.f32 %v1887_v38, 1.0  ;;  %2783 = vpow2.f32 %v1625_v35  ;;  %v2525_v45 = vpop.f32.mrf.mxu1 }
 0x12a   :  { %v2772_v46 = vpop.eup %2771  ;;  %v1746_v47 = vadd.f32 1.0, %v2770_v43  ;;  %v1627_v48 = vmul.f32 1.442695, %v1531_v40  ;;  %v1459_v49 = vadd.f32 %v3337_v55, %v1231_v41  ;;  %v605_v50 = vpop.f32.mrf.mxu0 }
 0x12b   :  { %2033 = vst [vmem:[%s3791_s5 + $0x70] sm:$0xff] %v1960_v44  ;;  %v1888_v51 = vmax.f32 %v2772_v46, 0.0  ;;  %v1233_v52 = vpop.f32.mrf.mxu1 }
 0x12c   :  { %2785 = vrcp.f32 %v1746_v47  ;;  %v1532_v53 = vsub.f32 0.0, %v1459_v49  ;;  %v1234_v54 = vadd.f32 %v1233_v52, %v605_v50  ;;  %v2376_v56 = vpop.f32.mrf.mxu0 }
 0x12d   :  { %v2774_v57 = vpop.eup %2773  ;;  %v1961_v58 = vmin.f32 %v1888_v51, 1.0  ;;  %2787 = vpow2.f32 %v1627_v48  ;;  %v2526_v59 = vpop.f32.mrf.mxu1 }
 0x12e   :  { %v2776_v60 = vpop.eup %2775  ;;  %v1889_v61 = vmax.f32 %v2774_v57, 0.0  ;;  %v1629_v62 = vmul.f32 1.442695, %v1532_v53  ;;  %v1460_v63 = vadd.f32 %v3337_v55, %v1234_v54  ;;  %v610_v1 = vpop.f32.mrf.mxu0 }
 0x12f   :  { %2034 = vst [vmem:[%s3791_s5 + $0x78] sm:$0xff] %v1961_v58  ;;  %v1747_v2 = vadd.f32 1.0, %v2776_v60  ;;  %v1238_v3 = vpop.f32.mrf.mxu1 }
 0x130   :  { %v1962_v4 = vmin.f32 %v1889_v61, 1.0  ;;  %2789 = vpow2.f32 %v1629_v62  ;;  %v1533_v5 = vsub.f32 0.0, %v1460_v63  ;;  %v1239_v6 = vadd.f32 %v1238_v3, %v610_v1  ;;  %v2379_v7 = vpop.f32.mrf.mxu0 }
 0x131   :  { %v2778_v8 = vpop.eup %2777  ;;  %2791 = vrcp.f32 %v1747_v2  ;;  %v2529_v9 = vpop.f32.mrf.mxu1 }
 0x132   :  { %v2780_v10 = vpop.eup %2779  ;;  %2035 = vst [vmem:[%s3791_s5 + $0x80] sm:$0xff] %v1962_v4  ;;  %v1890_v11 = vmax.f32 %v2778_v8, 0.0  ;;  %v1631_v12 = vmul.f32 1.442695, %v1533_v5  ;;  %v1461_v13 = vadd.f32 %v3337_v55, %v1239_v6  ;;  %v613_v14 = vpop.f32.mrf.mxu0 }
 0x133   :  { %v1748_v15 = vadd.f32 1.0, %v2780_v10  ;;  %v1241_v16 = vpop.f32.mrf.mxu1 }
 0x134   :  { %v1963_v17 = vmin.f32 %v1890_v11, 1.0  ;;  %2793 = vpow2.f32 %v1631_v12  ;;  %v1534_v18 = vsub.f32 0.0, %v1461_v13  ;;  %v1242_v19 = vadd.f32 %v1241_v16, %v613_v14  ;;  %v2380_v20 = vpop.f32.mrf.mxu0 }
 0x135   :  { %v2782_v21 = vpop.eup %2781  ;;  %2795 = vrcp.f32 %v1748_v15  ;;  %v2530_v22 = vpop.f32.mrf.mxu1 }
 0x136   :  { %v2784_v23 = vpop.eup %2783  ;;  %2036 = vst [vmem:[%s3791_s5 + $0x88] sm:$0xff] %v1963_v17  ;;  %v1891_v24 = vmax.f32 %v2782_v21, 0.0  ;;  %v1633_v25 = vmul.f32 1.442695, %v1534_v18  ;;  %v1462_v0 = vadd.f32 %v3337_v55, %v1242_v19  ;;  %v618_v26 = vpop.f32.mrf.mxu0 }
 0x137   :  { %v1749_v27 = vadd.f32 1.0, %v2784_v23  ;;  %v1246_v28 = vpop.f32.mrf.mxu1 }
 0x138   :  { %v1964_v29 = vmin.f32 %v1891_v24, 1.0  ;;  %2797 = vpow2.f32 %v1633_v25  ;;  %v1535_v30 = vsub.f32 0.0, %v1462_v0  ;;  %v1247_v31 = vadd.f32 %v1246_v28, %v618_v26  ;;  %v2383_v32 = vpop.f32.mrf.mxu0 }
 0x139   :  { %v2786_v33 = vpop.eup %2785  ;;  %2799 = vrcp.f32 %v1749_v27  ;;  %v2533_v34 = vpop.f32.mrf.mxu1 }
 0x13a   :  { %v2788_v35 = vpop.eup %2787  ;;  %2037 = vst [vmem:[%s3791_s5 + $0x90] sm:$0xff] %v1964_v29  ;;  %v1892_v36 = vmax.f32 %v2786_v33, 0.0  ;;  %v1635_v37 = vmul.f32 1.442695, %v1535_v30  ;;  %v1463_v38 = vadd.f32 %v3337_v55, %v1247_v31  ;;  %v621_v39 = vpop.f32.mrf.mxu0 }
 0x13b   :  { %v1750_v40 = vadd.f32 1.0, %v2788_v35  ;;  %v1249_v41 = vpop.f32.mrf.mxu1 }
 0x13c   :  { %v1965_v42 = vmin.f32 %v1892_v36, 1.0  ;;  %2801 = vpow2.f32 %v1635_v37  ;;  %v1536_v43 = vsub.f32 0.0, %v1463_v38  ;;  %v1250_v44 = vadd.f32 %v1249_v41, %v621_v39  ;;  %v2384_v45 = vpop.f32.mrf.mxu0 }
 0x13d   :  { %v2790_v46 = vpop.eup %2789  ;;  %2803 = vrcp.f32 %v1750_v40  ;;  %v2534_v47 = vpop.f32.mrf.mxu1 }
 0x13e   :  { %v2792_v48 = vpop.eup %2791  ;;  %2038 = vst [vmem:[%s3791_s5 + $0x98] sm:$0xff] %v1965_v42  ;;  %v1751_v49 = vadd.f32 1.0, %v2790_v46  ;;  %v1637_v50 = vmul.f32 1.442695, %v1536_v43  ;;  %v1464_v51 = vadd.f32 %v3337_v55, %v1250_v44  ;;  %v626_v52 = vpop.f32.mrf.mxu0 }
 0x13f   :  { %v1893_v53 = vmax.f32 %v2792_v48, 0.0  ;;  %v1254_v54 = vpop.f32.mrf.mxu1 }
 0x140   :  { %2805 = vrcp.f32 %v1751_v49  ;;  %v1537_v56 = vsub.f32 0.0, %v1464_v51  ;;  %v1255_v57 = vadd.f32 %v1254_v54, %v626_v52  ;;  %v2387_v58 = vpop.f32.mrf.mxu0 }
 0x141   :  { %v2794_v59 = vpop.eup %2793  ;;  %v1966_v60 = vmin.f32 %v1893_v53, 1.0  ;;  %2807 = vpow2.f32 %v1637_v50  ;;  %v2537_v61 = vpop.f32.mrf.mxu1 }
 0x142   :  { %v2796_v62 = vpop.eup %2795  ;;  %v1752_v63 = vadd.f32 1.0, %v2794_v59  ;;  %v1639_v1 = vmul.f32 1.442695, %v1537_v56  ;;  %v1465_v2 = vadd.f32 %v3337_v55, %v1255_v57  ;;  %v629_v3 = vpop.f32.mrf.mxu0  ;;  %v3581_v55 = vld [vmem:[%s3790_s4] ss:$0 sm:$0xff] }
 0x143   :  { %2039 = vst [vmem:[%s3791_s5 + $0xa0] sm:$0xff] %v1966_v60  ;;  %v1894_v4 = vmax.f32 %v2796_v62, 0.0  ;;  %v1257_v5 = vpop.f32.mrf.mxu1 }
 0x144   :  { %2809 = vrcp.f32 %v1752_v63  ;;  %v1538_v6 = vsub.f32 0.0, %v1465_v2  ;;  %v1258_v7 = vadd.f32 %v1257_v5, %v629_v3  ;;  %v2388_v8 = vpop.f32.mrf.mxu0 }
 0x145   :  { %v2798_v9 = vpop.eup %2797  ;;  %v1967_v10 = vmin.f32 %v1894_v4, 1.0  ;;  %2811 = vpow2.f32 %v1639_v1  ;;  %v2538_v11 = vpop.f32.mrf.mxu1 }
 0x146   :  { %v2800_v12 = vpop.eup %2799  ;;  %v1753_v13 = vadd.f32 1.0, %v2798_v9  ;;  %v1641_v14 = vmul.f32 1.442695, %v1538_v6  ;;  %v1466_v15 = vadd.f32 %v3581_v55, %v1258_v7  ;;  %v634_v16 = vpop.f32.mrf.mxu0 }
 0x147   :  { %2040 = vst [vmem:[%s3791_s5 + $0xa8] sm:$0xff] %v1967_v10  ;;  %v1895_v17 = vmax.f32 %v2800_v12, 0.0  ;;  %v1262_v18 = vpop.f32.mrf.mxu1 }
 0x148   :  { %2813 = vrcp.f32 %v1753_v13  ;;  %v1539_v19 = vsub.f32 0.0, %v1466_v15  ;;  %v1263_v20 = vadd.f32 %v1262_v18, %v634_v16  ;;  %v2391_v21 = vpop.f32.mrf.mxu0 }
 0x149   :  { %v2802_v22 = vpop.eup %2801  ;;  %v1968_v23 = vmin.f32 %v1895_v17, 1.0  ;;  %2815 = vpow2.f32 %v1641_v14  ;;  %v2541_v24 = vpop.f32.mrf.mxu1 }
 0x14a   :  { %v2804_v25 = vpop.eup %2803  ;;  %v1754_v0 = vadd.f32 1.0, %v2802_v22  ;;  %v1643_v26 = vmul.f32 1.442695, %v1539_v19  ;;  %v1467_v27 = vadd.f32 %v3581_v55, %v1263_v20  ;;  %v637_v28 = vpop.f32.mrf.mxu0 }
 0x14b   :  { %2041 = vst [vmem:[%s3791_s5 + $0xb0] sm:$0xff] %v1968_v23  ;;  %v1896_v29 = vmax.f32 %v2804_v25, 0.0  ;;  %v1265_v30 = vpop.f32.mrf.mxu1 }
 0x14c   :  { %2817 = vrcp.f32 %v1754_v0  ;;  %v1540_v31 = vsub.f32 0.0, %v1467_v27  ;;  %v1266_v32 = vadd.f32 %v1265_v30, %v637_v28  ;;  %v2392_v33 = vpop.f32.mrf.mxu0 }
 0x14d   :  { %v2806_v34 = vpop.eup %2805  ;;  %v1969_v35 = vmin.f32 %v1896_v29, 1.0  ;;  %2819 = vpow2.f32 %v1643_v26  ;;  %v2542_v36 = vpop.f32.mrf.mxu1 }
 0x14e   :  { %v2808_v37 = vpop.eup %2807  ;;  %v1897_v38 = vmax.f32 %v2806_v34, 0.0  ;;  %v1645_v39 = vmul.f32 1.442695, %v1540_v31  ;;  %v1468_v40 = vadd.f32 %v3581_v55, %v1266_v32  ;;  %v642_v41 = vpop.f32.mrf.mxu0 }
 0x14f   :  { %2042 = vst [vmem:[%s3791_s5 + $0xb8] sm:$0xff] %v1969_v35  ;;  %v1755_v42 = vadd.f32 1.0, %v2808_v37  ;;  %v1270_v43 = vpop.f32.mrf.mxu1 }
 0x150   :  { %v1970_v44 = vmin.f32 %v1897_v38, 1.0  ;;  %2821 = vpow2.f32 %v1645_v39  ;;  %v1541_v45 = vsub.f32 0.0, %v1468_v40  ;;  %v1271_v46 = vadd.f32 %v1270_v43, %v642_v41  ;;  %v2395_v47 = vpop.f32.mrf.mxu0 }
 0x151   :  { %v2810_v48 = vpop.eup %2809  ;;  %2823 = vrcp.f32 %v1755_v42  ;;  %v2545_v49 = vpop.f32.mrf.mxu1 }
 0x152   :  { %v2812_v50 = vpop.eup %2811  ;;  %2043 = vst [vmem:[%s3791_s5 + $0xc0] sm:$0xff] %v1970_v44  ;;  %v1898_v51 = vmax.f32 %v2810_v48, 0.0  ;;  %v1647_v52 = vmul.f32 1.442695, %v1541_v45  ;;  %v1469_v53 = vadd.f32 %v3581_v55, %v1271_v46  ;;  %v645_v54 = vpop.f32.mrf.mxu0 }
 0x153   :  { %v1756_v56 = vadd.f32 1.0, %v2812_v50  ;;  %v1273_v57 = vpop.f32.mrf.mxu1 }
 0x154   :  { %v1971_v58 = vmin.f32 %v1898_v51, 1.0  ;;  %2825 = vpow2.f32 %v1647_v52  ;;  %v1542_v59 = vsub.f32 0.0, %v1469_v53  ;;  %v1274_v60 = vadd.f32 %v1273_v57, %v645_v54  ;;  %v2396_v61 = vpop.f32.mrf.mxu0 }
 0x155   :  { %v2814_v62 = vpop.eup %2813  ;;  %2827 = vrcp.f32 %v1756_v56  ;;  %v2546_v63 = vpop.f32.mrf.mxu1 }
 0x156   :  { %v2816_v1 = vpop.eup %2815  ;;  %2044 = vst [vmem:[%s3791_s5 + $0xc8] sm:$0xff] %v1971_v58  ;;  %v1899_v2 = vmax.f32 %v2814_v62, 0.0  ;;  %v1649_v3 = vmul.f32 1.442695, %v1542_v59  ;;  %v1470_v4 = vadd.f32 %v3581_v55, %v1274_v60  ;;  %v650_v5 = vpop.f32.mrf.mxu0 }
 0x157   :  { %v1757_v6 = vadd.f32 1.0, %v2816_v1  ;;  %v1278_v7 = vpop.f32.mrf.mxu1 }
 0x158   :  { %v1972_v8 = vmin.f32 %v1899_v2, 1.0  ;;  %2829 = vpow2.f32 %v1649_v3  ;;  %v1543_v9 = vsub.f32 0.0, %v1470_v4  ;;  %v1279_v10 = vadd.f32 %v1278_v7, %v650_v5  ;;  %v2399_v11 = vpop.f32.mrf.mxu0 }
 0x159   :  { %v2818_v12 = vpop.eup %2817  ;;  %2831 = vrcp.f32 %v1757_v6  ;;  %v2549_v13 = vpop.f32.mrf.mxu1 }
 0x15a   :  { %v2820_v14 = vpop.eup %2819  ;;  %2045 = vst [vmem:[%s3791_s5 + $0xd0] sm:$0xff] %v1972_v8  ;;  %v1900_v15 = vmax.f32 %v2818_v12, 0.0  ;;  %v1651_v16 = vmul.f32 1.442695, %v1543_v9  ;;  %v1471_v17 = vadd.f32 %v3581_v55, %v1279_v10  ;;  %v653_v18 = vpop.f32.mrf.mxu0 }
 0x15b   :  { %v1758_v19 = vadd.f32 1.0, %v2820_v14  ;;  %v1281_v20 = vpop.f32.mrf.mxu1 }
 0x15c   :  { %v1973_v21 = vmin.f32 %v1900_v15, 1.0  ;;  %2833 = vpow2.f32 %v1651_v16  ;;  %v1544_v22 = vsub.f32 0.0, %v1471_v17  ;;  %v1282_v23 = vadd.f32 %v1281_v20, %v653_v18  ;;  %v2400_v24 = vpop.f32.mrf.mxu0 }
 0x15d   :  { %v2822_v25 = vpop.eup %2821  ;;  %2835 = vrcp.f32 %v1758_v19  ;;  %v2550_v0 = vpop.f32.mrf.mxu1 }
 0x15e   :  { %v2824_v26 = vpop.eup %2823  ;;  %2046 = vst [vmem:[%s3791_s5 + $0xd8] sm:$0xff] %v1973_v21  ;;  %v1759_v27 = vadd.f32 1.0, %v2822_v25  ;;  %v1653_v28 = vmul.f32 1.442695, %v1544_v22  ;;  %v1472_v29 = vadd.f32 %v3581_v55, %v1282_v23  ;;  %v658_v30 = vpop.f32.mrf.mxu0 }
 0x15f   :  { %v1901_v31 = vmax.f32 %v2824_v26, 0.0  ;;  %v1286_v32 = vpop.f32.mrf.mxu1 }
 0x160   :  { %2837 = vrcp.f32 %v1759_v27  ;;  %v1545_v33 = vsub.f32 0.0, %v1472_v29  ;;  %v1287_v34 = vadd.f32 %v1286_v32, %v658_v30  ;;  %v2403_v35 = vpop.f32.mrf.mxu0 }
 0x161   :  { %v2826_v36 = vpop.eup %2825  ;;  %v1974_v37 = vmin.f32 %v1901_v31, 1.0  ;;  %2839 = vpow2.f32 %v1653_v28  ;;  %v2553_v38 = vpop.f32.mrf.mxu1 }
 0x162   :  { %v2828_v39 = vpop.eup %2827  ;;  %v1760_v40 = vadd.f32 1.0, %v2826_v36  ;;  %v1655_v41 = vmul.f32 1.442695, %v1545_v33  ;;  %v1473_v42 = vadd.f32 %v3581_v55, %v1287_v34  ;;  %v661_v43 = vpop.f32.mrf.mxu0 }
 0x163   :  { %2047 = vst [vmem:[%s3791_s5 + $0xe0] sm:$0xff] %v1974_v37  ;;  %v1902_v44 = vmax.f32 %v2828_v39, 0.0  ;;  %v1289_v45 = vpop.f32.mrf.mxu1 }
 0x164   :  { %2841 = vrcp.f32 %v1760_v40  ;;  %v1546_v46 = vsub.f32 0.0, %v1473_v42  ;;  %v1290_v47 = vadd.f32 %v1289_v45, %v661_v43  ;;  %v2404_v48 = vpop.f32.mrf.mxu0 }
 0x165   :  { %v2830_v49 = vpop.eup %2829  ;;  %v1975_v50 = vmin.f32 %v1902_v44, 1.0  ;;  %2843 = vpow2.f32 %v1655_v41  ;;  %v2554_v51 = vpop.f32.mrf.mxu1 }
 0x166   :  { %v2832_v52 = vpop.eup %2831  ;;  %v1761_v53 = vadd.f32 1.0, %v2830_v49  ;;  %v1657_v54 = vmul.f32 1.442695, %v1546_v46  ;;  %v1474_v56 = vadd.f32 %v3581_v55, %v1290_v47  ;;  %v666_v57 = vpop.f32.mrf.mxu0 }
 0x167   :  { %2048 = vst [vmem:[%s3791_s5 + $0xe8] sm:$0xff] %v1975_v50  ;;  %v1903_v58 = vmax.f32 %v2832_v52, 0.0  ;;  %v1294_v59 = vpop.f32.mrf.mxu1 }
 0x168   :  { %2845 = vrcp.f32 %v1761_v53  ;;  %v1547_v60 = vsub.f32 0.0, %v1474_v56  ;;  %v1295_v61 = vadd.f32 %v1294_v59, %v666_v57  ;;  %v2407_v62 = vpop.f32.mrf.mxu0 }
 0x169   :  { %v2834_v63 = vpop.eup %2833  ;;  %v1976_v1 = vmin.f32 %v1903_v58, 1.0  ;;  %2847 = vpow2.f32 %v1657_v54  ;;  %v2557_v2 = vpop.f32.mrf.mxu1 }
 0x16a   :  { %v2836_v3 = vpop.eup %2835  ;;  %v1762_v4 = vadd.f32 1.0, %v2834_v63  ;;  %v1659_v5 = vmul.f32 1.442695, %v1547_v60  ;;  %v1475_v6 = vadd.f32 %v3581_v55, %v1295_v61  ;;  %v669_v7 = vpop.f32.mrf.mxu0 }
 0x16b   :  { %2049 = vst [vmem:[%s3791_s5 + $0xf0] sm:$0xff] %v1976_v1  ;;  %v1904_v8 = vmax.f32 %v2836_v3, 0.0  ;;  %v1297_v9 = vpop.f32.mrf.mxu1 }
 0x16c   :  { %2849 = vrcp.f32 %v1762_v4  ;;  %v1548_v10 = vsub.f32 0.0, %v1475_v6  ;;  %v1298_v11 = vadd.f32 %v1297_v9, %v669_v7  ;;  %v2408_v12 = vpop.f32.mrf.mxu0 }
 0x16d   :  { %v2838_v13 = vpop.eup %2837  ;;  %v1977_v14 = vmin.f32 %v1904_v8, 1.0  ;;  %2851 = vpow2.f32 %v1659_v5  ;;  %v2558_v15 = vpop.f32.mrf.mxu1 }
 0x16e   :  { %v2840_v16 = vpop.eup %2839  ;;  %v1905_v17 = vmax.f32 %v2838_v13, 0.0  ;;  %v1661_v18 = vmul.f32 1.442695, %v1548_v10  ;;  %v1476_v19 = vadd.f32 %v3581_v55, %v1298_v11  ;;  %v674_v20 = vpop.f32.mrf.mxu0 }
 0x16f   :  { %2050 = vst [vmem:[%s3791_s5 + $0xf8] sm:$0xff] %v1977_v14  ;;  %v1763_v21 = vadd.f32 1.0, %v2840_v16  ;;  %v1302_v22 = vpop.f32.mrf.mxu1 }
 0x170   :  { %v1978_v23 = vmin.f32 %v1905_v17, 1.0  ;;  %2853 = vpow2.f32 %v1661_v18  ;;  %v1549_v24 = vsub.f32 0.0, %v1476_v19  ;;  %v1303_v25 = vadd.f32 %v1302_v22, %v674_v20  ;;  %v2411_v0 = vpop.f32.mrf.mxu0 }
 0x171   :  { %v2842_v26 = vpop.eup %2841  ;;  %2855 = vrcp.f32 %v1763_v21  ;;  %v2561_v27 = vpop.f32.mrf.mxu1 }
 0x172   :  { %v2844_v28 = vpop.eup %2843  ;;  %2051 = vst [vmem:[%s3791_s5 + $0x100] sm:$0xff] %v1978_v23  ;;  %v1906_v29 = vmax.f32 %v2842_v26, 0.0  ;;  %v1663_v30 = vmul.f32 1.442695, %v1549_v24  ;;  %v1477_v31 = vadd.f32 %v3581_v55, %v1303_v25  ;;  %v677_v32 = vpop.f32.mrf.mxu0 }
 0x173   :  { %v1764_v33 = vadd.f32 1.0, %v2844_v28  ;;  %v1305_v34 = vpop.f32.mrf.mxu1 }
 0x174   :  { %v1979_v35 = vmin.f32 %v1906_v29, 1.0  ;;  %2857 = vpow2.f32 %v1663_v30  ;;  %v1550_v36 = vsub.f32 0.0, %v1477_v31  ;;  %v1306_v37 = vadd.f32 %v1305_v34, %v677_v32  ;;  %v2412_v38 = vpop.f32.mrf.mxu0 }
 0x175   :  { %v2846_v39 = vpop.eup %2845  ;;  %2859 = vrcp.f32 %v1764_v33  ;;  %v2562_v40 = vpop.f32.mrf.mxu1 }
 0x176   :  { %v2848_v41 = vpop.eup %2847  ;;  %2052 = vst [vmem:[%s3791_s5 + $0x108] sm:$0xff] %v1979_v35  ;;  %v1907_v42 = vmax.f32 %v2846_v39, 0.0  ;;  %v1665_v43 = vmul.f32 1.442695, %v1550_v36  ;;  %v1478_v44 = vadd.f32 %v3581_v55, %v1306_v37  ;;  %v682_v45 = vpop.f32.mrf.mxu0 }
 0x177   :  { %v1765_v46 = vadd.f32 1.0, %v2848_v41  ;;  %v1310_v47 = vpop.f32.mrf.mxu1 }
 0x178   :  { %v1980_v48 = vmin.f32 %v1907_v42, 1.0  ;;  %2861 = vpow2.f32 %v1665_v43  ;;  %v1551_v49 = vsub.f32 0.0, %v1478_v44  ;;  %v1311_v50 = vadd.f32 %v1310_v47, %v682_v45  ;;  %v2415_v51 = vpop.f32.mrf.mxu0 }
 0x179   :  { %v2850_v52 = vpop.eup %2849  ;;  %2863 = vrcp.f32 %v1765_v46  ;;  %v2565_v53 = vpop.f32.mrf.mxu1 }
 0x17a   :  { %v2852_v54 = vpop.eup %2851  ;;  %2053 = vst [vmem:[%s3791_s5 + $0x110] sm:$0xff] %v1980_v48  ;;  %v1908_v56 = vmax.f32 %v2850_v52, 0.0  ;;  %v1667_v57 = vmul.f32 1.442695, %v1551_v49  ;;  %v1479_v58 = vadd.f32 %v3581_v55, %v1311_v50  ;;  %v685_v59 = vpop.f32.mrf.mxu0 }
 0x17b   :  { %v1766_v60 = vadd.f32 1.0, %v2852_v54  ;;  %v1313_v61 = vpop.f32.mrf.mxu1 }
 0x17c   :  { %v1981_v62 = vmin.f32 %v1908_v56, 1.0  ;;  %2865 = vpow2.f32 %v1667_v57  ;;  %v1552_v63 = vsub.f32 0.0, %v1479_v58  ;;  %v1314_v1 = vadd.f32 %v1313_v61, %v685_v59  ;;  %v2416_v2 = vpop.f32.mrf.mxu0 }
 0x17d   :  { %v2854_v3 = vpop.eup %2853  ;;  %2867 = vrcp.f32 %v1766_v60  ;;  %v2566_v4 = vpop.f32.mrf.mxu1 }
 0x17e   :  { %v2856_v5 = vpop.eup %2855  ;;  %2054 = vst [vmem:[%s3791_s5 + $0x118] sm:$0xff] %v1981_v62  ;;  %v1767_v6 = vadd.f32 1.0, %v2854_v3  ;;  %v1669_v7 = vmul.f32 1.442695, %v1552_v63  ;;  %v1480_v8 = vadd.f32 %v3581_v55, %v1314_v1  ;;  %v690_v9 = vpop.f32.mrf.mxu0 }
 0x17f   :  { %v1909_v10 = vmax.f32 %v2856_v5, 0.0  ;;  %v1318_v11 = vpop.f32.mrf.mxu1 }
 0x180   :  { %2869 = vrcp.f32 %v1767_v6  ;;  %v1553_v12 = vsub.f32 0.0, %v1480_v8  ;;  %v1319_v13 = vadd.f32 %v1318_v11, %v690_v9  ;;  %v2419_v14 = vpop.f32.mrf.mxu0 }
 0x181   :  { %v2858_v15 = vpop.eup %2857  ;;  %v1982_v16 = vmin.f32 %v1909_v10, 1.0  ;;  %2871 = vpow2.f32 %v1669_v7  ;;  %v2569_v17 = vpop.f32.mrf.mxu1 }
 0x182   :  { %v2860_v18 = vpop.eup %2859  ;;  %v1768_v19 = vadd.f32 1.0, %v2858_v15  ;;  %v1671_v20 = vmul.f32 1.442695, %v1553_v12  ;;  %v1481_v21 = vadd.f32 %v3581_v55, %v1319_v13  ;;  %v693_v22 = vpop.f32.mrf.mxu0 }
 0x183   :  { %2055 = vst [vmem:[%s3791_s5 + $0x120] sm:$0xff] %v1982_v16  ;;  %v1910_v23 = vmax.f32 %v2860_v18, 0.0  ;;  %v1321_v24 = vpop.f32.mrf.mxu1 }
 0x184   :  { %2873 = vrcp.f32 %v1768_v19  ;;  %v1554_v25 = vsub.f32 0.0, %v1481_v21  ;;  %v1322_v0 = vadd.f32 %v1321_v24, %v693_v22  ;;  %v2420_v26 = vpop.f32.mrf.mxu0 }
 0x185   :  { %v2862_v27 = vpop.eup %2861  ;;  %v1983_v28 = vmin.f32 %v1910_v23, 1.0  ;;  %2875 = vpow2.f32 %v1671_v20  ;;  %v2570_v29 = vpop.f32.mrf.mxu1 }
 0x186   :  { %v2864_v30 = vpop.eup %2863  ;;  %v1769_v31 = vadd.f32 1.0, %v2862_v27  ;;  %v1673_v32 = vmul.f32 1.442695, %v1554_v25  ;;  %v1482_v33 = vadd.f32 %v3581_v55, %v1322_v0  ;;  %v698_v34 = vpop.f32.mrf.mxu0 }
 0x187   :  { %2056 = vst [vmem:[%s3791_s5 + $0x128] sm:$0xff] %v1983_v28  ;;  %v1911_v35 = vmax.f32 %v2864_v30, 0.0  ;;  %v1326_v36 = vpop.f32.mrf.mxu1 }
 0x188   :  { %2877 = vrcp.f32 %v1769_v31  ;;  %v1555_v37 = vsub.f32 0.0, %v1482_v33  ;;  %v1327_v38 = vadd.f32 %v1326_v36, %v698_v34  ;;  %v2423_v39 = vpop.f32.mrf.mxu0 }
 0x189   :  { %v2866_v40 = vpop.eup %2865  ;;  %v1984_v41 = vmin.f32 %v1911_v35, 1.0  ;;  %2879 = vpow2.f32 %v1673_v32  ;;  %v2573_v42 = vpop.f32.mrf.mxu1 }
 0x18a   :  { %v2868_v43 = vpop.eup %2867  ;;  %v1770_v44 = vadd.f32 1.0, %v2866_v40  ;;  %v1675_v45 = vmul.f32 1.442695, %v1555_v37  ;;  %v1483_v46 = vadd.f32 %v3581_v55, %v1327_v38  ;;  %v701_v47 = vpop.f32.mrf.mxu0 }
 0x18b   :  { %2057 = vst [vmem:[%s3791_s5 + $0x130] sm:$0xff] %v1984_v41  ;;  %v1912_v48 = vmax.f32 %v2868_v43, 0.0  ;;  %v1329_v49 = vpop.f32.mrf.mxu1 }
 0x18c   :  { %2881 = vrcp.f32 %v1770_v44  ;;  %v1556_v50 = vsub.f32 0.0, %v1483_v46  ;;  %v1330_v51 = vadd.f32 %v1329_v49, %v701_v47  ;;  %v2424_v52 = vpop.f32.mrf.mxu0 }
 0x18d   :  { %v2870_v53 = vpop.eup %2869  ;;  %v1985_v54 = vmin.f32 %v1912_v48, 1.0  ;;  %2883 = vpow2.f32 %v1675_v45  ;;  %v2574_v56 = vpop.f32.mrf.mxu1 }
 0x18e   :  { %v2872_v57 = vpop.eup %2871  ;;  %v1913_v58 = vmax.f32 %v2870_v53, 0.0  ;;  %v1677_v59 = vmul.f32 1.442695, %v1556_v50  ;;  %v1484_v60 = vadd.f32 %v3581_v55, %v1330_v51  ;;  %v706_v61 = vpop.f32.mrf.mxu0 }
 0x18f   :  { %2058 = vst [vmem:[%s3791_s5 + $0x138] sm:$0xff] %v1985_v54  ;;  %v1771_v62 = vadd.f32 1.0, %v2872_v57  ;;  %v1334_v63 = vpop.f32.mrf.mxu1 }
 0x190   :  { %v1986_v1 = vmin.f32 %v1913_v58, 1.0  ;;  %2885 = vpow2.f32 %v1677_v59  ;;  %v1557_v2 = vsub.f32 0.0, %v1484_v60  ;;  %v1335_v3 = vadd.f32 %v1334_v63, %v706_v61  ;;  %v2427_v4 = vpop.f32.mrf.mxu0 }
 0x191   :  { %v2874_v5 = vpop.eup %2873  ;;  %2887 = vrcp.f32 %v1771_v62  ;;  %v2577_v6 = vpop.f32.mrf.mxu1 }
 0x192   :  { %v2876_v7 = vpop.eup %2875  ;;  %2059 = vst [vmem:[%s3791_s5 + $0x140] sm:$0xff] %v1986_v1  ;;  %v1914_v8 = vmax.f32 %v2874_v5, 0.0  ;;  %v1679_v9 = vmul.f32 1.442695, %v1557_v2  ;;  %v1485_v10 = vadd.f32 %v3581_v55, %v1335_v3  ;;  %v709_v11 = vpop.f32.mrf.mxu0 }
 0x193   :  { %v1772_v12 = vadd.f32 1.0, %v2876_v7  ;;  %v1337_v13 = vpop.f32.mrf.mxu1 }
 0x194   :  { %v1987_v14 = vmin.f32 %v1914_v8, 1.0  ;;  %2889 = vpow2.f32 %v1679_v9  ;;  %v1558_v15 = vsub.f32 0.0, %v1485_v10  ;;  %v1338_v16 = vadd.f32 %v1337_v13, %v709_v11  ;;  %v2428_v17 = vpop.f32.mrf.mxu0 }
 0x195   :  { %v2878_v18 = vpop.eup %2877  ;;  %2891 = vrcp.f32 %v1772_v12  ;;  %v2578_v19 = vpop.f32.mrf.mxu1 }
 0x196   :  { %v2880_v20 = vpop.eup %2879  ;;  %2060 = vst [vmem:[%s3791_s5 + $0x148] sm:$0xff] %v1987_v14  ;;  %v1915_v21 = vmax.f32 %v2878_v18, 0.0  ;;  %v1681_v22 = vmul.f32 1.442695, %v1558_v15  ;;  %v1486_v23 = vadd.f32 %v3581_v55, %v1338_v16  ;;  %v714_v24 = vpop.f32.mrf.mxu0 }
 0x197   :  { %v1773_v25 = vadd.f32 1.0, %v2880_v20  ;;  %v1342_v0 = vpop.f32.mrf.mxu1 }
 0x198   :  { %v1988_v26 = vmin.f32 %v1915_v21, 1.0  ;;  %2893 = vpow2.f32 %v1681_v22  ;;  %v1559_v27 = vsub.f32 0.0, %v1486_v23  ;;  %v1343_v28 = vadd.f32 %v1342_v0, %v714_v24  ;;  %v2431_v29 = vpop.f32.mrf.mxu0 }
 0x199   :  { %v2882_v30 = vpop.eup %2881  ;;  %2895 = vrcp.f32 %v1773_v25  ;;  %v2581_v31 = vpop.f32.mrf.mxu1 }
 0x19a   :  { %v2884_v32 = vpop.eup %2883  ;;  %2061 = vst [vmem:[%s3791_s5 + $0x150] sm:$0xff] %v1988_v26  ;;  %v1916_v33 = vmax.f32 %v2882_v30, 0.0  ;;  %v1683_v34 = vmul.f32 1.442695, %v1559_v27  ;;  %v1487_v35 = vadd.f32 %v3581_v55, %v1343_v28  ;;  %v717_v36 = vpop.f32.mrf.mxu0 }
 0x19b   :  { %v1774_v37 = vadd.f32 1.0, %v2884_v32  ;;  %v1345_v38 = vpop.f32.mrf.mxu1 }
 0x19c   :  { %v1989_v39 = vmin.f32 %v1916_v33, 1.0  ;;  %2897 = vpow2.f32 %v1683_v34  ;;  %v1560_v40 = vsub.f32 0.0, %v1487_v35  ;;  %v1346_v41 = vadd.f32 %v1345_v38, %v717_v36  ;;  %v2432_v42 = vpop.f32.mrf.mxu0 }
 0x19d   :  { %v2886_v43 = vpop.eup %2885  ;;  %2899 = vrcp.f32 %v1774_v37  ;;  %v2582_v44 = vpop.f32.mrf.mxu1 }
 0x19e   :  { %v2888_v45 = vpop.eup %2887  ;;  %2062 = vst [vmem:[%s3791_s5 + $0x158] sm:$0xff] %v1989_v39  ;;  %v1775_v46 = vadd.f32 1.0, %v2886_v43  ;;  %v1685_v47 = vmul.f32 1.442695, %v1560_v40  ;;  %v1488_v48 = vadd.f32 %v3581_v55, %v1346_v41  ;;  %v722_v49 = vpop.f32.mrf.mxu0 }
 0x19f   :  { %v1917_v50 = vmax.f32 %v2888_v45, 0.0  ;;  %v1350_v51 = vpop.f32.mrf.mxu1 }
 0x1a0   :  { %2901 = vrcp.f32 %v1775_v46  ;;  %v1561_v52 = vsub.f32 0.0, %v1488_v48  ;;  %v1351_v53 = vadd.f32 %v1350_v51, %v722_v49  ;;  %v2435_v54 = vpop.f32.mrf.mxu0 }
 0x1a1   :  { %v2890_v56 = vpop.eup %2889  ;;  %v1990_v57 = vmin.f32 %v1917_v50, 1.0  ;;  %2903 = vpow2.f32 %v1685_v47  ;;  %v2585_v58 = vpop.f32.mrf.mxu1 }
 0x1a2   :  { %v2892_v59 = vpop.eup %2891  ;;  %v1776_v60 = vadd.f32 1.0, %v2890_v56  ;;  %v1687_v61 = vmul.f32 1.442695, %v1561_v52  ;;  %v1489_v62 = vadd.f32 %v3581_v55, %v1351_v53  ;;  %v725_v63 = vpop.f32.mrf.mxu0 }
 0x1a3   :  { %2063 = vst [vmem:[%s3791_s5 + $0x160] sm:$0xff] %v1990_v57  ;;  %v1918_v1 = vmax.f32 %v2892_v59, 0.0  ;;  %v1353_v2 = vpop.f32.mrf.mxu1 }
 0x1a4   :  { %2905 = vrcp.f32 %v1776_v60  ;;  %v1562_v3 = vsub.f32 0.0, %v1489_v62  ;;  %v1354_v4 = vadd.f32 %v1353_v2, %v725_v63  ;;  %v2436_v5 = vpop.f32.mrf.mxu0 }
 0x1a5   :  { %v2894_v6 = vpop.eup %2893  ;;  %v1991_v7 = vmin.f32 %v1918_v1, 1.0  ;;  %2907 = vpow2.f32 %v1687_v61  ;;  %v2586_v8 = vpop.f32.mrf.mxu1 }
 0x1a6   :  { %v2896_v9 = vpop.eup %2895  ;;  %v1777_v10 = vadd.f32 1.0, %v2894_v6  ;;  %v1689_v11 = vmul.f32 1.442695, %v1562_v3  ;;  %v1490_v12 = vadd.f32 %v3581_v55, %v1354_v4  ;;  %v730_v13 = vpop.f32.mrf.mxu0 }
 0x1a7   :  { %2064 = vst [vmem:[%s3791_s5 + $0x168] sm:$0xff] %v1991_v7  ;;  %v1919_v14 = vmax.f32 %v2896_v9, 0.0  ;;  %v1358_v15 = vpop.f32.mrf.mxu1 }
 0x1a8   :  { %2909 = vrcp.f32 %v1777_v10  ;;  %v1563_v16 = vsub.f32 0.0, %v1490_v12  ;;  %v1359_v17 = vadd.f32 %v1358_v15, %v730_v13  ;;  %v2439_v18 = vpop.f32.mrf.mxu0 }
 0x1a9   :  { %v2898_v19 = vpop.eup %2897  ;;  %v1992_v20 = vmin.f32 %v1919_v14, 1.0  ;;  %2911 = vpow2.f32 %v1689_v11  ;;  %v2589_v21 = vpop.f32.mrf.mxu1 }
 0x1aa   :  { %v2900_v22 = vpop.eup %2899  ;;  %v1778_v23 = vadd.f32 1.0, %v2898_v19  ;;  %v1691_v24 = vmul.f32 1.442695, %v1563_v16  ;;  %v1491_v25 = vadd.f32 %v3581_v55, %v1359_v17  ;;  %v733_v0 = vpop.f32.mrf.mxu0 }
 0x1ab   :  { %2065 = vst [vmem:[%s3791_s5 + $0x170] sm:$0xff] %v1992_v20  ;;  %v1920_v26 = vmax.f32 %v2900_v22, 0.0  ;;  %v1361_v27 = vpop.f32.mrf.mxu1 }
 0x1ac   :  { %2913 = vrcp.f32 %v1778_v23  ;;  %v1564_v28 = vsub.f32 0.0, %v1491_v25  ;;  %v1362_v29 = vadd.f32 %v1361_v27, %v733_v0  ;;  %v2440_v30 = vpop.f32.mrf.mxu0 }
 0x1ad   :  { %v2902_v31 = vpop.eup %2901  ;;  %v1993_v32 = vmin.f32 %v1920_v26, 1.0  ;;  %2915 = vpow2.f32 %v1691_v24  ;;  %v2590_v33 = vpop.f32.mrf.mxu1 }
 0x1ae   :  { %v2904_v34 = vpop.eup %2903  ;;  %v1921_v35 = vmax.f32 %v2902_v31, 0.0  ;;  %v1693_v36 = vmul.f32 1.442695, %v1564_v28  ;;  %v1492_v37 = vadd.f32 %v3581_v55, %v1362_v29  ;;  %v738_v38 = vpop.f32.mrf.mxu0 }
 0x1af   :  { %2066 = vst [vmem:[%s3791_s5 + $0x178] sm:$0xff] %v1993_v32  ;;  %v1779_v39 = vadd.f32 1.0, %v2904_v34  ;;  %v1366_v40 = vpop.f32.mrf.mxu1 }
 0x1b0   :  { %v1994_v41 = vmin.f32 %v1921_v35, 1.0  ;;  %2917 = vpow2.f32 %v1693_v36  ;;  %v1565_v42 = vsub.f32 0.0, %v1492_v37  ;;  %v1367_v43 = vadd.f32 %v1366_v40, %v738_v38  ;;  %v2443_v44 = vpop.f32.mrf.mxu0 }
 0x1b1   :  { %v2906_v45 = vpop.eup %2905  ;;  %2919 = vrcp.f32 %v1779_v39  ;;  %v2593_v46 = vpop.f32.mrf.mxu1 }
 0x1b2   :  { %v2908_v47 = vpop.eup %2907  ;;  %2067 = vst [vmem:[%s3791_s5 + $0x180] sm:$0xff] %v1994_v41  ;;  %v1922_v48 = vmax.f32 %v2906_v45, 0.0  ;;  %v1695_v49 = vmul.f32 1.442695, %v1565_v42  ;;  %v1493_v50 = vadd.f32 %v3581_v55, %v1367_v43  ;;  %v741_v51 = vpop.f32.mrf.mxu0 }
 0x1b3   :  { %v1780_v52 = vadd.f32 1.0, %v2908_v47  ;;  %v1369_v53 = vpop.f32.mrf.mxu1 }
 0x1b4   :  { %v1995_v54 = vmin.f32 %v1922_v48, 1.0  ;;  %2921 = vpow2.f32 %v1695_v49  ;;  %v1566_v56 = vsub.f32 0.0, %v1493_v50  ;;  %v1370_v57 = vadd.f32 %v1369_v53, %v741_v51  ;;  %v2444_v58 = vpop.f32.mrf.mxu0 }
 0x1b5   :  { %v2910_v59 = vpop.eup %2909  ;;  %2923 = vrcp.f32 %v1780_v52  ;;  %v2594_v60 = vpop.f32.mrf.mxu1 }
 0x1b6   :  { %v2912_v61 = vpop.eup %2911  ;;  %2068 = vst [vmem:[%s3791_s5 + $0x188] sm:$0xff] %v1995_v54  ;;  %v1923_v62 = vmax.f32 %v2910_v59, 0.0  ;;  %v1697_v63 = vmul.f32 1.442695, %v1566_v56  ;;  %v1494_v1 = vadd.f32 %v3581_v55, %v1370_v57  ;;  %v746_v2 = vpop.f32.mrf.mxu0 }
 0x1b7   :  { %v1781_v3 = vadd.f32 1.0, %v2912_v61  ;;  %v1374_v4 = vpop.f32.mrf.mxu1 }
 0x1b8   :  { %v1996_v5 = vmin.f32 %v1923_v62, 1.0  ;;  %2925 = vpow2.f32 %v1697_v63  ;;  %v1567_v6 = vsub.f32 0.0, %v1494_v1  ;;  %v1375_v7 = vadd.f32 %v1374_v4, %v746_v2  ;;  %v2447_v8 = vpop.f32.mrf.mxu0 }
 0x1b9   :  { %v2914_v9 = vpop.eup %2913  ;;  %2927 = vrcp.f32 %v1781_v3  ;;  %v2597_v10 = vpop.f32.mrf.mxu1 }
 0x1ba   :  { %v2916_v11 = vpop.eup %2915  ;;  %2069 = vst [vmem:[%s3791_s5 + $0x190] sm:$0xff] %v1996_v5  ;;  %v1924_v12 = vmax.f32 %v2914_v9, 0.0  ;;  %v1699_v13 = vmul.f32 1.442695, %v1567_v6  ;;  %v1495_v14 = vadd.f32 %v3581_v55, %v1375_v7  ;;  %v749_v15 = vpop.f32.mrf.mxu0 }
 0x1bb   :  { %v1782_v16 = vadd.f32 1.0, %v2916_v11  ;;  %v1377_v17 = vpop.f32.mrf.mxu1 }
 0x1bc   :  { %v1997_v18 = vmin.f32 %v1924_v12, 1.0  ;;  %2929 = vpow2.f32 %v1699_v13  ;;  %v1568_v19 = vsub.f32 0.0, %v1495_v14  ;;  %v1378_v20 = vadd.f32 %v1377_v17, %v749_v15  ;;  %v2448_v21 = vpop.f32.mrf.mxu0 }
 0x1bd   :  { %v2918_v22 = vpop.eup %2917  ;;  %2931 = vrcp.f32 %v1782_v16  ;;  %v2598_v23 = vpop.f32.mrf.mxu1 }
 0x1be   :  { %v2920_v24 = vpop.eup %2919  ;;  %2070 = vst [vmem:[%s3791_s5 + $0x198] sm:$0xff] %v1997_v18  ;;  %v1783_v25 = vadd.f32 1.0, %v2918_v22  ;;  %v1701_v0 = vmul.f32 1.442695, %v1568_v19  ;;  %v1496_v26 = vadd.f32 %v3581_v55, %v1378_v20  ;;  %v754_v27 = vpop.f32.mrf.mxu0 }
 0x1bf   :  { %v1925_v28 = vmax.f32 %v2920_v24, 0.0  ;;  %v1382_v29 = vpop.f32.mrf.mxu1 }
 0x1c0   :  { %2933 = vrcp.f32 %v1783_v25  ;;  %v1569_v30 = vsub.f32 0.0, %v1496_v26  ;;  %v1383_v31 = vadd.f32 %v1382_v29, %v754_v27  ;;  %v2451_v32 = vpop.f32.mrf.mxu0 }
 0x1c1   :  { %v2922_v33 = vpop.eup %2921  ;;  %v1998_v34 = vmin.f32 %v1925_v28, 1.0  ;;  %2935 = vpow2.f32 %v1701_v0  ;;  %v2601_v35 = vpop.f32.mrf.mxu1 }
 0x1c2   :  { %v2924_v36 = vpop.eup %2923  ;;  %v1784_v37 = vadd.f32 1.0, %v2922_v33  ;;  %v1703_v38 = vmul.f32 1.442695, %v1569_v30  ;;  %v1497_v39 = vadd.f32 %v3581_v55, %v1383_v31  ;;  %v757_v40 = vpop.f32.mrf.mxu0  ;;  %v3714_v55 = vld [vmem:[%s3790_s4] ss:$0 sm:$0xff] }
 0x1c3   :  { %2071 = vst [vmem:[%s3791_s5 + $0x1a0] sm:$0xff] %v1998_v34  ;;  %v1926_v41 = vmax.f32 %v2924_v36, 0.0  ;;  %v1385_v42 = vpop.f32.mrf.mxu1 }
 0x1c4   :  { %2937 = vrcp.f32 %v1784_v37  ;;  %v1570_v43 = vsub.f32 0.0, %v1497_v39  ;;  %v1386_v44 = vadd.f32 %v1385_v42, %v757_v40  ;;  %v2452_v45 = vpop.f32.mrf.mxu0 }
 0x1c5   :  { %v2926_v46 = vpop.eup %2925  ;;  %v1999_v47 = vmin.f32 %v1926_v41, 1.0  ;;  %2939 = vpow2.f32 %v1703_v38  ;;  %v2602_v48 = vpop.f32.mrf.mxu1 }
 0x1c6   :  { %v2928_v49 = vpop.eup %2927  ;;  %v1785_v50 = vadd.f32 1.0, %v2926_v46  ;;  %v1705_v51 = vmul.f32 1.442695, %v1570_v43  ;;  %v1498_v52 = vadd.f32 %v3714_v55, %v1386_v44  ;;  %v762_v53 = vpop.f32.mrf.mxu0 }
 0x1c7   :  { %2072 = vst [vmem:[%s3791_s5 + $0x1a8] sm:$0xff] %v1999_v47  ;;  %v1927_v54 = vmax.f32 %v2928_v49, 0.0  ;;  %v1390_v56 = vpop.f32.mrf.mxu1 }
 0x1c8   :  { %2941 = vrcp.f32 %v1785_v50  ;;  %v1571_v57 = vsub.f32 0.0, %v1498_v52  ;;  %v1391_v58 = vadd.f32 %v1390_v56, %v762_v53  ;;  %v2455_v59 = vpop.f32.mrf.mxu0 }
 0x1c9   :  { %v2930_v60 = vpop.eup %2929  ;;  %v2000_v61 = vmin.f32 %v1927_v54, 1.0  ;;  %2943 = vpow2.f32 %v1705_v51  ;;  %v2605_v62 = vpop.f32.mrf.mxu1 }
 0x1ca   :  { %v2932_v63 = vpop.eup %2931  ;;  %v1786_v1 = vadd.f32 1.0, %v2930_v60  ;;  %v1707_v2 = vmul.f32 1.442695, %v1571_v57  ;;  %v1499_v3 = vadd.f32 %v3714_v55, %v1391_v58  ;;  %v765_v4 = vpop.f32.mrf.mxu0 }
 0x1cb   :  { %2073 = vst [vmem:[%s3791_s5 + $0x1b0] sm:$0xff] %v2000_v61  ;;  %v1928_v5 = vmax.f32 %v2932_v63, 0.0  ;;  %v1393_v6 = vpop.f32.mrf.mxu1 }
 0x1cc   :  { %2945 = vrcp.f32 %v1786_v1  ;;  %v1572_v7 = vsub.f32 0.0, %v1499_v3  ;;  %v1394_v8 = vadd.f32 %v1393_v6, %v765_v4  ;;  %v2456_v9 = vpop.f32.mrf.mxu0 }
 0x1cd   :  { %v2934_v10 = vpop.eup %2933  ;;  %v2001_v11 = vmin.f32 %v1928_v5, 1.0  ;;  %2947 = vpow2.f32 %v1707_v2  ;;  %v2606_v12 = vpop.f32.mrf.mxu1 }
 0x1ce   :  { %v2936_v13 = vpop.eup %2935  ;;  %v1929_v14 = vmax.f32 %v2934_v10, 0.0  ;;  %v1709_v15 = vmul.f32 1.442695, %v1572_v7  ;;  %v1500_v16 = vadd.f32 %v3714_v55, %v1394_v8  ;;  %v770_v17 = vpop.f32.mrf.mxu0 }
 0x1cf   :  { %2074 = vst [vmem:[%s3791_s5 + $0x1b8] sm:$0xff] %v2001_v11  ;;  %v1787_v18 = vadd.f32 1.0, %v2936_v13  ;;  %v1398_v19 = vpop.f32.mrf.mxu1 }
 0x1d0   :  { %v2002_v20 = vmin.f32 %v1929_v14, 1.0  ;;  %2949 = vpow2.f32 %v1709_v15  ;;  %v1573_v21 = vsub.f32 0.0, %v1500_v16  ;;  %v1399_v22 = vadd.f32 %v1398_v19, %v770_v17  ;;  %v2459_v23 = vpop.f32.mrf.mxu0 }
 0x1d1   :  { %v2938_v24 = vpop.eup %2937  ;;  %2951 = vrcp.f32 %v1787_v18  ;;  %v2609_v25 = vpop.f32.mrf.mxu1 }
 0x1d2   :  { %v2940_v0 = vpop.eup %2939  ;;  %2075 = vst [vmem:[%s3791_s5 + $0x1c0] sm:$0xff] %v2002_v20  ;;  %v1930_v26 = vmax.f32 %v2938_v24, 0.0  ;;  %v1711_v27 = vmul.f32 1.442695, %v1573_v21  ;;  %v1501_v28 = vadd.f32 %v3714_v55, %v1399_v22  ;;  %v773_v29 = vpop.f32.mrf.mxu0 }
 0x1d3   :  { %v1788_v30 = vadd.f32 1.0, %v2940_v0  ;;  %v1401_v31 = vpop.f32.mrf.mxu1 }
 0x1d4   :  { %v2003_v32 = vmin.f32 %v1930_v26, 1.0  ;;  %2953 = vpow2.f32 %v1711_v27  ;;  %v1574_v33 = vsub.f32 0.0, %v1501_v28  ;;  %v1402_v34 = vadd.f32 %v1401_v31, %v773_v29  ;;  %v2460_v35 = vpop.f32.mrf.mxu0 }
 0x1d5   :  { %v2942_v36 = vpop.eup %2941  ;;  %2955 = vrcp.f32 %v1788_v30  ;;  %v2610_v37 = vpop.f32.mrf.mxu1 }
 0x1d6   :  { %v2944_v38 = vpop.eup %2943  ;;  %2076 = vst [vmem:[%s3791_s5 + $0x1c8] sm:$0xff] %v2003_v32  ;;  %v1931_v39 = vmax.f32 %v2942_v36, 0.0  ;;  %v1713_v40 = vmul.f32 1.442695, %v1574_v33  ;;  %v1502_v41 = vadd.f32 %v3714_v55, %v1402_v34  ;;  %v778_v42 = vpop.f32.mrf.mxu0 }
 0x1d7   :  { %v1789_v43 = vadd.f32 1.0, %v2944_v38  ;;  %v1406_v44 = vpop.f32.mrf.mxu1 }
 0x1d8   :  { %v2004_v45 = vmin.f32 %v1931_v39, 1.0  ;;  %2957 = vpow2.f32 %v1713_v40  ;;  %v1575_v46 = vsub.f32 0.0, %v1502_v41  ;;  %v1407_v47 = vadd.f32 %v1406_v44, %v778_v42  ;;  %v2463_v48 = vpop.f32.mrf.mxu0 }
 0x1d9   :  { %v2946_v49 = vpop.eup %2945  ;;  %2959 = vrcp.f32 %v1789_v43  ;;  %v2613_v50 = vpop.f32.mrf.mxu1 }
 0x1da   :  { %v2948_v51 = vpop.eup %2947  ;;  %2077 = vst [vmem:[%s3791_s5 + $0x1d0] sm:$0xff] %v2004_v45  ;;  %v1932_v52 = vmax.f32 %v2946_v49, 0.0  ;;  %v1715_v53 = vmul.f32 1.442695, %v1575_v46  ;;  %v1503_v54 = vadd.f32 %v3714_v55, %v1407_v47  ;;  %v781_v56 = vpop.f32.mrf.mxu0 }
 0x1db   :  { %v1790_v57 = vadd.f32 1.0, %v2948_v51  ;;  %v1409_v58 = vpop.f32.mrf.mxu1 }
 0x1dc   :  { %v2005_v59 = vmin.f32 %v1932_v52, 1.0  ;;  %2961 = vpow2.f32 %v1715_v53  ;;  %v1576_v60 = vsub.f32 0.0, %v1503_v54  ;;  %v1410_v61 = vadd.f32 %v1409_v58, %v781_v56  ;;  %v2464_v62 = vpop.f32.mrf.mxu0 }
 0x1dd   :  { %v2950_v63 = vpop.eup %2949  ;;  %2963 = vrcp.f32 %v1790_v57  ;;  %v2614_v1 = vpop.f32.mrf.mxu1 }
 0x1de   :  { %v2952_v2 = vpop.eup %2951  ;;  %2078 = vst [vmem:[%s3791_s5 + $0x1d8] sm:$0xff] %v2005_v59  ;;  %v1791_v3 = vadd.f32 1.0, %v2950_v63  ;;  %v1717_v4 = vmul.f32 1.442695, %v1576_v60  ;;  %v1504_v5 = vadd.f32 %v3714_v55, %v1410_v61  ;;  %v786_v6 = vpop.f32.mrf.mxu0 }
 0x1df   :  { %v1933_v7 = vmax.f32 %v2952_v2, 0.0  ;;  %v1414_v8 = vpop.f32.mrf.mxu1 }
 0x1e0   :  { %2965 = vrcp.f32 %v1791_v3  ;;  %v1577_v9 = vsub.f32 0.0, %v1504_v5  ;;  %v1415_v10 = vadd.f32 %v1414_v8, %v786_v6  ;;  %v2467_v11 = vpop.f32.mrf.mxu0 }
 0x1e1   :  { %v2954_v12 = vpop.eup %2953  ;;  %v2006_v13 = vmin.f32 %v1933_v7, 1.0  ;;  %2967 = vpow2.f32 %v1717_v4  ;;  %v2617_v14 = vpop.f32.mrf.mxu1 }
 0x1e2   :  { %v2956_v15 = vpop.eup %2955  ;;  %v1792_v16 = vadd.f32 1.0, %v2954_v12  ;;  %v1719_v17 = vmul.f32 1.442695, %v1577_v9  ;;  %v1505_v18 = vadd.f32 %v3714_v55, %v1415_v10  ;;  %v789_v19 = vpop.f32.mrf.mxu0 }
 0x1e3   :  { %2079 = vst [vmem:[%s3791_s5 + $0x1e0] sm:$0xff] %v2006_v13  ;;  %v1934_v20 = vmax.f32 %v2956_v15, 0.0  ;;  %v1417_v21 = vpop.f32.mrf.mxu1 }
 0x1e4   :  { %2969 = vrcp.f32 %v1792_v16  ;;  %v1578_v22 = vsub.f32 0.0, %v1505_v18  ;;  %v1418_v23 = vadd.f32 %v1417_v21, %v789_v19  ;;  %v2468_v24 = vpop.f32.mrf.mxu0 }
 0x1e5   :  { %v2958_v25 = vpop.eup %2957  ;;  %v2007_v0 = vmin.f32 %v1934_v20, 1.0  ;;  %2971 = vpow2.f32 %v1719_v17  ;;  %v2618_v26 = vpop.f32.mrf.mxu1 }
 0x1e6   :  { %v2960_v27 = vpop.eup %2959  ;;  %v1793_v28 = vadd.f32 1.0, %v2958_v25  ;;  %v1721_v29 = vmul.f32 1.442695, %v1578_v22  ;;  %v1506_v30 = vadd.f32 %v3714_v55, %v1418_v23  ;;  %v794_v31 = vpop.f32.mrf.mxu0 }
 0x1e7   :  { %2080 = vst [vmem:[%s3791_s5 + $0x1e8] sm:$0xff] %v2007_v0  ;;  %v1935_v32 = vmax.f32 %v2960_v27, 0.0  ;;  %v1422_v33 = vpop.f32.mrf.mxu1 }
 0x1e8   :  { %2973 = vrcp.f32 %v1793_v28  ;;  %v1579_v34 = vsub.f32 0.0, %v1506_v30  ;;  %v1423_v35 = vadd.f32 %v1422_v33, %v794_v31  ;;  %v2471_v36 = vpop.f32.mrf.mxu0 }
 0x1e9   :  { %v2962_v37 = vpop.eup %2961  ;;  %v2008_v38 = vmin.f32 %v1935_v32, 1.0  ;;  %2975 = vpow2.f32 %v1721_v29  ;;  %v2621_v39 = vpop.f32.mrf.mxu1 }
 0x1ea   :  { %v2964_v40 = vpop.eup %2963  ;;  %v1794_v41 = vadd.f32 1.0, %v2962_v37  ;;  %v1723_v42 = vmul.f32 1.442695, %v1579_v34  ;;  %v1507_v43 = vadd.f32 %v3714_v55, %v1423_v35  ;;  %v797_v44 = vpop.f32.mrf.mxu0 }
 0x1eb   :  { %2081 = vst [vmem:[%s3791_s5 + $0x1f0] sm:$0xff] %v2008_v38  ;;  %v1936_v45 = vmax.f32 %v2964_v40, 0.0  ;;  %v1425_v46 = vpop.f32.mrf.mxu1 }
 0x1ec   :  { %2977 = vrcp.f32 %v1794_v41  ;;  %v1580_v47 = vsub.f32 0.0, %v1507_v43  ;;  %v2472_v48 = vpop.f32.mrf.mxu0 }
 0x1ed   :  { %v2966_v49 = vpop.eup %2965  ;;  %v2009_v50 = vmin.f32 %v1936_v45, 1.0  ;;  %2979 = vpow2.f32 %v1723_v42  ;;  %v2622_v51 = vpop.f32.mrf.mxu1 }
 0x1ee   :  { %v2968_v52 = vpop.eup %2967  ;;  %v1937_v53 = vmax.f32 %v2966_v49, 0.0  ;;  %v1725_v54 = vmul.f32 1.442695, %v1580_v47 }
 0x1ef   :  { %2082 = vst [vmem:[%s3791_s5 + $0x1f8] sm:$0xff] %v2009_v50  ;;  %v1795_v55 = vadd.f32 1.0, %v2968_v52 }
 0x1f0   :  { %v2010_v56 = vmin.f32 %v1937_v53, 1.0  ;;  %2981 = vpow2.f32 %v1725_v54 }
 0x1f1   :  { %v2970_v57 = vpop.eup %2969  ;;  %2983 = vrcp.f32 %v1795_v55 }
 0x1f2   :  { %v2972_v58 = vpop.eup %2971  ;;  %2083 = vst [vmem:[%s3791_s5 + $0x200] sm:$0xff] %v2010_v56  ;;  %v1938_v59 = vmax.f32 %v2970_v57, 0.0 }
 0x1f3   :  { %v1796_v60 = vadd.f32 1.0, %v2972_v58 }
 0x1f4   :  { %v2011_v61 = vmin.f32 %v1938_v59, 1.0 }
 0x1f5   :  { %v2974_v62 = vpop.eup %2973  ;;  %2985 = vrcp.f32 %v1796_v60 }
 0x1f6   :  { %v2976_v63 = vpop.eup %2975  ;;  %2084 = vst [vmem:[%s3791_s5 + $0x208] sm:$0xff] %v2011_v61  ;;  %v1939_v1 = vmax.f32 %v2974_v62, 0.0 }
 0x1f7   :  { %v1797_v2 = vadd.f32 1.0, %v2976_v63 }
 0x1f8   :  { %v2012_v3 = vmin.f32 %v1939_v1, 1.0 }
 0x1f9   :  { %v2978_v4 = vpop.eup %2977  ;;  %2987 = vrcp.f32 %v1797_v2 }
 0x1fa   :  { %v2980_v5 = vpop.eup %2979  ;;  %2085 = vst [vmem:[%s3791_s5 + $0x210] sm:$0xff] %v2012_v3  ;;  %v1940_v6 = vmax.f32 %v2978_v4, 0.0 }
 0x1fb   :  { %v1798_v7 = vadd.f32 1.0, %v2980_v5 }
 0x1fc   :  { %v2013_v8 = vmin.f32 %v1940_v6, 1.0 }
 0x1fd   :  { %v2982_v9 = vpop.eup %2981  ;;  %2989 = vrcp.f32 %v1798_v7 }
 0x1fe   :  { %v2984_v10 = vpop.eup %2983  ;;  %2086 = vst [vmem:[%s3791_s5 + $0x218] sm:$0xff] %v2013_v8  ;;  %v1799_v11 = vadd.f32 1.0, %v2982_v9 }
 0x1ff   :  { %v1941_v12 = vmax.f32 %v2984_v10, 0.0 }
 0x200   :  { %2991 = vrcp.f32 %v1799_v11 }
 0x201   :  { %v2014_v13 = vmin.f32 %v1941_v12, 1.0 }
 0x202   :  { %v2986_v14 = vpop.eup %2985 }
 0x203   :  { %2087 = vst [vmem:[%s3791_s5 + $0x220] sm:$0xff] %v2014_v13  ;;  %v1942_v15 = vmax.f32 %v2986_v14, 0.0 }
 0x205   :  { %v2015_v16 = vmin.f32 %v1942_v15, 1.0 }
 0x206   :  { %v2988_v17 = vpop.eup %2987 }
 0x207   :  { %2088 = vst [vmem:[%s3791_s5 + $0x228] sm:$0xff] %v2015_v16  ;;  %v1943_v18 = vmax.f32 %v2988_v17, 0.0 }
 0x209   :  { %v2016_v19 = vmin.f32 %v1943_v18, 1.0 }
 0x20a   :  { %v2990_v20 = vpop.eup %2989 }
 0x20b   :  { %2089 = vst [vmem:[%s3791_s5 + $0x230] sm:$0xff] %v2016_v19  ;;  %v1944_v21 = vmax.f32 %v2990_v20, 0.0 }
 0x20d   :  { %v2992_v22 = vpop.eup %2991  ;;  %v2017_v23 = vmin.f32 %v1944_v21, 1.0 }
 0x20e   :  { %v1945_v24 = vmax.f32 %v2992_v22, 0.0 }
 0x20f   :  { %2090 = vst [vmem:[%s3791_s5 + $0x238] sm:$0xff] %v2017_v23 }
 0x210   :  { %v2018_v25 = vmin.f32 %v1945_v24, 1.0 }
 0x212   :  { %2091 = vst [vmem:[%s3791_s5 + $0x240] sm:$0xff] %v2018_v25 }

</bundles_post_ra>
